<compile_context>
chip_gen: v7x
topology: tpu7x:2x2x1
jax: 0.10.0
libtpu: 0.0.40
codegen_flags: <defaults>
</compile_context>

<pallas_src>
import jax
import jax.numpy as jnp
import numpy as np
from jax import lax
from jax.experimental import pallas as pl
from jax.experimental.pallas import tpu as pltpu

# fc1 = Linear(6*28*28, 10) pins the shapes: 1 input channel, 28x28 spatial.
N = 2
H = W = 28
C_IN, C_MID, C_PAD = 1, 6, 8
NUM_CLASSES = 10
NO = N * NUM_CLASSES            # 20 logits total (both images)

HP, WP = H + 2, W + 2           # zero-padded plane (30 x 30)
SP = HP * WP                    # 900 flattened padded pixels per image
S = N * SP                      # 1800 lanes of real data (both images)
LEFT = 128                      # lane margin so every tap slice is in-bounds
BUF = LEFT + S + 32             # 1960

TAPS = 9
TAPR = TAPS * C_PAD + C_PAD     # 80 = 72 tap rows + 8 constant-one bias rows
BIAS_COL = TAPS * C_PAD         # 72

# tap t = ky*3 + kx  ->  flat lane offset (ky-1)*WP + (kx-1)
_TAP_OFF = [(ky - 1) * WP + (kx - 1) for ky in range(3) for kx in range(3)]


def _conv_stacked(src_ref, tap_ref, w):
    """3x3 'same' conv over the padded-flat layout as ONE K=80 MXU matmul.

    src_ref: [C_PAD, BUF]   activations (margins + pad-ring lanes are zero)
    tap_ref: [TAPR, S]      scratch; rows 0..71 get the 9 shifted slabs,
                            rows 72..79 are constant 1.0 (bias rows)
    w:       [C_PAD, TAPR]  folded weights, bias in column BIAS_COL
    returns  [C_PAD, S]     conv output (values at pad-ring lanes are garbage)
    """
    for t, off in enumerate(_TAP_OFF):
        tap_ref[t * C_PAD:(t + 1) * C_PAD, :] = src_ref[:, LEFT + off:LEFT + off + S]
    return jnp.dot(w, tap_ref[...], preferred_element_type=jnp.float32)


def net_kernel(ain_ref, mask_ref, w_ref, gts_ref, out_ref, a0_ref, m_ref, tap_ref):
    # Zero only the margin lanes (interior is overwritten below); set the
    # constant-one bias rows of the tap stack once.
    a0_ref[:, :LEFT] = jnp.zeros((C_PAD, LEFT), jnp.float32)
    a0_ref[:, LEFT + S:] = jnp.zeros((C_PAD, BUF - LEFT - S), jnp.float32)
    m_ref[:, :LEFT] = jnp.zeros((C_PAD, LEFT), jnp.float32)
    m_ref[:, LEFT + S:] = jnp.zeros((C_PAD, BUF - LEFT - S), jnp.float32)
    tap_ref[BIAS_COL:, :] = jnp.ones((C_PAD, S), jnp.float32)

    mask = mask_ref[...]                                 # [1, S], 1 = interior pixel
    fcb = w_ref[3][0:1, 0:NO]                            # [1, 20] tiled fc bias

    # x = relu(conv0(input))   (kept for the residual branch)
    a0 = jnp.maximum(_conv_stacked(ain_ref, tap_ref, w_ref[0]), 0.0) * mask
    a0_ref[:, LEFT:LEFT + S] = a0

    # m = relu(conv1(x))
    m = jnp.maximum(_conv_stacked(a0_ref, tap_ref, w_ref[1]), 0.0) * mask
    m_ref[:, LEFT:LEFT + S] = m

    # out = conv2(m) + x     (pad-ring lanes hold garbage; FC weights are 0 there)
    res = _conv_stacked(m_ref, tap_ref, w_ref[2]) + a0_ref[:, LEFT:LEFT + S]

    # logits = relu(fc1(out.view(-1, 6*28*28)))
    # gts_ref: [C_MID*20, S] bf16 — FC weights scattered to the padded-flat
    # layout, channel-stacked on rows (row = c*20 + n*10 + o), block-diagonal
    # over the two images, zero at pad positions.  One A @ B.T matmul, then
    # pick the diagonal (c == c') [1, 20] blocks of the [8, 120] result.
    res_bf = res.astype(jnp.bfloat16)
    out_cm = lax.dot_general(res_bf, gts_ref[...],
                             dimension_numbers=(((1,), (1,)), ((), ())),
                             preferred_element_type=jnp.float32)      # [8, 120]
    logits = fcb
    for c in range(C_MID):
        logits = logits + out_cm[c:c + 1, c * NO:(c + 1) * NO]
    logits = jnp.maximum(logits, 0.0)                                 # [1, 20]
    out_ref[0:1, :] = logits[:, 0:NUM_CLASSES]
    out_ref[1:2, :] = logits[:, NUM_CLASSES:NO]


def prepare_params(params):
    """One-time re-layout of the PyTorch-style parameters for the fused kernel."""
    w0, b0, w1, b1, w2, b2, fcw, fcb = params

    def fold_conv(w, b):      # [6, cin, 3, 3], [6] -> [8, 80] (tap-folded + bias col)
        cin = w.shape[1]
        wt = jnp.transpose(w, (2, 3, 0, 1)).reshape(9, C_MID, cin)        # [t, co, ci]
        wt = jnp.pad(wt, ((0, 0), (0, C_PAD - C_MID), (0, C_PAD - cin)))  # [9, 8, 8]
        wt = jnp.transpose(wt, (1, 0, 2)).reshape(C_PAD, TAPS * C_PAD)    # [co, t*8+ci]
        bias_col = jnp.pad(b, (0, C_PAD - C_MID)).reshape(C_PAD, 1)
        pad_cols = jnp.zeros((C_PAD, TAPR - BIAS_COL - 1), jnp.float32)
        return jnp.concatenate([wt, bias_col, pad_cols], axis=1)          # [8, 80]

    fcb_layer = jnp.zeros((C_PAD, TAPR), jnp.float32)
    fcb_layer = fcb_layer.at[0, 0:NO].set(jnp.tile(fcb, (N,)))
    wstack = jnp.stack([fold_conv(w0, b0), fold_conv(w1, b1),
                        fold_conv(w2, b2), fcb_layer])                    # [4, 8, 80]

    # FC weights scattered to the padded-flat activation layout (bf16):
    # gts[c*20 + n*10 + o, n*900 + (h+1)*30 + (w+1)] = fcw[o, c*784 + h*28 + w]
    fr = fcw.reshape(NUM_CLASSES, C_MID, H, W)
    fr = jnp.transpose(fr, (1, 0, 2, 3))                                  # [c, o, h, w]
    fr = jnp.pad(fr, ((0, 0), (0, 0), (1, 1), (1, 1))).reshape(C_MID, NUM_CLASSES, SP)
    gts = jnp.zeros((C_MID, NO, S), jnp.float32)
    for n in range(N):
        gts = gts.at[:, n * NUM_CLASSES:(n + 1) * NUM_CLASSES,
                     n * SP:(n + 1) * SP].set(fr)
    gts = gts.reshape(C_MID * NO, S).astype(jnp.bfloat16)                 # [120, 1800]

    # Interior-lane mask (1 at real 28x28 pixels, 0 at the zero-pad ring).
    m = np.zeros((HP, WP), np.float32)
    m[1:H + 1, 1:W + 1] = 1.0
    mask = jnp.asarray(np.tile(m.reshape(-1), N).reshape(1, S))

    return (mask, wstack, gts)


@jax.jit
def net_forward(x, prep):
    mask, wstack, gts = prep

    # Embed x into the padded-flat, lane-dense layout: [C_PAD, BUF], channel row 0.
    xp = jnp.pad(x, ((0, 0), (0, 0), (1, 1), (1, 1))).reshape(1, S)       # [1, 1800]
    a_in = jnp.zeros((C_PAD, BUF), jnp.float32).at[0:1, LEFT:LEFT + S].set(xp)

    vmem = pl.BlockSpec(memory_space=pltpu.MemorySpace.VMEM)
    return pl.pallas_call(
        net_kernel,
        out_shape=jax.ShapeDtypeStruct((N, NUM_CLASSES), jnp.float32),
        in_specs=[vmem] * 4,
        out_specs=vmem,
        scratch_shapes=[pltpu.VMEM((C_PAD, BUF), jnp.float32),   # relu(conv0(x))
                        pltpu.VMEM((C_PAD, BUF), jnp.float32),   # relu(conv1(.))
                        pltpu.VMEM((TAPR, S), jnp.float32)],     # tap stack (K=80)
    )(a_in, mask, wstack, gts)


def reference(x, params):
    w0, b0, w1, b1, w2, b2, fcw, fcb = params
    dn = ('NCHW', 'OIHW', 'NCHW')

    def conv(inp, w, b):
        y = lax.conv_general_dilated(inp, w, (1, 1), [(1, 1), (1, 1)],
                                     dimension_numbers=dn)
        return y + b.reshape(1, -1, 1, 1)

    a = jax.nn.relu(conv(x, w0, b0))
    m = jax.nn.relu(conv(a, w1, b1))
    out = conv(m, w2, b2) + a
    return jax.nn.relu(out.reshape(N, C_MID * H * W) @ fcw.T + fcb)


if __name__ == "__main__":
    key = jax.random.PRNGKey(0)
    ks = jax.random.split(key, 9)
    # Deterministic synthetic parameters (torch layouts: conv OIHW, linear [out, in]).
    w0 = 0.2 * jax.random.normal(ks[0], (C_MID, C_IN, 3, 3), jnp.float32)
    b0 = 0.1 * jax.random.normal(ks[1], (C_MID,), jnp.float32)
    w1 = 0.2 * jax.random.normal(ks[2], (C_MID, C_MID, 3, 3), jnp.float32)
    b1 = 0.1 * jax.random.normal(ks[3], (C_MID,), jnp.float32)
    w2 = 0.2 * jax.random.normal(ks[4], (C_MID, C_MID, 3, 3), jnp.float32)
    b2 = 0.1 * jax.random.normal(ks[5], (C_MID,), jnp.float32)
    fcw = 0.02 * jax.random.normal(ks[6], (NUM_CLASSES, C_MID * H * W), jnp.float32)
    fcb = 0.1 * jax.random.normal(ks[7], (NUM_CLASSES,), jnp.float32)
    params = (w0, b0, w1, b1, w2, b2, fcw, fcb)

    x = jax.random.normal(ks[8], (N, C_IN, H, W), jnp.float32)

    prep = prepare_params(params)          # one-time weight re-layout (off hot path)
    logits = net_forward(x, prep)
    jax.block_until_ready(logits)

    ref_logits = reference(x, params)
    np.testing.assert_allclose(np.asarray(logits), np.asarray(ref_logits),
                               rtol=2e-2, atol=2e-2)

    print("KERNEL_OK")
</pallas_src>

<mosaic_0001>
module attributes {stable_mosaic.version = 11 : i64} {
  func.func @net_kernel(%arg0: memref<8x1960xf32, #tpu.memory_space<vmem>>, %arg1: memref<1x1800xf32, #tpu.memory_space<vmem>>, %arg2: memref<4x8x80xf32, #tpu.memory_space<vmem>>, %arg3: memref<120x1800xbf16, #tpu.memory_space<vmem>>, %arg4: memref<2x10xf32, #tpu.memory_space<vmem>>, %arg5: memref<8x1960xf32, #tpu.memory_space<vmem>>, %arg6: memref<8x1960xf32, #tpu.memory_space<vmem>>, %arg7: memref<80x1800xf32, #tpu.memory_space<vmem>>) attributes {dimension_semantics = [], scalar_prefetch = 0 : i64, scratch_operands = 3 : i64, tpu.core_type = #tpu.core_type<tc>} {
    %cst = arith.constant 0.000000e+00 : f32
    %0 = vector.broadcast %cst : f32 to vector<8x128xf32>
    %c0 = arith.constant 0 : index
    %c0_0 = arith.constant 0 : index
    %1 = vector.load %arg5[%c0, %c0_0] : memref<8x1960xf32, #tpu.memory_space<vmem>>, vector<8x128xf32>
    tpu.vector_store %arg5[%c0, %c0_0], %0 {strides = array<i32>} : memref<8x1960xf32, #tpu.memory_space<vmem>>, vector<8x128xf32>,
    %cst_1 = arith.constant 0.000000e+00 : f32
    %2 = vector.broadcast %cst_1 : f32 to vector<8x32xf32>
    %c0_2 = arith.constant 0 : index
    %c1928 = arith.constant 1928 : index
    %3 = vector.load %arg5[%c0_2, %c1928] : memref<8x1960xf32, #tpu.memory_space<vmem>>, vector<8x32xf32>
    tpu.vector_store %arg5[%c0_2, %c1928], %2 {strides = array<i32>} : memref<8x1960xf32, #tpu.memory_space<vmem>>, vector<8x32xf32>,
    %cst_3 = arith.constant 0.000000e+00 : f32
    %4 = vector.broadcast %cst_3 : f32 to vector<8x128xf32>
    %c0_4 = arith.constant 0 : index
    %c0_5 = arith.constant 0 : index
    %5 = vector.load %arg6[%c0_4, %c0_5] : memref<8x1960xf32, #tpu.memory_space<vmem>>, vector<8x128xf32>
    tpu.vector_store %arg6[%c0_4, %c0_5], %4 {strides = array<i32>} : memref<8x1960xf32, #tpu.memory_space<vmem>>, vector<8x128xf32>,
    %cst_6 = arith.constant 0.000000e+00 : f32
    %6 = vector.broadcast %cst_6 : f32 to vector<8x32xf32>
    %c0_7 = arith.constant 0 : index
    %c1928_8 = arith.constant 1928 : index
    %7 = vector.load %arg6[%c0_7, %c1928_8] : memref<8x1960xf32, #tpu.memory_space<vmem>>, vector<8x32xf32>
    tpu.vector_store %arg6[%c0_7, %c1928_8], %6 {strides = array<i32>} : memref<8x1960xf32, #tpu.memory_space<vmem>>, vector<8x32xf32>,
    %cst_9 = arith.constant 1.000000e+00 : f32
    %8 = vector.broadcast %cst_9 : f32 to vector<8x1800xf32>
    %c72 = arith.constant 72 : index
    %c0_10 = arith.constant 0 : index
    %9 = vector.load %arg7[%c72, %c0_10] : memref<80x1800xf32, #tpu.memory_space<vmem>>, vector<8x1800xf32>
    tpu.vector_store %arg7[%c72, %c0_10], %8 {strides = array<i32>} : memref<80x1800xf32, #tpu.memory_space<vmem>>, vector<8x1800xf32>,
    %c0_11 = arith.constant 0 : index
    %c0_12 = arith.constant 0 : index
    %10 = vector.load %arg1[%c0_11, %c0_12] : memref<1x1800xf32, #tpu.memory_space<vmem>>, vector<1x1800xf32>
    %c3 = arith.constant 3 : index
    %c0_13 = arith.constant 0 : index
    %c0_14 = arith.constant 0 : index
    %11 = vector.load %arg2[%c3, %c0_13, %c0_14] : memref<4x8x80xf32, #tpu.memory_space<vmem>>, vector<1x8x80xf32>
    %12 = vector.shape_cast %11 : vector<1x8x80xf32> to vector<8x80xf32>
    %13 = vector.extract_strided_slice %12 {offsets = [0, 0], sizes = [1, 20], strides = [1, 1]} : vector<8x80xf32> to vector<1x20xf32>
    %c0_15 = arith.constant 0 : index
    %c0_16 = arith.constant 0 : index
    %c0_17 = arith.constant 0 : index
    %14 = vector.load %arg2[%c0_15, %c0_16, %c0_17] : memref<4x8x80xf32, #tpu.memory_space<vmem>>, vector<1x8x80xf32>
    %15 = vector.shape_cast %14 : vector<1x8x80xf32> to vector<8x80xf32>
    %c0_18 = arith.constant 0 : index
    %c97 = arith.constant 97 : index
    %16 = vector.load %arg0[%c0_18, %c97] : memref<8x1960xf32, #tpu.memory_space<vmem>>, vector<8x1800xf32>
    %c0_19 = arith.constant 0 : index
    %c0_20 = arith.constant 0 : index
    %17 = vector.load %arg7[%c0_19, %c0_20] : memref<80x1800xf32, #tpu.memory_space<vmem>>, vector<8x1800xf32>
    tpu.vector_store %arg7[%c0_19, %c0_20], %16 {strides = array<i32>} : memref<80x1800xf32, #tpu.memory_space<vmem>>, vector<8x1800xf32>,
    %c0_21 = arith.constant 0 : index
    %c98 = arith.constant 98 : index
    %18 = vector.load %arg0[%c0_21, %c98] : memref<8x1960xf32, #tpu.memory_space<vmem>>, vector<8x1800xf32>
    %c8 = arith.constant 8 : index
    %c0_22 = arith.constant 0 : index
    %19 = vector.load %arg7[%c8, %c0_22] : memref<80x1800xf32, #tpu.memory_space<vmem>>, vector<8x1800xf32>
    tpu.vector_store %arg7[%c8, %c0_22], %18 {strides = array<i32>} : memref<80x1800xf32, #tpu.memory_space<vmem>>, vector<8x1800xf32>,
    %c0_23 = arith.constant 0 : index
    %c99 = arith.constant 99 : index
    %20 = vector.load %arg0[%c0_23, %c99] : memref<8x1960xf32, #tpu.memory_space<vmem>>, vector<8x1800xf32>
    %c16 = arith.constant 16 : index
    %c0_24 = arith.constant 0 : index
    %21 = vector.load %arg7[%c16, %c0_24] : memref<80x1800xf32, #tpu.memory_space<vmem>>, vector<8x1800xf32>
    tpu.vector_store %arg7[%c16, %c0_24], %20 {strides = array<i32>} : memref<80x1800xf32, #tpu.memory_space<vmem>>, vector<8x1800xf32>,
    %c0_25 = arith.constant 0 : index
    %c127 = arith.constant 127 : index
    %22 = vector.load %arg0[%c0_25, %c127] : memref<8x1960xf32, #tpu.memory_space<vmem>>, vector<8x1800xf32>
    %c24 = arith.constant 24 : index
    %c0_26 = arith.constant 0 : index
    %23 = vector.load %arg7[%c24, %c0_26] : memref<80x1800xf32, #tpu.memory_space<vmem>>, vector<8x1800xf32>
    tpu.vector_store %arg7[%c24, %c0_26], %22 {strides = array<i32>} : memref<80x1800xf32, #tpu.memory_space<vmem>>, vector<8x1800xf32>,
    %c0_27 = arith.constant 0 : index
    %c128 = arith.constant 128 : index
    %24 = vector.load %arg0[%c0_27, %c128] : memref<8x1960xf32, #tpu.memory_space<vmem>>, vector<8x1800xf32>
    %c32 = arith.constant 32 : index
    %c0_28 = arith.constant 0 : index
    %25 = vector.load %arg7[%c32, %c0_28] : memref<80x1800xf32, #tpu.memory_space<vmem>>, vector<8x1800xf32>
    tpu.vector_store %arg7[%c32, %c0_28], %24 {strides = array<i32>} : memref<80x1800xf32, #tpu.memory_space<vmem>>, vector<8x1800xf32>,
    %c0_29 = arith.constant 0 : index
    %c129 = arith.constant 129 : index
    %26 = vector.load %arg0[%c0_29, %c129] : memref<8x1960xf32, #tpu.memory_space<vmem>>, vector<8x1800xf32>
    %c40 = arith.constant 40 : index
    %c0_30 = arith.constant 0 : index
    %27 = vector.load %arg7[%c40, %c0_30] : memref<80x1800xf32, #tpu.memory_space<vmem>>, vector<8x1800xf32>
    tpu.vector_store %arg7[%c40, %c0_30], %26 {strides = array<i32>} : memref<80x1800xf32, #tpu.memory_space<vmem>>, vector<8x1800xf32>,
    %c0_31 = arith.constant 0 : index
    %c157 = arith.constant 157 : index
    %28 = vector.load %arg0[%c0_31, %c157] : memref<8x1960xf32, #tpu.memory_space<vmem>>, vector<8x1800xf32>
    %c48 = arith.constant 48 : index
    %c0_32 = arith.constant 0 : index
    %29 = vector.load %arg7[%c48, %c0_32] : memref<80x1800xf32, #tpu.memory_space<vmem>>, vector<8x1800xf32>
    tpu.vector_store %arg7[%c48, %c0_32], %28 {strides = array<i32>} : memref<80x1800xf32, #tpu.memory_space<vmem>>, vector<8x1800xf32>,
    %c0_33 = arith.constant 0 : index
    %c158 = arith.constant 158 : index
    %30 = vector.load %arg0[%c0_33, %c158] : memref<8x1960xf32, #tpu.memory_space<vmem>>, vector<8x1800xf32>
    %c56 = arith.constant 56 : index
    %c0_34 = arith.constant 0 : index
    %31 = vector.load %arg7[%c56, %c0_34] : memref<80x1800xf32, #tpu.memory_space<vmem>>, vector<8x1800xf32>
    tpu.vector_store %arg7[%c56, %c0_34], %30 {strides = array<i32>} : memref<80x1800xf32, #tpu.memory_space<vmem>>, vector<8x1800xf32>,
    %c0_35 = arith.constant 0 : index
    %c159 = arith.constant 159 : index
    %32 = vector.load %arg0[%c0_35, %c159] : memref<8x1960xf32, #tpu.memory_space<vmem>>, vector<8x1800xf32>
    %c64 = arith.constant 64 : index
    %c0_36 = arith.constant 0 : index
    %33 = vector.load %arg7[%c64, %c0_36] : memref<80x1800xf32, #tpu.memory_space<vmem>>, vector<8x1800xf32>
    tpu.vector_store %arg7[%c64, %c0_36], %32 {strides = array<i32>} : memref<80x1800xf32, #tpu.memory_space<vmem>>, vector<8x1800xf32>,
    %c0_37 = arith.constant 0 : index
    %c0_38 = arith.constant 0 : index
    %34 = vector.load %arg7[%c0_37, %c0_38] : memref<80x1800xf32, #tpu.memory_space<vmem>>, vector<80x1800xf32>
    %cst_39 = arith.constant dense<0.000000e+00> : vector<8x1800xf32>
    %35 = tpu.matmul %15, %34, %cst_39 {dimension_numbers = #tpu.dot_dimension_numbers<[1], [0], [0], [1], [0, 0, 1, 1], [], []>} : vector<8x80xf32>, vector<80x1800xf32>, vector<8x1800xf32> -> vector<8x1800xf32>
    %cst_40 = arith.constant 0.000000e+00 : f32
    %36 = vector.broadcast %cst_40 : f32 to vector<8x1800xf32>
    %37 = arith.maximumf %35, %36 : vector<8x1800xf32>
    %38 = vector.broadcast %10 : vector<1x1800xf32> to vector<8x1800xf32>
    %39 = arith.mulf %37, %38 : vector<8x1800xf32>
    %c0_41 = arith.constant 0 : index
    %c128_42 = arith.constant 128 : index
    %40 = vector.load %arg5[%c0_41, %c128_42] : memref<8x1960xf32, #tpu.memory_space<vmem>>, vector<8x1800xf32>
    tpu.vector_store %arg5[%c0_41, %c128_42], %39 {strides = array<i32>} : memref<8x1960xf32, #tpu.memory_space<vmem>>, vector<8x1800xf32>,
    %c1 = arith.constant 1 : index
    %c0_43 = arith.constant 0 : index
    %c0_44 = arith.constant 0 : index
    %41 = vector.load %arg2[%c1, %c0_43, %c0_44] : memref<4x8x80xf32, #tpu.memory_space<vmem>>, vector<1x8x80xf32>
    %42 = vector.shape_cast %41 : vector<1x8x80xf32> to vector<8x80xf32>
    %c0_45 = arith.constant 0 : index
    %c97_46 = arith.constant 97 : index
    %43 = vector.load %arg5[%c0_45, %c97_46] : memref<8x1960xf32, #tpu.memory_space<vmem>>, vector<8x1800xf32>
    %c0_47 = arith.constant 0 : index
    %c0_48 = arith.constant 0 : index
    %44 = vector.load %arg7[%c0_47, %c0_48] : memref<80x1800xf32, #tpu.memory_space<vmem>>, vector<8x1800xf32>
    tpu.vector_store %arg7[%c0_47, %c0_48], %43 {strides = array<i32>} : memref<80x1800xf32, #tpu.memory_space<vmem>>, vector<8x1800xf32>,
    %c0_49 = arith.constant 0 : index
    %c98_50 = arith.constant 98 : index
    %45 = vector.load %arg5[%c0_49, %c98_50] : memref<8x1960xf32, #tpu.memory_space<vmem>>, vector<8x1800xf32>
    %c8_51 = arith.constant 8 : index
    %c0_52 = arith.constant 0 : index
    %46 = vector.load %arg7[%c8_51, %c0_52] : memref<80x1800xf32, #tpu.memory_space<vmem>>, vector<8x1800xf32>
    tpu.vector_store %arg7[%c8_51, %c0_52], %45 {strides = array<i32>} : memref<80x1800xf32, #tpu.memory_space<vmem>>, vector<8x1800xf32>,
    %c0_53 = arith.constant 0 : index
    %c99_54 = arith.constant 99 : index
    %47 = vector.load %arg5[%c0_53, %c99_54] : memref<8x1960xf32, #tpu.memory_space<vmem>>, vector<8x1800xf32>
    %c16_55 = arith.constant 16 : index
    %c0_56 = arith.constant 0 : index
    %48 = vector.load %arg7[%c16_55, %c0_56] : memref<80x1800xf32, #tpu.memory_space<vmem>>, vector<8x1800xf32>
    tpu.vector_store %arg7[%c16_55, %c0_56], %47 {strides = array<i32>} : memref<80x1800xf32, #tpu.memory_space<vmem>>, vector<8x1800xf32>,
    %c0_57 = arith.constant 0 : index
    %c127_58 = arith.constant 127 : index
    %49 = vector.load %arg5[%c0_57, %c127_58] : memref<8x1960xf32, #tpu.memory_space<vmem>>, vector<8x1800xf32>
    %c24_59 = arith.constant 24 : index
    %c0_60 = arith.constant 0 : index
    %50 = vector.load %arg7[%c24_59, %c0_60] : memref<80x1800xf32, #tpu.memory_space<vmem>>, vector<8x1800xf32>
    tpu.vector_store %arg7[%c24_59, %c0_60], %49 {strides = array<i32>} : memref<80x1800xf32, #tpu.memory_space<vmem>>, vector<8x1800xf32>,
    %c0_61 = arith.constant 0 : index
    %c128_62 = arith.constant 128 : index
    %51 = vector.load %arg5[%c0_61, %c128_62] : memref<8x1960xf32, #tpu.memory_space<vmem>>, vector<8x1800xf32>
    %c32_63 = arith.constant 32 : index
    %c0_64 = arith.constant 0 : index
    %52 = vector.load %arg7[%c32_63, %c0_64] : memref<80x1800xf32, #tpu.memory_space<vmem>>, vector<8x1800xf32>
    tpu.vector_store %arg7[%c32_63, %c0_64], %51 {strides = array<i32>} : memref<80x1800xf32, #tpu.memory_space<vmem>>, vector<8x1800xf32>,
    %c0_65 = arith.constant 0 : index
    %c129_66 = arith.constant 129 : index
    %53 = vector.load %arg5[%c0_65, %c129_66] : memref<8x1960xf32, #tpu.memory_space<vmem>>, vector<8x1800xf32>
    %c40_67 = arith.constant 40 : index
    %c0_68 = arith.constant 0 : index
    %54 = vector.load %arg7[%c40_67, %c0_68] : memref<80x1800xf32, #tpu.memory_space<vmem>>, vector<8x1800xf32>
    tpu.vector_store %arg7[%c40_67, %c0_68], %53 {strides = array<i32>} : memref<80x1800xf32, #tpu.memory_space<vmem>>, vector<8x1800xf32>,
    %c0_69 = arith.constant 0 : index
    %c157_70 = arith.constant 157 : index
    %55 = vector.load %arg5[%c0_69, %c157_70] : memref<8x1960xf32, #tpu.memory_space<vmem>>, vector<8x1800xf32>
    %c48_71 = arith.constant 48 : index
    %c0_72 = arith.constant 0 : index
    %56 = vector.load %arg7[%c48_71, %c0_72] : memref<80x1800xf32, #tpu.memory_space<vmem>>, vector<8x1800xf32>
    tpu.vector_store %arg7[%c48_71, %c0_72], %55 {strides = array<i32>} : memref<80x1800xf32, #tpu.memory_space<vmem>>, vector<8x1800xf32>,
    %c0_73 = arith.constant 0 : index
    %c158_74 = arith.constant 158 : index
    %57 = vector.load %arg5[%c0_73, %c158_74] : memref<8x1960xf32, #tpu.memory_space<vmem>>, vector<8x1800xf32>
    %c56_75 = arith.constant 56 : index
    %c0_76 = arith.constant 0 : index
    %58 = vector.load %arg7[%c56_75, %c0_76] : memref<80x1800xf32, #tpu.memory_space<vmem>>, vector<8x1800xf32>
    tpu.vector_store %arg7[%c56_75, %c0_76], %57 {strides = array<i32>} : memref<80x1800xf32, #tpu.memory_space<vmem>>, vector<8x1800xf32>,
    %c0_77 = arith.constant 0 : index
    %c159_78 = arith.constant 159 : index
    %59 = vector.load %arg5[%c0_77, %c159_78] : memref<8x1960xf32, #tpu.memory_space<vmem>>, vector<8x1800xf32>
    %c64_79 = arith.constant 64 : index
    %c0_80 = arith.constant 0 : index
    %60 = vector.load %arg7[%c64_79, %c0_80] : memref<80x1800xf32, #tpu.memory_space<vmem>>, vector<8x1800xf32>
    tpu.vector_store %arg7[%c64_79, %c0_80], %59 {strides = array<i32>} : memref<80x1800xf32, #tpu.memory_space<vmem>>, vector<8x1800xf32>,
    %c0_81 = arith.constant 0 : index
    %c0_82 = arith.constant 0 : index
    %61 = vector.load %arg7[%c0_81, %c0_82] : memref<80x1800xf32, #tpu.memory_space<vmem>>, vector<80x1800xf32>
    %cst_83 = arith.constant dense<0.000000e+00> : vector<8x1800xf32>
    %62 = tpu.matmul %42, %61, %cst_83 {dimension_numbers = #tpu.dot_dimension_numbers<[1], [0], [0], [1], [0, 0, 1, 1], [], []>} : vector<8x80xf32>, vector<80x1800xf32>, vector<8x1800xf32> -> vector<8x1800xf32>
    %cst_84 = arith.constant 0.000000e+00 : f32
    %63 = vector.broadcast %cst_84 : f32 to vector<8x1800xf32>
    %64 = arith.maximumf %62, %63 : vector<8x1800xf32>
    %65 = vector.broadcast %10 : vector<1x1800xf32> to vector<8x1800xf32>
    %66 = arith.mulf %64, %65 : vector<8x1800xf32>
    %c0_85 = arith.constant 0 : index
    %c128_86 = arith.constant 128 : index
    %67 = vector.load %arg6[%c0_85, %c128_86] : memref<8x1960xf32, #tpu.memory_space<vmem>>, vector<8x1800xf32>
    tpu.vector_store %arg6[%c0_85, %c128_86], %66 {strides = array<i32>} : memref<8x1960xf32, #tpu.memory_space<vmem>>, vector<8x1800xf32>,
    %c2 = arith.constant 2 : index
    %c0_87 = arith.constant 0 : index
    %c0_88 = arith.constant 0 : index
    %68 = vector.load %arg2[%c2, %c0_87, %c0_88] : memref<4x8x80xf32, #tpu.memory_space<vmem>>, vector<1x8x80xf32>
    %69 = vector.shape_cast %68 : vector<1x8x80xf32> to vector<8x80xf32>
    %c0_89 = arith.constant 0 : index
    %c97_90 = arith.constant 97 : index
    %70 = vector.load %arg6[%c0_89, %c97_90] : memref<8x1960xf32, #tpu.memory_space<vmem>>, vector<8x1800xf32>
    %c0_91 = arith.constant 0 : index
    %c0_92 = arith.constant 0 : index
    %71 = vector.load %arg7[%c0_91, %c0_92] : memref<80x1800xf32, #tpu.memory_space<vmem>>, vector<8x1800xf32>
    tpu.vector_store %arg7[%c0_91, %c0_92], %70 {strides = array<i32>} : memref<80x1800xf32, #tpu.memory_space<vmem>>, vector<8x1800xf32>,
    %c0_93 = arith.constant 0 : index
    %c98_94 = arith.constant 98 : index
    %72 = vector.load %arg6[%c0_93, %c98_94] : memref<8x1960xf32, #tpu.memory_space<vmem>>, vector<8x1800xf32>
    %c8_95 = arith.constant 8 : index
    %c0_96 = arith.constant 0 : index
    %73 = vector.load %arg7[%c8_95, %c0_96] : memref<80x1800xf32, #tpu.memory_space<vmem>>, vector<8x1800xf32>
    tpu.vector_store %arg7[%c8_95, %c0_96], %72 {strides = array<i32>} : memref<80x1800xf32, #tpu.memory_space<vmem>>, vector<8x1800xf32>,
    %c0_97 = arith.constant 0 : index
    %c99_98 = arith.constant 99 : index
    %74 = vector.load %arg6[%c0_97, %c99_98] : memref<8x1960xf32, #tpu.memory_space<vmem>>, vector<8x1800xf32>
    %c16_99 = arith.constant 16 : index
    %c0_100 = arith.constant 0 : index
    %75 = vector.load %arg7[%c16_99, %c0_100] : memref<80x1800xf32, #tpu.memory_space<vmem>>, vector<8x1800xf32>
    tpu.vector_store %arg7[%c16_99, %c0_100], %74 {strides = array<i32>} : memref<80x1800xf32, #tpu.memory_space<vmem>>, vector<8x1800xf32>,
    %c0_101 = arith.constant 0 : index
    %c127_102 = arith.constant 127 : index
    %76 = vector.load %arg6[%c0_101, %c127_102] : memref<8x1960xf32, #tpu.memory_space<vmem>>, vector<8x1800xf32>
    %c24_103 = arith.constant 24 : index
    %c0_104 = arith.constant 0 : index
    %77 = vector.load %arg7[%c24_103, %c0_104] : memref<80x1800xf32, #tpu.memory_space<vmem>>, vector<8x1800xf32>
    tpu.vector_store %arg7[%c24_103, %c0_104], %76 {strides = array<i32>} : memref<80x1800xf32, #tpu.memory_space<vmem>>, vector<8x1800xf32>,
    %c0_105 = arith.constant 0 : index
    %c128_106 = arith.constant 128 : index
    %78 = vector.load %arg6[%c0_105, %c128_106] : memref<8x1960xf32, #tpu.memory_space<vmem>>, vector<8x1800xf32>
    %c32_107 = arith.constant 32 : index
    %c0_108 = arith.constant 0 : index
    %79 = vector.load %arg7[%c32_107, %c0_108] : memref<80x1800xf32, #tpu.memory_space<vmem>>, vector<8x1800xf32>
    tpu.vector_store %arg7[%c32_107, %c0_108], %78 {strides = array<i32>} : memref<80x1800xf32, #tpu.memory_space<vmem>>, vector<8x1800xf32>,
    %c0_109 = arith.constant 0 : index
    %c129_110 = arith.constant 129 : index
    %80 = vector.load %arg6[%c0_109, %c129_110] : memref<8x1960xf32, #tpu.memory_space<vmem>>, vector<8x1800xf32>
    %c40_111 = arith.constant 40 : index
    %c0_112 = arith.constant 0 : index
    %81 = vector.load %arg7[%c40_111, %c0_112] : memref<80x1800xf32, #tpu.memory_space<vmem>>, vector<8x1800xf32>
    tpu.vector_store %arg7[%c40_111, %c0_112], %80 {strides = array<i32>} : memref<80x1800xf32, #tpu.memory_space<vmem>>, vector<8x1800xf32>,
    %c0_113 = arith.constant 0 : index
    %c157_114 = arith.constant 157 : index
    %82 = vector.load %arg6[%c0_113, %c157_114] : memref<8x1960xf32, #tpu.memory_space<vmem>>, vector<8x1800xf32>
    %c48_115 = arith.constant 48 : index
    %c0_116 = arith.constant 0 : index
    %83 = vector.load %arg7[%c48_115, %c0_116] : memref<80x1800xf32, #tpu.memory_space<vmem>>, vector<8x1800xf32>
    tpu.vector_store %arg7[%c48_115, %c0_116], %82 {strides = array<i32>} : memref<80x1800xf32, #tpu.memory_space<vmem>>, vector<8x1800xf32>,
    %c0_117 = arith.constant 0 : index
    %c158_118 = arith.constant 158 : index
    %84 = vector.load %arg6[%c0_117, %c158_118] : memref<8x1960xf32, #tpu.memory_space<vmem>>, vector<8x1800xf32>
    %c56_119 = arith.constant 56 : index
    %c0_120 = arith.constant 0 : index
    %85 = vector.load %arg7[%c56_119, %c0_120] : memref<80x1800xf32, #tpu.memory_space<vmem>>, vector<8x1800xf32>
    tpu.vector_store %arg7[%c56_119, %c0_120], %84 {strides = array<i32>} : memref<80x1800xf32, #tpu.memory_space<vmem>>, vector<8x1800xf32>,
    %c0_121 = arith.constant 0 : index
    %c159_122 = arith.constant 159 : index
    %86 = vector.load %arg6[%c0_121, %c159_122] : memref<8x1960xf32, #tpu.memory_space<vmem>>, vector<8x1800xf32>
    %c64_123 = arith.constant 64 : index
    %c0_124 = arith.constant 0 : index
    %87 = vector.load %arg7[%c64_123, %c0_124] : memref<80x1800xf32, #tpu.memory_space<vmem>>, vector<8x1800xf32>
    tpu.vector_store %arg7[%c64_123, %c0_124], %86 {strides = array<i32>} : memref<80x1800xf32, #tpu.memory_space<vmem>>, vector<8x1800xf32>,
    %c0_125 = arith.constant 0 : index
    %c0_126 = arith.constant 0 : index
    %88 = vector.load %arg7[%c0_125, %c0_126] : memref<80x1800xf32, #tpu.memory_space<vmem>>, vector<80x1800xf32>
    %cst_127 = arith.constant dense<0.000000e+00> : vector<8x1800xf32>
    %89 = tpu.matmul %69, %88, %cst_127 {dimension_numbers = #tpu.dot_dimension_numbers<[1], [0], [0], [1], [0, 0, 1, 1], [], []>} : vector<8x80xf32>, vector<80x1800xf32>, vector<8x1800xf32> -> vector<8x1800xf32>
    %c0_128 = arith.constant 0 : index
    %c128_129 = arith.constant 128 : index
    %90 = vector.load %arg5[%c0_128, %c128_129] : memref<8x1960xf32, #tpu.memory_space<vmem>>, vector<8x1800xf32>
    %91 = arith.addf %89, %90 : vector<8x1800xf32>
    %92 = arith.truncf %91 : vector<8x1800xf32> to vector<8x1800xbf16>
    %c0_130 = arith.constant 0 : index
    %c0_131 = arith.constant 0 : index
    %93 = vector.load %arg3[%c0_130, %c0_131] : memref<120x1800xbf16, #tpu.memory_space<vmem>>, vector<120x1800xbf16>
    %cst_132 = arith.constant dense<0.000000e+00> : vector<8x120xf32>
    %94 = tpu.matmul %92, %93, %cst_132 {dimension_numbers = #tpu.dot_dimension_numbers<[1], [1], [0], [0], [0, 0, 1, 0], [], []>} : vector<8x1800xbf16>, vector<120x1800xbf16>, vector<8x120xf32> -> vector<8x120xf32>
    %95 = vector.extract_strided_slice %94 {offsets = [0, 0], sizes = [1, 20], strides = [1, 1]} : vector<8x120xf32> to vector<1x20xf32>
    %96 = arith.addf %13, %95 : vector<1x20xf32>
    %97 = vector.extract_strided_slice %94 {offsets = [1, 20], sizes = [1, 20], strides = [1, 1]} : vector<8x120xf32> to vector<1x20xf32>
    %98 = arith.addf %96, %97 : vector<1x20xf32>
    %99 = vector.extract_strided_slice %94 {offsets = [2, 40], sizes = [1, 20], strides = [1, 1]} : vector<8x120xf32> to vector<1x20xf32>
    %100 = arith.addf %98, %99 : vector<1x20xf32>
    %101 = vector.extract_strided_slice %94 {offsets = [3, 60], sizes = [1, 20], strides = [1, 1]} : vector<8x120xf32> to vector<1x20xf32>
    %102 = arith.addf %100, %101 : vector<1x20xf32>
    %103 = vector.extract_strided_slice %94 {offsets = [4, 80], sizes = [1, 20], strides = [1, 1]} : vector<8x120xf32> to vector<1x20xf32>
    %104 = arith.addf %102, %103 : vector<1x20xf32>
    %105 = vector.extract_strided_slice %94 {offsets = [5, 100], sizes = [1, 20], strides = [1, 1]} : vector<8x120xf32> to vector<1x20xf32>
    %106 = arith.addf %104, %105 : vector<1x20xf32>
    %cst_133 = arith.constant 0.000000e+00 : f32
    %107 = vector.broadcast %cst_133 : f32 to vector<1x20xf32>
    %108 = arith.maximumf %106, %107 : vector<1x20xf32>
    %109 = vector.extract_strided_slice %108 {offsets = [0, 0], sizes = [1, 10], strides = [1, 1]} : vector<1x20xf32> to vector<1x10xf32>
    %c0_134 = arith.constant 0 : index
    %c0_135 = arith.constant 0 : index
    %110 = vector.load %arg4[%c0_134, %c0_135] : memref<2x10xf32, #tpu.memory_space<vmem>>, vector<1x10xf32>
    tpu.vector_store %arg4[%c0_134, %c0_135], %109 {strides = array<i32>} : memref<2x10xf32, #tpu.memory_space<vmem>>, vector<1x10xf32>,
    %111 = vector.extract_strided_slice %108 {offsets = [0, 10], sizes = [1, 10], strides = [1, 1]} : vector<1x20xf32> to vector<1x10xf32>
    %c1_136 = arith.constant 1 : index
    %c0_137 = arith.constant 0 : index
    %112 = vector.load %arg4[%c1_136, %c0_137] : memref<2x10xf32, #tpu.memory_space<vmem>>, vector<1x10xf32>
    tpu.vector_store %arg4[%c1_136, %c0_137], %111 {strides = array<i32>} : memref<2x10xf32, #tpu.memory_space<vmem>>, vector<1x10xf32>,
    return
  }
}

</mosaic_0001>

<bundles_post_ra>
// kernel: net_forward.1
= control target key start
LH: loop header
LB: loop body
LE: loop exit
PB: predicated region body
PF: predicated region fallthrough
CT: control target
= control target key end

     0   :  { %9 = vsyncpa [#allocation6], 0  ;;  %s9335_s0 = inlined_call_operand.vmem [shape: f32[8,1960], index: 0, kind: input, shape index: {}]   ;;  %s9336_s1 = inlined_call_operand.vmem [shape: f32[1,1800], index: 1, kind: input, shape index: {}]   ;;  %s9337_s2 = inlined_call_operand.vmem [shape: f32[4,8,80], index: 2, kind: input, shape index: {}]   ;;  %s9338_s3 = inlined_call_operand.hbm [shape: bf16[120,1800], index: 3, kind: input, shape index: {}]   ;;  %s9339_s4 = inlined_call_operand.hbm [shape: f32[2,10], index: 4, kind: output, shape index: {}]  }
   0x1   :  { %10 = vsyncpa [#allocation7], 0  ;;  %s7140_s15 = smov [#allocation5]   ;;  %s7092_s19 = scalar_lea.hbm %s9338_s3, 14400 }
   0x2   :  { %s22_s16 = sshll.u32 %s7140_s15, 4  ;;  %p7093_p0 = scmp.ne.s32.totalorder %s9338_s3, %s7092_s19  ;;  %s23_s16 = int_to_ptr.vmem [resolvable:$true] %s22_s16 }
   0x3   :  { %p7096_p1 = scmp.lt.u32.totalorder %s7092_s19, %s9338_s3 }
   0x5   :  { %p7098_p2 = pnand %p7096_p1, %p7093_p0 }
   0x7   :  { %7101 = shalt.err (!%p7098_p2)
}
   0x8   :  { %s7102_s24 = scalar_lea.vmem %s23_s16, 14400  ;;  %p7107_p4 = scmp.lt.s32.totalorder %s23_s16, %s23_s16 }
   0x9   :  { %p7103_p3 = scmp.ne.s32.totalorder %s23_s16, %s7102_s24  ;;  %p7108_p5 = scmp.lt.s32.totalorder %s7102_s24, %s7102_s24 }
   0xb   :  { %p7109_p6 = por %p7108_p5, %p7107_p4 }
   0xd   :  { %p7110_p7 = pnand %p7109_p6, %p7103_p3 }
   0xf   :  { %7113 = shalt.err (!%p7110_p7)
}
  0x10   :  { %s7141_s25 = smov 960   ;;  %s7142_s26 = smov 60  }
  0x11   :  { %28 = dma.hbm_to_vmem [thread:$0]  %s9338_s3, 14400, %s23_s16, [#allocation6], %s7141_s25, %s7141_s25, %s7142_s26  }
  0x12   :  { %7136 = dma.done.wait [#allocation6], 14400  }
  0x13   :  { %7137 = vsyncadd [#allocation6], 4294952896  ;;  %v7202_v0 = vld [vmem:[%s9335_s0 + $0x8] sm:$0xff]  ;;  %s7143_s5 = smov 30   ;;  %s7144_s6 = smov 31   ;;  %v7211_v1 = vld [vmem:[%s9335_s0 + $0x10] sm:$0xff] }
  0x14   :  { %196 = vrot.lane.b32.xlu1 %v7202_v0, %s7143_s5  ;;  %91 = vrot.lane.b32.xlu0 %v7202_v0, %s7144_s6  ;;  %v164_v2 = vld [vmem:[%s9335_s0] sm:$0xff]  ;;  %s7145_s10 = smov 29   ;;  %s7146_s11 = smov 1   ;;  %v7233_v3 = vld [vmem:[%s9335_s0 + $0x18] sm:$0xff]  ;;  %v7150_v5 = vmov 1.0   ;;  %v7152_v7 = vmov 0.0  }
  0x15   :  { %s7147_s14 = smov 127   ;;  %v7244_v4 = vld [vmem:[%s9335_s0 + $0x20] sm:$0xff]  ;;  %s7148_s17 = smov 99   ;;  %39 = vst [vmem:[#allocation4 + $0x440] sm:$0xff] %v7150_v5  ;;  %v7286_v6 = vld [vmem:[%s9335_s0 + $0x28] sm:$0xff]  ;;  %1152 = vmatprep.mubr.f32.mxu0 %v7152_v7  ;;  %33 = vst [vmem:[#allocation2] sm:$0xff] %v7152_v7  ;;  %1223 = vmatprep.mubr.f32.mxu1 %v7152_v7 }
  0x16   :  { %s7149_s18 = smov 98   ;;  %s7151_s19 = smov 97   ;;  %v7298_v8 = vld [vmem:[%s9335_s0 + $0x30] sm:$0xff]  ;;  %v520_v9 = vld [vmem:[%s9335_s0 + $0x38] sm:$0xff]  ;;  %v7337_v10 = vld [vmem:[%s9335_s0 + $0x40] sm:$0xff]  ;;  %vm224_vm0 = vcmask 244736  }
  0x17   :  { %vm119_vm1 = vcmask 252928   ;;  %v522_v23 = vld [vmem:[%s9335_s0 + $0x48] sm:$0xff]  ;;  %vm329_vm2 = vcmask 236544   ;;  %vm438_vm3 = vcmask 7168   ;;  %v7378_v26 = vld [vmem:[%s9335_s0 + $0x50] sm:$0xff]  ;;  %vm574_vm4 = vcmask 1039360  }
  0x18   :  { %198 = vrot.lane.b32.xlu1 %v7211_v1, %s7143_s5  ;;  %93 = vrot.lane.b32.xlu0 %v7211_v1, %s7144_s6  ;;  %vm679_vm5 = vcmask 809984   ;;  %vm784_vm6 = vcmask 801792   ;;  %v7432_v57 = vld [vmem:[%s9335_s0 + $0x58] sm:$0xff]  ;;  %v7447_v63 = vld [vmem:[%s9335_s0 + $0x60] sm:$0xff]  ;;  %vm889_vm7 = vcmask 793600   ;;  %vm1084_vm8 = vcmask 654336  }
  0x19   :  { %vm52_vm9 = vcmask 64512   ;;  %vm7154_vm10 = vmmov 0   ;;  %vm34_vm11 = vcmask 326720   ;;  %vm6102_vm12 = vcmask 73728   ;;  %s7160_s29 = smov 118   ;;  %s7161_s30 = smov [#allocation8]  }
  0x1a   :  { %53 = vst.msk [vmem:[#allocation4 + $0x4a8] sm:$0xff] %vm52_vm9, %v7150_v5  ;;  %s6115_s7 = sshll.u32 %s7161_s30, 4  ;;  %s6116_s7 = int_to_ptr.vmem [resolvable:$true] %s6115_s7 }
  0x1b   :  { %p7119_p9 = scmp.lt.s32.totalorder %s6116_s7, %s6116_s7 }
  0x1c   :  { %194 = vrot.lane.b32.xlu1 %v164_v2, %s7143_s5  ;;  %89 = vrot.lane.b32.xlu0 %v164_v2, %s7144_s6 }
  0x20   :  { %303 = vrot.lane.b32.xlu1 %v7211_v1, %s7145_s10  ;;  %301 = vrot.lane.b32.xlu0 %v7202_v0, %s7145_s10 }
  0x24   :  { %410 = vrot.lane.b32.xlu1 %v7211_v1, %s7146_s11  ;;  %408 = vrot.lane.b32.xlu0 %v7202_v0, %s7146_s11 }
  0x28   :  { %406 = vrot.lane.b32.xlu1 %v164_v2, %s7146_s11  ;;  %299 = vrot.lane.b32.xlu0 %v164_v2, %s7145_s10 }
  0x2c   :  { %548 = vrot.lane.b32.xlu1 %v7233_v3, %s7147_s14  ;;  %546 = vrot.lane.b32.xlu0 %v7211_v1, %s7147_s14 }
  0x30   :  { %95 = vrot.lane.b32.xlu1 %v7233_v3, %s7144_s6  ;;  %544 = vrot.lane.b32.xlu0 %v7202_v0, %s7147_s14 }
  0x34   :  { %200 = vrot.lane.b32.xlu1 %v7233_v3, %s7143_s5  ;;  %97 = vrot.lane.b32.xlu0 %v7244_v4, %s7144_s6 }
  0x38   :  { %651 = vrot.lane.b32.xlu1 %v7211_v1, %s7148_s17  ;;  %202 = vrot.lane.b32.xlu0 %v7244_v4, %s7143_s5 }
  0x3c   :  { %756 = vrot.lane.b32.xlu1 %v7211_v1, %s7149_s18  ;;  %653 = vrot.lane.b32.xlu0 %v7233_v3, %s7148_s17 }
  0x40   :  { %649 = vrot.lane.b32.xlu1 %v7202_v0, %s7148_s17  ;;  %758 = vrot.lane.b32.xlu0 %v7233_v3, %s7149_s18 }
  0x44   :  { %305 = vrot.lane.b32.xlu1 %v7233_v3, %s7145_s10  ;;  %754 = vrot.lane.b32.xlu0 %v7202_v0, %s7149_s18 }
  0x48   :  { %412 = vrot.lane.b32.xlu1 %v7233_v3, %s7146_s11  ;;  %307 = vrot.lane.b32.xlu0 %v7244_v4, %s7145_s10 }
  0x4c   :  { %861 = vrot.lane.b32.xlu1 %v7211_v1, %s7151_s19  ;;  %414 = vrot.lane.b32.xlu0 %v7244_v4, %s7146_s11 }
  0x50   :  { %859 = vrot.lane.b32.xlu1 %v7202_v0, %s7151_s19  ;;  %863 = vrot.lane.b32.xlu0 %v7233_v3, %s7151_s19 }
  0x54   :  { %552 = vrot.lane.b32.xlu1 %v7286_v6, %s7147_s14  ;;  %550 = vrot.lane.b32.xlu0 %v7244_v4, %s7147_s14 }
  0x58   :  { %101 = vrot.lane.b32.xlu1 %v7298_v8, %s7144_s6  ;;  %99 = vrot.lane.b32.xlu0 %v7286_v6, %s7144_s6 }
  0x5c   :  { %206 = vrot.lane.b32.xlu1 %v7298_v8, %s7143_s5  ;;  %204 = vrot.lane.b32.xlu0 %v7286_v6, %s7143_s5 }
  0x60   :  { %657 = vrot.lane.b32.xlu1 %v7286_v6, %s7148_s17  ;;  %655 = vrot.lane.b32.xlu0 %v7244_v4, %s7148_s17 }
  0x64   :  { %762 = vrot.lane.b32.xlu1 %v7286_v6, %s7149_s18  ;;  %760 = vrot.lane.b32.xlu0 %v7244_v4, %s7149_s18 }
  0x68   :  { %311 = vrot.lane.b32.xlu1 %v7298_v8, %s7145_s10  ;;  %309 = vrot.lane.b32.xlu0 %v7286_v6, %s7145_s10 }
  0x6c   :  { %418 = vrot.lane.b32.xlu1 %v7298_v8, %s7146_s11  ;;  %416 = vrot.lane.b32.xlu0 %v7286_v6, %s7146_s11 }
  0x70   :  { %867 = vrot.lane.b32.xlu1 %v7286_v6, %s7151_s19  ;;  %865 = vrot.lane.b32.xlu0 %v7244_v4, %s7151_s19 }
  0x74   :  { %556 = vrot.lane.b32.xlu1 %v520_v9, %s7147_s14  ;;  %554 = vrot.lane.b32.xlu0 %v7298_v8, %s7147_s14 }
  0x78   :  { %105 = vrot.lane.b32.xlu1 %v7337_v10, %s7144_s6  ;;  %103 = vrot.lane.b32.xlu0 %v520_v9, %s7144_s6 }
  0x7c   :  { %210 = vrot.lane.b32.xlu1 %v7337_v10, %s7143_s5  ;;  %208 = vrot.lane.b32.xlu0 %v520_v9, %s7143_s5 }
  0x80   :  { %661 = vrot.lane.b32.xlu1 %v520_v9, %s7148_s17  ;;  %659 = vrot.lane.b32.xlu0 %v7298_v8, %s7148_s17 }
  0x84   :  { %766 = vrot.lane.b32.xlu1 %v520_v9, %s7149_s18  ;;  %764 = vrot.lane.b32.xlu0 %v7298_v8, %s7149_s18 }
  0x86   :  { %v197_v11 = vpop.permute.xlu1 %196  ;;  %v92_v12 = vpop.permute.xlu0 %91 }
  0x88   :  { %315 = vrot.lane.b32.xlu1 %v7337_v10, %s7145_s10  ;;  %313 = vrot.lane.b32.xlu0 %v520_v9, %s7145_s10 }
  0x8a   :  { %v199_v13 = vpop.permute.xlu1 %198  ;;  %v7354_v14 = vpop.permute.xlu0 %93 }
  0x8b   :  { %v226_v15 = vsel %vm224_vm0, %v197_v11, %v199_v13  ;;  %v121_v16 = vsel %vm119_vm1, %v92_v12, %v7354_v14 }
  0x8c   :  { %422 = vrot.lane.b32.xlu1 %v7337_v10, %s7146_s11  ;;  %420 = vrot.lane.b32.xlu0 %v520_v9, %s7146_s11  ;;  %v6403_v17 = vpack.c.bf16 %v226_v15, %v121_v16 }
  0x8e   :  { %v195_v18 = vpop.permute.xlu1 %194  ;;  %v90_v19 = vpop.permute.xlu0 %89  ;;  %6404 = vmatprep.subr.bf16.mxu0 %v6403_v17 }
  0x8f   :  { %v225_v20 = vsel %vm224_vm0, %v195_v18, %v197_v11  ;;  %v120_v21 = vsel %vm119_vm1, %v90_v19, %v92_v12 }
  0x90   :  { %871 = vrot.lane.b32.xlu1 %v520_v9, %s7151_s19  ;;  %869 = vrot.lane.b32.xlu0 %v7298_v8, %s7151_s19  ;;  %v6405_v22 = vpack.c.bf16 %v225_v20, %v120_v21 }
  0x92   :  { %v7370_v24 = vpop.permute.xlu1 %303  ;;  %v302_v25 = vpop.permute.xlu0 %301  ;;  %6406 = vmatpush1.bf16.msra.mxu0 %v6405_v22 }
  0x93   :  { %v331_v29 = vsel %vm329_vm2, %v302_v25, %v7370_v24 }
  0x94   :  { %560 = vrot.lane.b32.xlu1 %v522_v23, %s7147_s14  ;;  %558 = vrot.lane.b32.xlu0 %v7337_v10, %s7147_s14 }
  0x96   :  { %v7380_v27 = vpop.permute.xlu1 %410  ;;  %v409_v28 = vpop.permute.xlu0 %408 }
  0x97   :  { %v440_v30 = vsel %vm438_vm3, %v409_v28, %v7380_v27 }
  0x98   :  { %109 = vrot.lane.b32.xlu1 %v7378_v26, %s7144_s6  ;;  %107 = vrot.lane.b32.xlu0 %v522_v23, %s7144_s6  ;;  %v6407_v31 = vpack.c.bf16 %v440_v30, %v331_v29 }
  0x9a   :  { %v407_v32 = vpop.permute.xlu1 %406  ;;  %v300_v33 = vpop.permute.xlu0 %299  ;;  %6408 = vmatprep.subr.bf16.mxu0 %v6407_v31 }
  0x9b   :  { %v439_v34 = vsel %vm438_vm3, %v407_v32, %v409_v28  ;;  %v330_v35 = vsel %vm329_vm2, %v300_v33, %v302_v25  ;;  %v7495_v32 = vld [vmem:[%s9337_s2] sm:$0xff]  ;;  %v7500_v33 = vld [vmem:[%s9335_s0 + $0x78] sm:$0xff] }
  0x9c   :  { %214 = vrot.lane.b32.xlu1 %v7378_v26, %s7143_s5  ;;  %212 = vrot.lane.b32.xlu0 %v522_v23, %s7143_s5  ;;  %v6409_v36 = vpack.c.bf16 %v439_v34, %v330_v35  ;;  %513 = vst.msk [vmem:[#allocation4 + $0x250] sm:$0xff] %vm52_vm9, %v7500_v33 }
  0x9e   :  { %v7394_v37 = vpop.permute.xlu1 %548  ;;  %v547_v38 = vpop.permute.xlu0 %546  ;;  %6410 = vmatpush1.bf16.msra.mxu0 %v6409_v36 }
  0x9f   :  { %v576_v39 = vsel %vm574_vm4, %v547_v38, %v7394_v37 }
  0xa0   :  { %665 = vrot.lane.b32.xlu1 %v522_v23, %s7148_s17  ;;  %663 = vrot.lane.b32.xlu0 %v7337_v10, %s7148_s17  ;;  %v6411_v40 = vpack.c.bf16 %v576_v39, %v7211_v1 }
  0xa2   :  { %v96_v41 = vpop.permute.xlu1 %95  ;;  %v545_v42 = vpop.permute.xlu0 %544  ;;  %6412 = vmatprep.subr.bf16.mxu0 %v6411_v40 }
  0xa3   :  { %v575_v43 = vsel %vm574_vm4, %v545_v42, %v547_v38  ;;  %v122_v52 = vsel %vm119_vm1, %v7354_v14, %v96_v41 }
  0xa4   :  { %770 = vrot.lane.b32.xlu1 %v522_v23, %s7149_s18  ;;  %768 = vrot.lane.b32.xlu0 %v7337_v10, %s7149_s18  ;;  %v6413_v44 = vpack.c.bf16 %v575_v43, %v7202_v0 }
  0xa6   :  { %v201_v45 = vpop.permute.xlu1 %200  ;;  %v7407_v46 = vpop.permute.xlu0 %97  ;;  %6414 = vmatpush1.bf16.msra.mxu0 %v6413_v44  ;;  %v7538_v44 = vld [vmem:[%s9335_s0 + $0x68] sm:$0xff] }
  0xa7   :  { %v227_v47 = vsel %vm224_vm0, %v199_v13, %v201_v45  ;;  %v123_v50 = vsel %vm119_vm1, %v96_v41, %v7407_v46 }
  0xa8   :  { %319 = vrot.lane.b32.xlu1 %v7378_v26, %s7145_s10  ;;  %317 = vrot.lane.b32.xlu0 %v522_v23, %s7145_s10  ;;  %v6425_v54 = vpack.c.bf16 %v227_v47, %v122_v52 }
  0xaa   :  { %v652_v48 = vpop.permute.xlu1 %651  ;;  %v7413_v49 = vpop.permute.xlu0 %202 }
  0xab   :  { %v228_v51 = vsel %vm224_vm0, %v201_v45, %v7413_v49 }
  0xac   :  { %426 = vrot.lane.b32.xlu1 %v7378_v26, %s7146_s11  ;;  %424 = vrot.lane.b32.xlu0 %v522_v23, %s7146_s11  ;;  %v6423_v53 = vpack.c.bf16 %v228_v51, %v123_v50 }
  0xae   :  { %v757_v55 = vpop.permute.xlu1 %756  ;;  %v7424_v56 = vpop.permute.xlu0 %653  ;;  %6424 = vmatprep.subr.bf16.mxu1 %v6423_v53 }
  0xaf   :  { %6426 = vmatpush1.bf16.msra.mxu1 %v6425_v54  ;;  %v681_v60 = vsel %vm679_vm5, %v652_v48, %v7424_v56 }
  0xb0   :  { %875 = vrot.lane.b32.xlu1 %v522_v23, %s7151_s19  ;;  %873 = vrot.lane.b32.xlu0 %v7337_v10, %s7151_s19 }
  0xb2   :  { %v650_v58 = vpop.permute.xlu1 %649  ;;  %v7434_v59 = vpop.permute.xlu0 %758 }
  0xb3   :  { %v786_v61 = vsel %vm784_vm6, %v757_v55, %v7434_v59  ;;  %v680_v2 = vsel %vm679_vm5, %v650_v58, %v652_v48 }
  0xb4   :  { %564 = vrot.lane.b32.xlu1 %v7432_v57, %s7147_s14  ;;  %562 = vrot.lane.b32.xlu0 %v7378_v26, %s7147_s14  ;;  %v6415_v62 = vpack.c.bf16 %v786_v61, %v681_v60 }
  0xb6   :  { %v306_v0 = vpop.permute.xlu1 %305  ;;  %v755_v1 = vpop.permute.xlu0 %754  ;;  %6416 = vmatprep.subr.bf16.mxu0 %v6415_v62 }
  0xb7   :  { %v785_v9 = vsel %vm784_vm6, %v755_v1, %v757_v55  ;;  %v332_v18 = vsel %vm329_vm2, %v7370_v24, %v306_v0 }
  0xb8   :  { %113 = vrot.lane.b32.xlu1 %v7447_v63, %s7144_s6  ;;  %111 = vrot.lane.b32.xlu0 %v7432_v57, %s7144_s6  ;;  %v6417_v10 = vpack.c.bf16 %v785_v9, %v680_v2 }
  0xba   :  { %v413_v11 = vpop.permute.xlu1 %412  ;;  %v7455_v12 = vpop.permute.xlu0 %307  ;;  %6418 = vmatpush1.bf16.msra.mxu0 %v6417_v10 }
  0xbb   :  { %v441_v13 = vsel %vm438_vm3, %v7380_v27, %v413_v11  ;;  %v333_v16 = vsel %vm329_vm2, %v306_v0, %v7455_v12 }
  0xbc   :  { %218 = vrot.lane.b32.xlu1 %v7447_v63, %s7143_s5  ;;  %216 = vrot.lane.b32.xlu0 %v7432_v57, %s7143_s5  ;;  %v6429_v20 = vpack.c.bf16 %v441_v13, %v332_v18 }
  0xbe   :  { %v862_v14 = vpop.permute.xlu1 %861  ;;  %v7463_v15 = vpop.permute.xlu0 %414 }
  0xbf   :  { %v442_v17 = vsel %vm438_vm3, %v413_v11, %v7463_v15 }
  0xc0   :  { %669 = vrot.lane.b32.xlu1 %v7432_v57, %s7148_s17  ;;  %667 = vrot.lane.b32.xlu0 %v7378_v26, %s7148_s17  ;;  %v6427_v19 = vpack.c.bf16 %v442_v17, %v333_v16 }
  0xc2   :  { %v860_v21 = vpop.permute.xlu1 %859  ;;  %v7475_v22 = vpop.permute.xlu0 %863  ;;  %6428 = vmatprep.subr.bf16.mxu1 %v6427_v19 }
  0xc3   :  { %v890_v23 = vsel %vm889_vm7, %v860_v21, %v862_v14  ;;  %v891_v25 = vsel %vm889_vm7, %v862_v14, %v7475_v22  ;;  %6430 = vmatpush1.bf16.msra.mxu1 %v6429_v20 }
  0xc4   :  { %774 = vrot.lane.b32.xlu1 %v7432_v57, %s7149_s18  ;;  %772 = vrot.lane.b32.xlu0 %v7378_v26, %s7149_s18  ;;  %v6419_v24 = vpack.c.bf16 %v7150_v5, %v891_v25  ;;  %v6421_v27 = vpack.c.bf16 %v7150_v5, %v890_v23 }
  0xc6   :  { %v7486_v28 = vpop.permute.xlu1 %552  ;;  %v551_v29 = vpop.permute.xlu0 %550  ;;  %6420 = vmatprep.subr.bf16.mxu0 %v6419_v24 }
  0xc7   :  { %v577_v30 = vsel %vm574_vm4, %v7394_v37, %v551_v29  ;;  %v578_v31 = vsel %vm574_vm4, %v551_v29, %v7486_v28  ;;  %6422 = vmatpush1.bf16.msra.mxu0 %v6421_v27 }
  0xc8   :  { %323 = vrot.lane.b32.xlu1 %v7447_v63, %s7145_s10  ;;  %321 = vrot.lane.b32.xlu0 %v7432_v57, %s7145_s10  ;;  %v6431_v34 = vpack.c.bf16 %v578_v31, %v7244_v4  ;;  %v6433_v35 = vpack.c.bf16 %v577_v30, %v7233_v3 }
  0xca   :  { %v7512_v36 = vpop.permute.xlu1 %101  ;;  %v100_v37 = vpop.permute.xlu0 %99  ;;  %6432 = vmatprep.subr.bf16.mxu1 %v6431_v34  ;;  %6125 = vmatmul.mubr.msk.f32.vlgmr.msra.gmra.mrb[0].mxu0 %vm1084_vm8, %v7495_v32 }
  0xcb   :  { %6434 = vmatpush1.bf16.msra.mxu1 %v6433_v35  ;;  %1294 = vmatprep.mubr.f32.mxu0 %v7152_v7  ;;  %v124_v38 = vsel %vm119_vm1, %v7407_v46, %v100_v37  ;;  %v125_v39 = vsel %vm119_vm1, %v100_v37, %v7512_v36 }
  0xcc   :  { %430 = vrot.lane.b32.xlu1 %v7447_v63, %s7146_s11  ;;  %428 = vrot.lane.b32.xlu0 %v7432_v57, %s7146_s11 }
  0xce   :  { %v7521_v3 = vpop.permute.xlu1 %206  ;;  %v205_v4 = vpop.permute.xlu0 %204 }
  0xcf   :  { %v229_v40 = vsel %vm224_vm0, %v7413_v49, %v205_v4  ;;  %v230_v41 = vsel %vm224_vm0, %v205_v4, %v7521_v3 }
  0xd0   :  { %879 = vrot.lane.b32.xlu1 %v7432_v57, %s7151_s19  ;;  %877 = vrot.lane.b32.xlu0 %v7378_v26, %s7151_s19  ;;  %v6443_v42 = vpack.c.bf16 %v230_v41, %v125_v39  ;;  %v6445_v43 = vpack.c.bf16 %v229_v40, %v124_v38  ;;  %v7549_v26 = vld [vmem:[%s9335_s0 + $0x70] sm:$0xff] }
  0xd2   :  { %v7540_v45 = vpop.permute.xlu1 %657  ;;  %v656_v46 = vpop.permute.xlu0 %655  ;;  %6444 = vmatprep.subr.bf16.mxu0 %v6443_v42 }
  0xd3   :  { %6446 = vmatpush1.bf16.msra.mxu0 %v6445_v43  ;;  %v682_v49 = vsel %vm679_vm5, %v7424_v56, %v656_v46  ;;  %v683_v50 = vsel %vm679_vm5, %v656_v46, %v7540_v45 }
  0xd4   :  { %568 = vrot.lane.b32.xlu1 %v7538_v44, %s7147_s14  ;;  %566 = vrot.lane.b32.xlu0 %v7447_v63, %s7147_s14 }
  0xd6   :  { %v7551_v47 = vpop.permute.xlu1 %762  ;;  %v761_v48 = vpop.permute.xlu0 %760 }
  0xd7   :  { %v787_v51 = vsel %vm784_vm6, %v7434_v59, %v761_v48  ;;  %v788_v52 = vsel %vm784_vm6, %v761_v48, %v7551_v47 }
  0xd8   :  { %117 = vrot.lane.b32.xlu1 %v7549_v26, %s7144_s6  ;;  %115 = vrot.lane.b32.xlu0 %v7538_v44, %s7144_s6  ;;  %v6435_v53 = vpack.c.bf16 %v788_v52, %v683_v50  ;;  %v6437_v54 = vpack.c.bf16 %v787_v51, %v682_v49 }
  0xda   :  { %v7565_v55 = vpop.permute.xlu1 %311  ;;  %v310_v56 = vpop.permute.xlu0 %309  ;;  %6436 = vmatprep.subr.bf16.mxu1 %v6435_v53  ;;  %v491_v53 = vld [vmem:[%s9335_s0 + $0x40] sm:$0xff] }
  0xdb   :  { %6438 = vmatpush1.bf16.msra.mxu1 %v6437_v54  ;;  %v334_v59 = vsel %vm329_vm2, %v7455_v12, %v310_v56  ;;  %v335_v60 = vsel %vm329_vm2, %v310_v56, %v7565_v55  ;;  %v490_v54 = vld [vmem:[%s9335_s0 + $0x38] sm:$0xff] }
  0xdc   :  { %222 = vrot.lane.b32.xlu1 %v7549_v26, %s7143_s5  ;;  %220 = vrot.lane.b32.xlu0 %v7538_v44, %s7143_s5 }
  0xde   :  { %v7571_v57 = vpop.permute.xlu1 %418  ;;  %v417_v58 = vpop.permute.xlu0 %416 }
  0xdf   :  { %v443_v61 = vsel %vm438_vm3, %v7463_v15, %v417_v58  ;;  %v444_v62 = vsel %vm438_vm3, %v417_v58, %v7571_v57 }
  0xe0   :  { %673 = vrot.lane.b32.xlu1 %v7538_v44, %s7148_s17  ;;  %671 = vrot.lane.b32.xlu0 %v7447_v63, %s7148_s17  ;;  %v6447_v0 = vpack.c.bf16 %v444_v62, %v335_v60  ;;  %v6449_v1 = vpack.c.bf16 %v443_v61, %v334_v59 }
  0xe2   :  { %v7585_v2 = vpop.permute.xlu1 %867  ;;  %v866_v9 = vpop.permute.xlu0 %865  ;;  %6448 = vmatprep.subr.bf16.mxu0 %v6447_v0 }
  0xe3   :  { %v892_v10 = vsel %vm889_vm7, %v7475_v22, %v866_v9  ;;  %v893_v11 = vsel %vm889_vm7, %v866_v9, %v7585_v2  ;;  %6450 = vmatpush1.bf16.msra.mxu0 %v6449_v1 }
  0xe4   :  { %778 = vrot.lane.b32.xlu1 %v7538_v44, %s7149_s18  ;;  %776 = vrot.lane.b32.xlu0 %v7447_v63, %s7149_s18  ;;  %v6439_v12 = vpack.c.bf16 %v7150_v5, %v893_v11  ;;  %v6441_v13 = vpack.c.bf16 %v7150_v5, %v892_v10 }
  0xe6   :  { %v7597_v14 = vpop.permute.xlu1 %556  ;;  %v555_v15 = vpop.permute.xlu0 %554  ;;  %6440 = vmatprep.subr.bf16.mxu1 %v6439_v12 }
  0xe7   :  { %v579_v16 = vsel %vm574_vm4, %v7486_v28, %v555_v15  ;;  %v580_v17 = vsel %vm574_vm4, %v555_v15, %v7597_v14  ;;  %6442 = vmatpush1.bf16.msra.mxu1 %v6441_v13 }
  0xe8   :  { %327 = vrot.lane.b32.xlu1 %v7549_v26, %s7145_s10  ;;  %325 = vrot.lane.b32.xlu0 %v7538_v44, %s7145_s10  ;;  %v6451_v18 = vpack.c.bf16 %v580_v17, %v7298_v8  ;;  %v6453_v19 = vpack.c.bf16 %v579_v16, %v7286_v6 }
  0xea   :  { %v7609_v20 = vpop.permute.xlu1 %105  ;;  %v104_v21 = vpop.permute.xlu0 %103  ;;  %6126 = vmatmul.mubr.msk.f32.vlgmr.msra.gmra.mrb[0].mxu1 %vm1084_vm8, %v7495_v32  ;;  %6452 = vmatprep.subr.bf16.mxu0 %v6451_v18 }
  0xeb   :  { %6454 = vmatpush1.bf16.msra.mxu0 %v6453_v19  ;;  %1365 = vmatprep.mubr.f32.mxu1 %v7152_v7  ;;  %v127_v8 = vsel %vm119_vm1, %v104_v21, %v7609_v20  ;;  %v126_v23 = vsel %vm119_vm1, %v7512_v36, %v104_v21 }
  0xec   :  { %434 = vrot.lane.b32.xlu1 %v7549_v26, %s7146_s11  ;;  %432 = vrot.lane.b32.xlu0 %v7538_v44, %s7146_s11 }
  0xee   :  { %v7620_v6 = vpop.permute.xlu1 %210  ;;  %v209_v22 = vpop.permute.xlu0 %208 }
  0xef   :  { %v231_v25 = vsel %vm224_vm0, %v7521_v3, %v209_v22  ;;  %v232_v24 = vsel %vm224_vm0, %v209_v22, %v7620_v6 }
  0xf0   :  { %883 = vrot.lane.b32.xlu1 %v7538_v44, %s7151_s19  ;;  %881 = vrot.lane.b32.xlu0 %v7447_v63, %s7151_s19  ;;  %v6463_v27 = vpack.c.bf16 %v232_v24, %v127_v8  ;;  %v6465_v28 = vpack.c.bf16 %v231_v25, %v126_v23 }
  0xf2   :  { %v7632_v29 = vpop.permute.xlu1 %661  ;;  %v660_v30 = vpop.permute.xlu0 %659  ;;  %6464 = vmatprep.subr.bf16.mxu1 %v6463_v27 }
  0xf3   :  { %6466 = vmatpush1.bf16.msra.mxu1 %v6465_v28  ;;  %v685_v31 = vsel %vm679_vm5, %v660_v30, %v7632_v29  ;;  %v684_v63 = vsel %vm679_vm5, %v7540_v45, %v660_v30 }
  0xf4   :  { %572 = vrot.lane.b32.xlu1 %v7500_v33, %s7147_s14  ;;  %570 = vrot.lane.b32.xlu0 %v7549_v26, %s7147_s14 }
  0xf6   :  { %v7640_v34 = vpop.permute.xlu1 %766  ;;  %v765_v35 = vpop.permute.xlu0 %764 }
  0xf7   :  { %v789_v36 = vsel %vm784_vm6, %v7551_v47, %v765_v35  ;;  %v790_v37 = vsel %vm784_vm6, %v765_v35, %v7640_v34 }
  0xf8   :  { %677 = vrot.lane.b32.xlu1 %v7500_v33, %s7148_s17  ;;  %675 = vrot.lane.b32.xlu0 %v7549_v26, %s7148_s17  ;;  %v6455_v3 = vpack.c.bf16 %v790_v37, %v685_v31  ;;  %v6457_v4 = vpack.c.bf16 %v789_v36, %v684_v63 }
  0xfa   :  { %v7652_v38 = vpop.permute.xlu1 %315  ;;  %v314_v39 = vpop.permute.xlu0 %313  ;;  %6456 = vmatprep.subr.bf16.mxu0 %v6455_v3 }
  0xfb   :  { %6458 = vmatpush1.bf16.msra.mxu0 %v6457_v4  ;;  %v337_v40 = vsel %vm329_vm2, %v314_v39, %v7652_v38  ;;  %v336_v43 = vsel %vm329_vm2, %v7565_v55, %v314_v39  ;;  %v493_v4 = vld [vmem:[%s9335_s0 + $0x50] sm:$0xff] }
  0xfc   :  { %782 = vrot.lane.b32.xlu1 %v7500_v33, %s7149_s18  ;;  %780 = vrot.lane.b32.xlu0 %v7549_v26, %s7149_s18 }
  0xfe   :  { %v7660_v41 = vpop.permute.xlu1 %422  ;;  %v421_v42 = vpop.permute.xlu0 %420 }
  0xff   :  { %v445_v44 = vsel %vm438_vm3, %v7571_v57, %v421_v42  ;;  %v446_v45 = vsel %vm438_vm3, %v421_v42, %v7660_v41 }
 0x100   :  { %887 = vrot.lane.b32.xlu1 %v7500_v33, %s7151_s19  ;;  %885 = vrot.lane.b32.xlu0 %v7549_v26, %s7151_s19  ;;  %v6467_v46 = vpack.c.bf16 %v446_v45, %v337_v40  ;;  %v6469_v47 = vpack.c.bf16 %v445_v44, %v336_v43 }
 0x102   :  { %v7672_v48 = vpop.permute.xlu1 %871  ;;  %v870_v49 = vpop.permute.xlu0 %869  ;;  %6468 = vmatprep.subr.bf16.mxu1 %v6467_v46 }
 0x103   :  { %v894_v50 = vsel %vm889_vm7, %v7585_v2, %v870_v49  ;;  %v895_v51 = vsel %vm889_vm7, %v870_v49, %v7672_v48  ;;  %6470 = vmatpush1.bf16.msra.mxu1 %v6469_v47 }
 0x104   :  { %436 = vrot.lane.b32.xlu0 %v7500_v33, %s7146_s11  ;;  %v6459_v52 = vpack.c.bf16 %v7150_v5, %v895_v51  ;;  %v6461_v26 = vpack.c.bf16 %v7150_v5, %v894_v50  ;;  %1809 = vrot.lane.b32.xlu1 %v7152_v7, %s7144_s6 }
 0x106   :  { %v7690_v55 = vpop.permute.xlu1 %560  ;;  %v559_v56 = vpop.permute.xlu0 %558  ;;  %6460 = vmatprep.subr.bf16.mxu0 %v6459_v52 }
 0x107   :  { %v581_v33 = vsel %vm574_vm4, %v7597_v14, %v559_v56  ;;  %v582_v57 = vsel %vm574_vm4, %v559_v56, %v7690_v55  ;;  %6462 = vmatpush1.bf16.msra.mxu0 %v6461_v26 }
 0x108   :  { %v6471_v58 = vpack.c.bf16 %v582_v57, %v491_v53  ;;  %v6473_v59 = vpack.c.bf16 %v581_v33, %v490_v54  ;;  %2017 = vrot.lane.b32.xlu1 %v7152_v7, %s7145_s10  ;;  %1913 = vrot.lane.b32.xlu0 %v7152_v7, %s7143_s5 }
 0x10a   :  { %v7700_v60 = vpop.permute.xlu1 %109  ;;  %v108_v61 = vpop.permute.xlu0 %107  ;;  %6472 = vmatprep.subr.bf16.mxu1 %v6471_v58  ;;  %6127 = vmatmul.mubr.msk.f32.vlgmr.msra.gmra.mrb[2].mxu0 %vm1084_vm8, %v7495_v32 }
 0x10b   :  { %6474 = vmatpush1.bf16.msra.mxu1 %v6473_v59  ;;  %1436 = vmatprep.mubr.f32.mxu0 %v7152_v7  ;;  %v129_v62 = vsel %vm119_vm1, %v108_v61, %v7700_v60  ;;  %v128_v2 = vsel %vm119_vm1, %v7609_v20, %v108_v61 }
 0x10c   :  { %2123 = vrot.lane.b32.xlu0 %v7152_v7, %s7146_s11 }
 0x10e   :  { %v215_v0 = vpop.permute.xlu1 %214  ;;  %v213_v1 = vpop.permute.xlu0 %212 }
 0x10f   :  { %v233_v9 = vsel %vm224_vm0, %v7620_v6, %v213_v1  ;;  %v234_v10 = vsel %vm224_vm0, %v213_v1, %v215_v0 }
 0x110   :  { %v6483_v11 = vpack.c.bf16 %v234_v10, %v129_v62  ;;  %v6485_v12 = vpack.c.bf16 %v233_v9, %v128_v2 }
 0x112   :  { %v7714_v13 = vpop.permute.xlu1 %665  ;;  %v664_v14 = vpop.permute.xlu0 %663  ;;  %6484 = vmatprep.subr.bf16.mxu0 %v6483_v11 }
 0x113   :  { %6486 = vmatpush1.bf16.msra.mxu0 %v6485_v12  ;;  %v687_v15 = vsel %vm679_vm5, %v664_v14, %v7714_v13  ;;  %v686_v18 = vsel %vm679_vm5, %v7632_v29, %v664_v14 }
 0x116   :  { %v771_v16 = vpop.permute.xlu1 %770  ;;  %v769_v17 = vpop.permute.xlu0 %768 }
 0x117   :  { %v791_v19 = vsel %vm784_vm6, %v7640_v34, %v769_v17  ;;  %v792_v20 = vsel %vm784_vm6, %v769_v17, %v771_v16 }
 0x118   :  { %v6475_v21 = vpack.c.bf16 %v792_v20, %v687_v15  ;;  %v6477_v8 = vpack.c.bf16 %v791_v19, %v686_v18 }
 0x11a   :  { %v7723_v6 = vpop.permute.xlu1 %319  ;;  %v318_v22 = vpop.permute.xlu0 %317  ;;  %6476 = vmatprep.subr.bf16.mxu1 %v6475_v21 }
 0x11b   :  { %6478 = vmatpush1.bf16.msra.mxu1 %v6477_v8  ;;  %v339_v23 = vsel %vm329_vm2, %v318_v22, %v7723_v6  ;;  %v338_v27 = vsel %vm329_vm2, %v7652_v38, %v318_v22  ;;  %v492_v38 = vld [vmem:[%s9335_s0 + $0x48] sm:$0xff]  ;;  %v495_v8 = vld [vmem:[%s9335_s0 + $0x60] sm:$0xff] }
 0x11e   :  { %v427_v25 = vpop.permute.xlu1 %426  ;;  %v425_v24 = vpop.permute.xlu0 %424 }
 0x11f   :  { %v447_v28 = vsel %vm438_vm3, %v7660_v41, %v425_v24  ;;  %v448_v29 = vsel %vm438_vm3, %v425_v24, %v427_v25 }
 0x120   :  { %v6487_v30 = vpack.c.bf16 %v448_v29, %v339_v23  ;;  %v6489_v31 = vpack.c.bf16 %v447_v28, %v338_v27 }
 0x122   :  { %v876_v34 = vpop.permute.xlu1 %875  ;;  %v874_v35 = vpop.permute.xlu0 %873  ;;  %6488 = vmatprep.subr.bf16.mxu0 %v6487_v30 }
 0x123   :  { %v896_v63 = vsel %vm889_vm7, %v7672_v48, %v874_v35  ;;  %v897_v36 = vsel %vm889_vm7, %v874_v35, %v876_v34  ;;  %6490 = vmatpush1.bf16.msra.mxu0 %v6489_v31 }
 0x124   :  { %v6479_v37 = vpack.c.bf16 %v7150_v5, %v897_v36  ;;  %v6481_v3 = vpack.c.bf16 %v7150_v5, %v896_v63 }
 0x126   :  { %v565_v39 = vpop.permute.xlu1 %564  ;;  %v563_v40 = vpop.permute.xlu0 %562  ;;  %6480 = vmatprep.subr.bf16.mxu1 %v6479_v37 }
 0x127   :  { %v583_v41 = vsel %vm574_vm4, %v7690_v55, %v563_v40  ;;  %v584_v42 = vsel %vm574_vm4, %v563_v40, %v565_v39  ;;  %6482 = vmatpush1.bf16.msra.mxu1 %v6481_v3 }
 0x128   :  { %v6491_v43 = vpack.c.bf16 %v584_v42, %v493_v4  ;;  %v6493_v44 = vpack.c.bf16 %v583_v41, %v492_v38 }
 0x12a   :  { %v7746_v45 = vpop.permute.xlu1 %113  ;;  %v112_v46 = vpop.permute.xlu0 %111  ;;  %6492 = vmatprep.subr.bf16.mxu0 %v6491_v43  ;;  %6128 = vmatmul.mubr.msk.f32.vlgmr.msra.gmra.mrb[2].mxu1 %vm1084_vm8, %v7495_v32 }
 0x12b   :  { %6494 = vmatpush1.bf16.msra.mxu0 %v6493_v44  ;;  %1507 = vmatprep.mubr.f32.mxu1 %v7152_v7  ;;  %v131_v47 = vsel %vm119_vm1, %v112_v46, %v7746_v45  ;;  %v130_v50 = vsel %vm119_vm1, %v7700_v60, %v112_v46 }
 0x12e   :  { %v219_v48 = vpop.permute.xlu1 %218  ;;  %v217_v49 = vpop.permute.xlu0 %216 }
 0x12f   :  { %v235_v51 = vsel %vm224_vm0, %v215_v0, %v217_v49  ;;  %v236_v52 = vsel %vm224_vm0, %v217_v49, %v219_v48 }
 0x130   :  { %v6503_v26 = vpack.c.bf16 %v236_v52, %v131_v47  ;;  %v6505_v53 = vpack.c.bf16 %v235_v51, %v130_v50 }
 0x132   :  { %v7757_v54 = vpop.permute.xlu1 %669  ;;  %v668_v55 = vpop.permute.xlu0 %667  ;;  %6504 = vmatprep.subr.bf16.mxu1 %v6503_v26 }
 0x133   :  { %6506 = vmatpush1.bf16.msra.mxu1 %v6505_v53  ;;  %v689_v56 = vsel %vm679_vm5, %v668_v55, %v7757_v54  ;;  %v688_v58 = vsel %vm679_vm5, %v7714_v13, %v668_v55 }
 0x136   :  { %v775_v33 = vpop.permute.xlu1 %774  ;;  %v773_v57 = vpop.permute.xlu0 %772 }
 0x137   :  { %v793_v59 = vsel %vm784_vm6, %v771_v16, %v773_v57  ;;  %v794_v60 = vsel %vm784_vm6, %v773_v57, %v775_v33 }
 0x138   :  { %v6495_v61 = vpack.c.bf16 %v794_v60, %v689_v56  ;;  %v6497_v62 = vpack.c.bf16 %v793_v59, %v688_v58 }
 0x13a   :  { %v7765_v0 = vpop.permute.xlu1 %323  ;;  %v322_v1 = vpop.permute.xlu0 %321  ;;  %6496 = vmatprep.subr.bf16.mxu0 %v6495_v61 }
 0x13b   :  { %6498 = vmatpush1.bf16.msra.mxu0 %v6497_v62  ;;  %v341_v2 = vsel %vm329_vm2, %v322_v1, %v7765_v0  ;;  %v340_v11 = vsel %vm329_vm2, %v7723_v6, %v322_v1  ;;  %v494_v6 = vld [vmem:[%s9335_s0 + $0x58] sm:$0xff]  ;;  %v497_v62 = vld [vmem:[%s9335_s0 + $0x70] sm:$0xff] }
 0x13e   :  { %v7769_v9 = vpop.permute.xlu1 %430  ;;  %v429_v10 = vpop.permute.xlu0 %428 }
 0x13f   :  { %v449_v12 = vsel %vm438_vm3, %v427_v25, %v429_v10  ;;  %v450_v13 = vsel %vm438_vm3, %v429_v10, %v7769_v9 }
 0x140   :  { %v6507_v14 = vpack.c.bf16 %v450_v13, %v341_v2  ;;  %v6509_v15 = vpack.c.bf16 %v449_v12, %v340_v11  ;;  %v7153_v13 = vmov 0.0|0.0  }
 0x142   :  { %v7776_v16 = vpop.permute.xlu1 %879  ;;  %v878_v17 = vpop.permute.xlu0 %877  ;;  %6508 = vmatprep.subr.bf16.mxu1 %v6507_v14 }
 0x143   :  { %v898_v18 = vsel %vm889_vm7, %v876_v34, %v878_v17  ;;  %v899_v19 = vsel %vm889_vm7, %v878_v17, %v7776_v16  ;;  %6510 = vmatpush1.bf16.msra.mxu1 %v6509_v15 }
 0x144   :  { %v6499_v20 = vpack.c.bf16 %v7150_v5, %v899_v19  ;;  %v6501_v21 = vpack.c.bf16 %v7150_v5, %v898_v18 }
 0x146   :  { %v7789_v22 = vpop.permute.xlu1 %568  ;;  %v567_v23 = vpop.permute.xlu0 %566  ;;  %6500 = vmatprep.subr.bf16.mxu0 %v6499_v20 }
 0x147   :  { %v585_v25 = vsel %vm574_vm4, %v565_v39, %v567_v23  ;;  %v586_v24 = vsel %vm574_vm4, %v567_v23, %v7789_v22  ;;  %6502 = vmatpush1.bf16.msra.mxu0 %v6501_v21 }
 0x148   :  { %v6511_v27 = vpack.c.bf16 %v586_v24, %v495_v8  ;;  %v6513_v28 = vpack.c.bf16 %v585_v25, %v494_v6 }
 0x14a   :  { %v118_v29 = vpop.permute.xlu1 %117  ;;  %v116_v30 = vpop.permute.xlu0 %115  ;;  %6512 = vmatprep.subr.bf16.mxu1 %v6511_v27  ;;  %6129 = vmatmul.mubr.msk.f32.vlgmr.msra.gmra.mrb[4].mxu0 %vm1084_vm8, %v7495_v32 }
 0x14b   :  { %163 = vst.msk [vmem:[#allocation4 + $0x70] sm:$0xff] %vm52_vm9, %v118_v29  ;;  %6514 = vmatpush1.bf16.msra.mxu1 %v6513_v28  ;;  %1578 = vmatprep.mubr.f32.mxu0 %v7152_v7  ;;  %v133_v31 = vsel %vm119_vm1, %v116_v30, %v118_v29  ;;  %v132_v63 = vsel %vm119_vm1, %v7746_v45, %v116_v30  ;;  %v7853_v28 = vld [vmem:[#allocation4 + $0x440] sm:$0xff] }
 0x14e   :  { %v223_v34 = vpop.permute.xlu1 %222  ;;  %v221_v35 = vpop.permute.xlu0 %220 }
 0x14f   :  { %268 = vst.msk [vmem:[#allocation4 + $0xe8] sm:$0xff] %vm52_vm9, %v223_v34  ;;  %v237_v36 = vsel %vm224_vm0, %v219_v48, %v221_v35  ;;  %v238_v37 = vsel %vm224_vm0, %v221_v35, %v223_v34  ;;  %v7862_v35 = vld [vmem:[#allocation2] sm:$0xff] }
 0x150   :  { %v6523_v3 = vpack.c.bf16 %v238_v37, %v133_v31  ;;  %v6525_v4 = vpack.c.bf16 %v237_v36, %v132_v63  ;;  %v1008_v63 = vld [vmem:[#allocation4 + $0x250] sm:$0xff]  ;;  %35 = vst.msk [vmem:[#allocation2 + $0x78] sm:$0xff] %vm34_vm11, %v7862_v35  ;;  %37 = vst.msk [vmem:[#allocation3 + $0x78] sm:$0xff] %vm34_vm11, %v7862_v35 }
 0x152   :  { %v7804_v38 = vpop.permute.xlu1 %673  ;;  %v672_v39 = vpop.permute.xlu0 %671  ;;  %6524 = vmatprep.subr.bf16.mxu0 %v6523_v3 }
 0x153   :  { %6526 = vmatpush1.bf16.msra.mxu0 %v6525_v4  ;;  %v691_v40 = vsel %vm679_vm5, %v672_v39, %v7804_v38  ;;  %v690_v43 = vsel %vm679_vm5, %v7757_v54, %v672_v39 }
 0x156   :  { %v779_v41 = vpop.permute.xlu1 %778  ;;  %v777_v42 = vpop.permute.xlu0 %776  ;;  %v963_v10 = vld [vmem:[#allocation4 + $0xe8] sm:$0xff] }
 0x157   :  { %v795_v44 = vsel %vm784_vm6, %v775_v33, %v777_v42  ;;  %v796_v45 = vsel %vm784_vm6, %v777_v42, %v779_v41 }
 0x158   :  { %v6515_v46 = vpack.c.bf16 %v796_v45, %v691_v40  ;;  %v6517_v47 = vpack.c.bf16 %v795_v44, %v690_v43  ;;  %v1083_v43 = vld [vmem:[#allocation4 + $0x4a8] sm:$0xff]  ;;  %v1672_v45 = vlaneseq }
 0x15a   :  { %v328_v48 = vpop.permute.xlu1 %327  ;;  %v326_v49 = vpop.permute.xlu0 %325  ;;  %6516 = vmatprep.subr.bf16.mxu1 %v6515_v46  ;;  %v7871_v46 = vshrl.u32 %v1672_v45, 7 }
 0x15b   :  { %373 = vst.msk [vmem:[#allocation4 + $0x160] sm:$0xff] %vm52_vm9, %v328_v48  ;;  %6518 = vmatpush1.bf16.msra.mxu1 %v6517_v47  ;;  %v343_v50 = vsel %vm329_vm2, %v326_v49, %v328_v48  ;;  %v342_v26 = vsel %vm329_vm2, %v7765_v0, %v326_v49  ;;  %v496_v0 = vld [vmem:[%s9335_s0 + $0x68] sm:$0xff]  ;;  %v7877_v48 = vld [vmem:[%s9336_s1] sm:$0xff] }
 0x15c   :  { %v1674_v47 = vsub.s32 0, %v7871_v46  ;;  %v1678_v49 = vsub.s32 1, %v7871_v46 }
 0x15e   :  { %v7814_v51 = vpop.permute.xlu1 %434  ;;  %v433_v52 = vpop.permute.xlu0 %432 }
 0x15f   :  { %v451_v53 = vsel %vm438_vm3, %v7769_v9, %v433_v52  ;;  %v452_v54 = vsel %vm438_vm3, %v433_v52, %v7814_v51  ;;  %v948_v9 = vld [vmem:[#allocation4 + $0x70] sm:$0xff] }
 0x160   :  { %v6527_v55 = vpack.c.bf16 %v452_v54, %v343_v50  ;;  %v6529_v56 = vpack.c.bf16 %v451_v53, %v342_v26  ;;  %v6544_v15 = vpack.c.bf16 %v963_v10, %v948_v9  ;;  %v7883_v50 = vrot.slane %v7877_v48, %v1674_v47 }
 0x161   :  { %v1694_v9 = vsub.s32 5, %v7871_v46 }
 0x162   :  { %v884_v33 = vpop.permute.xlu1 %883  ;;  %v882_v57 = vpop.permute.xlu0 %881  ;;  %6528 = vmatprep.subr.bf16.mxu0 %v6527_v55  ;;  %v978_v36 = vld [vmem:[#allocation4 + $0x160] sm:$0xff] }
 0x163   :  { %v900_v58 = vsel %vm889_vm7, %v7776_v16, %v882_v57  ;;  %v901_v59 = vsel %vm889_vm7, %v882_v57, %v884_v33  ;;  %6530 = vmatpush1.bf16.msra.mxu0 %v6529_v56  ;;  %v1682_v56 = vsub.s32 2, %v7871_v46 }
 0x164   :  { %v6519_v60 = vpack.c.bf16 %v7150_v5, %v901_v59  ;;  %v6521_v61 = vpack.c.bf16 %v7150_v5, %v900_v58 }
 0x165   :  { %v7911_v57 = vrot.slane %v7877_v48, %v1682_v56 }
 0x166   :  { %v573_v1 = vpop.permute.xlu1 %572  ;;  %v571_v2 = vpop.permute.xlu0 %570  ;;  %6520 = vmatprep.subr.bf16.mxu1 %v6519_v60 }
 0x167   :  { %618 = vst.msk [vmem:[#allocation4 + $0x2c8] sm:$0xff] %vm52_vm9, %v573_v1  ;;  %v587_v11 = vsel %vm574_vm4, %v7789_v22, %v571_v2  ;;  %v588_v5 = vsel %vm574_vm4, %v571_v2, %v573_v1  ;;  %6522 = vmatpush1.bf16.msra.mxu1 %v6521_v61  ;;  %v1690_v2 = vsub.s32 4, %v7871_v46 }
 0x168   :  { %v6531_v12 = vpack.c.bf16 %v588_v5, %v497_v62  ;;  %6543 = vmatprep.subr.bf16.mxu1 %v7153_v13  ;;  %v6533_v14 = vpack.c.bf16 %v587_v11, %v496_v0  ;;  %v7964_v5 = vrot.slane %v7877_v48, %v1694_v9 }
 0x169   :  { %v7959_v10 = vrot.slane %v7877_v48, %v1690_v2 }
 0x16a   :  { %v678_v16 = vpop.permute.xlu1 %677  ;;  %v676_v17 = vpop.permute.xlu0 %675  ;;  %6532 = vmatprep.subr.bf16.mxu0 %v6531_v12  ;;  %6130 = vmatmul.mubr.msk.f32.vlgmr.msra.gmra.mrb[4].mxu1 %vm1084_vm8, %v7495_v32 }
 0x16b   :  { %723 = vst.msk [vmem:[#allocation4 + $0x340] sm:$0xff] %vm52_vm9, %v678_v16  ;;  %6534 = vmatpush1.bf16.msra.mxu0 %v6533_v14  ;;  %6545 = vmatpush3.bf16.msra.mxu1 %v6544_v15  ;;  %v693_v18 = vsel %vm679_vm5, %v676_v17, %v678_v16  ;;  %v692_v21 = vsel %vm679_vm5, %v7804_v38, %v676_v17 }
 0x16c   :  { %6546 = vmatprep.subr.bf16.mxu1 %v7153_v13  ;;  %6334 = vmatprep.mubr.msk.f32.mxu1 %vm7154_vm10, %v7152_v7 }
 0x16e   :  { %v783_v19 = vpop.permute.xlu1 %782  ;;  %v781_v20 = vpop.permute.xlu0 %780  ;;  %v1023_v3 = vld [vmem:[#allocation4 + $0x2c8] sm:$0xff] }
 0x16f   :  { %828 = vst.msk [vmem:[#allocation4 + $0x3b8] sm:$0xff] %vm52_vm9, %v783_v19  ;;  %v797_v8 = vsel %vm784_vm6, %v779_v41, %v781_v20  ;;  %v798_v6 = vsel %vm784_vm6, %v781_v20, %v783_v19  ;;  %v6550_v38 = vpack.c.bf16 %v1023_v3, %v1008_v63  ;;  %v1702_v19 = vsub.s32 7, %v7871_v46 }
 0x170   :  { %v6535_v22 = vpack.c.bf16 %v798_v6, %v693_v18  ;;  %v6537_v23 = vpack.c.bf16 %v797_v8, %v692_v21  ;;  %v1698_v18 = vsub.s32 6, %v7871_v46 }
 0x171   :  { %v8010_v8 = vrot.slane %v7877_v48, %v1702_v19 }
 0x172   :  { %v888_v25 = vpop.permute.xlu1 %887  ;;  %v886_v24 = vpop.permute.xlu0 %885  ;;  %6536 = vmatprep.subr.bf16.mxu0 %v6535_v22  ;;  %v1038_v39 = vld [vmem:[#allocation4 + $0x340] sm:$0xff]  ;;  %v8007_v20 = vrot.slane %v7877_v48, %v1698_v18 }
 0x173   :  { %933 = vst.msk [vmem:[#allocation4 + $0x430] sm:$0xff] %vm52_vm9, %v888_v25  ;;  %v902_v7 = vsel %vm889_vm7, %v884_v33, %v886_v24  ;;  %v903_v27 = vsel %vm889_vm7, %v886_v24, %v888_v25  ;;  %6538 = vmatpush1.bf16.msra.mxu0 %v6537_v23  ;;  %v1686_v33 = vsub.s32 3, %v7871_v46 }
 0x174   :  { %v6539_v29 = vpack.c.bf16 %v7853_v28, %v903_v27  ;;  %v6541_v30 = vpack.c.bf16 %v7853_v28, %v902_v7 }
 0x175   :  { %v7916_v59 = vrot.slane %v7877_v48, %v1686_v33 }
 0x176   :  { %v437_v31 = vpop.permute.xlu0 %436  ;;  %6540 = vmatprep.subr.bf16.mxu0 %v6539_v29  ;;  %v1053_v40 = vld [vmem:[#allocation4 + $0x3b8] sm:$0xff]  ;;  %v8026_v7 = vpop.permute.xlu1 %1809  ;;  %v8037_v29 = vld [vmem:[%s9336_s1 + $0x8] sm:$0x7f] }
 0x177   :  { %v453_v34 = vsel %vm438_vm3, %v7814_v51, %v437_v31  ;;  %6542 = vmatpush1.bf16.msra.mxu0 %v6541_v30  ;;  %v6553_v41 = vpack.c.bf16 %v1053_v40, %v1038_v39  ;;  %v8048_v31 = vrot.slane %v8037_v29, %v1674_v47  ;;  %v8053_v63 = vrot.slane %v8037_v29, %v1678_v49 }
 0x178   :  { %483 = vst.msk [vmem:[#allocation4 + $0x1d8] sm:$0xff] %vm52_vm9, %v453_v34 }
 0x17a   :  { %6131 = vmatmul.mubr.msk.f32.vlgmr.msra.gmra.mrb[6].mxu0 %vm1084_vm8, %v7495_v32  ;;  %v1068_v42 = vld [vmem:[#allocation4 + $0x430] sm:$0xff]  ;;  %v8032_v27 = vpop.permute.xlu1 %2017  ;;  %v1914_v40 = vpop.permute.xlu0 %1913 }
 0x17b   :  { %2863 = vmatprep.mubr.f32.mxu0 %v7862_v35  ;;  %v6556_v44 = vpack.c.bf16 %v1083_v43, %v1068_v42 }
 0x17e   :  { %v8079_v42 = vpop.permute.xlu0 %2123 }
 0x17f   :  { %v993_v37 = vld [vmem:[#allocation4 + $0x1d8] sm:$0xff] }
 0x180   :  { %v6547_v4 = vpack.c.bf16 %v993_v37, %v978_v36 }
 0x182   :  { %6548 = vmatpush3.bf16.msra.mxu1 %v6547_v4 }
 0x183   :  { %6549 = vmatprep.subr.bf16.mxu1 %v7153_v13 }
 0x186   :  { %6551 = vmatpush3.bf16.msra.mxu1 %v6550_v38 }
 0x187   :  { %6552 = vmatprep.subr.bf16.mxu1 %v7153_v13 }
 0x18a   :  { %6554 = vmatpush3.bf16.msra.mxu1 %v6553_v41 }
 0x18b   :  { %6555 = vmatprep.subr.bf16.mxu1 %v7153_v13 }
 0x18e   :  { %6557 = vmatpush3.bf16.msra.mxu1 %v6556_v44 }
 0x191   :  { %6335 = vmatmul.mubr.msk.f32.vlgmr.msra.gmra.mrb[6].mxu1 %vm1084_vm8, %v7495_v32  ;;  %v7888_v32 = vrot.slane %v7877_v48, %v1678_v49  ;;  %v8100_v49 = vrot.slane %v8037_v29, %v1682_v56 }
 0x192   :  { %2934 = vmatprep.mubr.f32.mxu1 %v7862_v35 }
 0x19d   :  { %v1154_v51 = vpop.f32.mrb[0].mxu0 }
 0x19e   :  { %v1655_v52 = vmax.f32 %v1154_v51, 0.0  ;;  %v1156_v26 = vpop.f32.mrb[1].mxu0 }
 0x19f   :  { %v1656_v53 = vmax.f32 %v1156_v26, 0.0 }
 0x1a0   :  { %v7891_v54 = vmul.f32 %v7883_v50, %v1655_v52 }
 0x1a1   :  { %v7894_v55 = vmul.f32 %v7888_v32, %v1656_v53  ;;  %v8109_v53 = vrot.slane %v8037_v29, %v1686_v33 }
 0x1a2   :  { %1762 = vst [vmem:[#allocation2 + $0x8] sm:$0xff] %v7891_v54  ;;  %1811 = vrot.lane.b32.xlu1 %v7891_v54, %s7144_s6 }
 0x1a3   :  { %1763 = vst [vmem:[#allocation2 + $0x10] sm:$0xff] %v7894_v55 }
 0x1a6   :  { %1915 = vrot.lane.b32.xlu1 %v7891_v54, %s7143_s5 }
 0x1aa   :  { %2019 = vrot.lane.b32.xlu1 %v7891_v54, %s7145_s10 }
 0x1ae   :  { %2125 = vrot.lane.b32.xlu1 %v7891_v54, %s7146_s11 }
 0x1bd   :  { %v1225_v58 = vpop.f32.mrb[0].mxu1 }
 0x1be   :  { %v1657_v60 = vmax.f32 %v1225_v58, 0.0  ;;  %v1227_v61 = vpop.f32.mrb[1].mxu1 }
 0x1bf   :  { %v1658_v62 = vmax.f32 %v1227_v61, 0.0 }
 0x1c0   :  { %v7919_v0 = vmul.f32 %v7911_v57, %v1657_v60 }
 0x1c1   :  { %v7922_v1 = vmul.f32 %v7916_v59, %v1658_v62 }
 0x1c2   :  { %1764 = vst [vmem:[#allocation2 + $0x18] sm:$0xff] %v7919_v0  ;;  %2264 = vrot.lane.b32.xlu0 %v7919_v0, %s7147_s14  ;;  %1815 = vrot.lane.b32.xlu1 %v7919_v0, %s7144_s6 }
 0x1c3   :  { %1765 = vst [vmem:[#allocation2 + $0x20] sm:$0xff] %v7922_v1 }
 0x1c6   :  { %2023 = vrot.lane.b32.xlu0 %v7919_v0, %s7145_s10  ;;  %1919 = vrot.lane.b32.xlu1 %v7919_v0, %s7143_s5 }
 0x1ca   :  { %2129 = vrot.lane.b32.xlu0 %v7919_v0, %s7146_s11  ;;  %2260 = vrot.lane.b32.xlu1 %v7891_v54, %s7147_s14 }
 0x1ce   :  { %2364 = vrot.lane.b32.xlu0 %v7891_v54, %s7148_s17  ;;  %2368 = vrot.lane.b32.xlu1 %v7919_v0, %s7148_s17 }
 0x1d2   :  { %2572 = vrot.lane.b32.xlu0 %v7891_v54, %s7151_s19  ;;  %2472 = vrot.lane.b32.xlu1 %v7919_v0, %s7149_s18 }
 0x1d6   :  { %1813 = vrot.lane.b32.xlu0 %v7894_v55, %s7144_s6  ;;  %2468 = vrot.lane.b32.xlu1 %v7891_v54, %s7149_s18 }
 0x1da   :  { %1917 = vrot.lane.b32.xlu0 %v7894_v55, %s7143_s5  ;;  %2576 = vrot.lane.b32.xlu1 %v7919_v0, %s7151_s19 }
 0x1dd   :  { %v1296_v11 = vpop.f32.mrb[2].mxu0 }
 0x1de   :  { %2021 = vrot.lane.b32.xlu0 %v7894_v55, %s7145_s10  ;;  %2262 = vrot.lane.b32.xlu1 %v7894_v55, %s7147_s14  ;;  %v1659_v12 = vmax.f32 %v1296_v11, 0.0  ;;  %v1298_v14 = vpop.f32.mrb[3].mxu0 }
 0x1df   :  { %v1660_v15 = vmax.f32 %v1298_v14, 0.0 }
 0x1e0   :  { %v1751_v16 = vmul.f32 %v7959_v10, %v1659_v12 }
 0x1e1   :  { %v7972_v17 = vmul.f32 %v7964_v5, %v1660_v15 }
 0x1e2   :  { %2127 = vrot.lane.b32.xlu0 %v7894_v55, %s7146_s11  ;;  %2025 = vrot.lane.b32.xlu1 %v7922_v1, %s7145_s10  ;;  %1766 = vst [vmem:[#allocation2 + $0x28] sm:$0xff] %v1751_v16  ;;  %2219 = vst [vmem:[#allocation4 + $0x200] sm:$0xff] %v1751_v16 }
 0x1e3   :  { %1767 = vst [vmem:[#allocation2 + $0x30] sm:$0xff] %v7972_v17  ;;  %2220 = vst [vmem:[#allocation4 + $0x208] sm:$0xff] %v7972_v17 }
 0x1e6   :  { %1817 = vrot.lane.b32.xlu0 %v7922_v1, %s7144_s6  ;;  %2131 = vrot.lane.b32.xlu1 %v7922_v1, %s7146_s11 }
 0x1ea   :  { %1921 = vrot.lane.b32.xlu0 %v7922_v1, %s7143_s5  ;;  %2370 = vrot.lane.b32.xlu1 %v7922_v1, %s7148_s17 }
 0x1ee   :  { %2366 = vrot.lane.b32.xlu0 %v7894_v55, %s7148_s17  ;;  %2474 = vrot.lane.b32.xlu1 %v7922_v1, %s7149_s18 }
 0x1f2   :  { %2470 = vrot.lane.b32.xlu0 %v7894_v55, %s7149_s18  ;;  %2578 = vrot.lane.b32.xlu1 %v7922_v1, %s7151_s19 }
 0x1f6   :  { %2574 = vrot.lane.b32.xlu0 %v7894_v55, %s7151_s19  ;;  %2268 = vrot.lane.b32.xlu1 %v1751_v16, %s7147_s14 }
 0x1fa   :  { %2266 = vrot.lane.b32.xlu0 %v7922_v1, %s7147_s14  ;;  %1819 = vrot.lane.b32.xlu1 %v1751_v16, %s7144_s6 }
 0x1fd   :  { %v1367_v21 = vpop.f32.mrb[2].mxu1 }
 0x1fe   :  { %v1661_v6 = vmax.f32 %v1367_v21, 0.0  ;;  %v1369_v22 = vpop.f32.mrb[3].mxu1  ;;  %2372 = vrot.lane.b32.xlu0 %v1751_v16, %s7148_s17  ;;  %1923 = vrot.lane.b32.xlu1 %v1751_v16, %s7143_s5 }
 0x1ff   :  { %v1662_v23 = vmax.f32 %v1369_v22, 0.0  ;;  %v8150_v22 = vrot.slane %v8037_v29, %v1690_v2  ;;  %v8162_v2 = vrot.slane %v8037_v29, %v1694_v9 }
 0x200   :  { %v1753_v25 = vmul.f32 %v8007_v20, %v1661_v6 }
 0x201   :  { %v1754_v24 = vmul.f32 %v8010_v8, %v1662_v23 }
 0x202   :  { %1768 = vst [vmem:[#allocation2 + $0x38] sm:$0xff] %v1753_v25  ;;  %2221 = vst [vmem:[#allocation4 + $0x210] sm:$0xff] %v1753_v25  ;;  %2476 = vrot.lane.b32.xlu0 %v1751_v16, %s7149_s18  ;;  %2027 = vrot.lane.b32.xlu1 %v1751_v16, %s7145_s10 }
 0x203   :  { %1769 = vst [vmem:[#allocation2 + $0x40] sm:$0xff] %v1754_v24  ;;  %2222 = vst [vmem:[#allocation4 + $0x218] sm:$0xff] %v1754_v24 }
 0x206   :  { %2580 = vrot.lane.b32.xlu0 %v1751_v16, %s7151_s19  ;;  %2133 = vrot.lane.b32.xlu1 %v1751_v16, %s7146_s11 }
 0x20a   :  { %2272 = vrot.lane.b32.xlu0 %v1753_v25, %s7147_s14  ;;  %1823 = vrot.lane.b32.xlu1 %v1753_v25, %s7144_s6 }
 0x20e   :  { %2376 = vrot.lane.b32.xlu0 %v1753_v25, %s7148_s17  ;;  %1927 = vrot.lane.b32.xlu1 %v1753_v25, %s7143_s5 }
 0x212   :  { %2480 = vrot.lane.b32.xlu0 %v1753_v25, %s7149_s18  ;;  %2031 = vrot.lane.b32.xlu1 %v1753_v25, %s7145_s10 }
 0x214   :  { %v8043_v30 = vpop.permute.xlu1 %1811 }
 0x216   :  { %2584 = vrot.lane.b32.xlu0 %v1753_v25, %s7151_s19  ;;  %2137 = vrot.lane.b32.xlu1 %v1753_v25, %s7146_s11 }
 0x218   :  { %v1916_v39 = vpop.permute.xlu1 %1915 }
 0x219   :  { %v1943_v19 = vsel %vm224_vm0, %v1914_v40, %v1916_v39 }
 0x21a   :  { %1821 = vrot.lane.b32.xlu0 %v7972_v17, %s7144_s6  ;;  %2270 = vrot.lane.b32.xlu1 %v7972_v17, %s7147_s14 }
 0x21c   :  { %v8073_v41 = vpop.permute.xlu1 %2019 }
 0x21d   :  { %v1438_v34 = vpop.f32.mrb[4].mxu0  ;;  %v2047_v40 = vsel %vm329_vm2, %v8032_v27, %v8073_v41 }
 0x21e   :  { %1925 = vrot.lane.b32.xlu0 %v7972_v17, %s7143_s5  ;;  %2374 = vrot.lane.b32.xlu1 %v7972_v17, %s7148_s17  ;;  %v1663_v36 = vmax.f32 %v1438_v34, 0.0  ;;  %v1440_v37 = vpop.f32.mrb[5].mxu0 }
 0x21f   :  { %v1664_v3 = vmax.f32 %v1440_v37, 0.0 }
 0x220   :  { %v1755_v4 = vmul.f32 %v8048_v31, %v1663_v36  ;;  %v8081_v43 = vpop.permute.xlu1 %2125 }
 0x221   :  { %v8061_v38 = vmul.f32 %v8053_v63, %v1664_v3 }
 0x222   :  { %2029 = vrot.lane.b32.xlu0 %v7972_v17, %s7145_s10  ;;  %2478 = vrot.lane.b32.xlu1 %v7972_v17, %s7149_s18  ;;  %1770 = vst [vmem:[#allocation2 + $0x48] sm:$0xff] %v1755_v4  ;;  %2223 = vst [vmem:[#allocation4 + $0x220] sm:$0xff] %v1755_v4 }
 0x223   :  { %1771 = vst [vmem:[#allocation2 + $0x50] sm:$0xff] %v8061_v38  ;;  %2224 = vst [vmem:[#allocation4 + $0x228] sm:$0xff] %v8061_v38 }
 0x226   :  { %2135 = vrot.lane.b32.xlu0 %v7972_v17, %s7146_s11  ;;  %2582 = vrot.lane.b32.xlu1 %v7972_v17, %s7151_s19  ;;  %v1839_v17 = vsel %vm119_vm1, %v8026_v7, %v8043_v30 }
 0x227   :  { %v6560_v37 = vpack.c.bf16 %v1943_v19, %v1839_v17 }
 0x22a   :  { %1825 = vrot.lane.b32.xlu0 %v1754_v24, %s7144_s6  ;;  %2274 = vrot.lane.b32.xlu1 %v1754_v24, %s7147_s14 }
 0x22e   :  { %1929 = vrot.lane.b32.xlu0 %v1754_v24, %s7143_s5  ;;  %2378 = vrot.lane.b32.xlu1 %v1754_v24, %s7148_s17 }
 0x232   :  { %2033 = vrot.lane.b32.xlu0 %v1754_v24, %s7145_s10  ;;  %2482 = vrot.lane.b32.xlu1 %v1754_v24, %s7149_s18 }
 0x234   :  { %v8085_v44 = vpop.permute.xlu0 %2264  ;;  %v8087_v45 = vpop.permute.xlu1 %1815 }
 0x236   :  { %2139 = vrot.lane.b32.xlu0 %v1754_v24, %s7146_s11  ;;  %2586 = vrot.lane.b32.xlu1 %v1754_v24, %s7151_s19 }
 0x238   :  { %v8091_v47 = vpop.permute.xlu0 %2023  ;;  %v8093_v48 = vpop.permute.xlu1 %1919 }
 0x23a   :  { %2276 = vrot.lane.b32.xlu0 %v1755_v4, %s7147_s14  ;;  %1827 = vrot.lane.b32.xlu1 %v1755_v4, %s7144_s6 }
 0x23c   :  { %v8102_v51 = vpop.permute.xlu0 %2129  ;;  %v8104_v52 = vpop.permute.xlu1 %2260 }
 0x23d   :  { %v1509_v26 = vpop.f32.mrb[4].mxu1 }
 0x23e   :  { %v1665_v58 = vmax.f32 %v1509_v26, 0.0  ;;  %v1511_v60 = vpop.f32.mrb[5].mxu1  ;;  %2380 = vrot.lane.b32.xlu0 %v1755_v4, %s7148_s17  ;;  %1931 = vrot.lane.b32.xlu1 %v1755_v4, %s7143_s5  ;;  %v2155_v26 = vsel %vm438_vm3, %v8079_v42, %v8081_v43 }
 0x23f   :  { %v1666_v61 = vmax.f32 %v1511_v60, 0.0  ;;  %v6564_v42 = vpack.c.bf16 %v2155_v26, %v2047_v40 }
 0x240   :  { %v8114_v56 = vmul.f32 %v8100_v49, %v1665_v58  ;;  %v8116_v62 = vpop.permute.xlu0 %2364  ;;  %v8118_v11 = vpop.permute.xlu1 %2368 }
 0x241   :  { %v8121_v12 = vmul.f32 %v8109_v53, %v1666_v61 }
 0x242   :  { %1772 = vst [vmem:[#allocation2 + $0x58] sm:$0xff] %v8114_v56  ;;  %2225 = vst [vmem:[#allocation4 + $0x230] sm:$0xff] %v8114_v56  ;;  %2484 = vrot.lane.b32.xlu0 %v1755_v4, %s7149_s18  ;;  %2035 = vrot.lane.b32.xlu1 %v1755_v4, %s7145_s10 }
 0x243   :  { %1773 = vst [vmem:[#allocation2 + $0x60] sm:$0xff] %v8121_v12  ;;  %2226 = vst [vmem:[#allocation4 + $0x238] sm:$0xff] %v8121_v12 }
 0x244   :  { %v8129_v33 = vpop.permute.xlu0 %2572  ;;  %v8131_v14 = vpop.permute.xlu1 %2472 }
 0x246   :  { %2588 = vrot.lane.b32.xlu0 %v1755_v4, %s7151_s19  ;;  %2141 = vrot.lane.b32.xlu1 %v1755_v4, %s7146_s11 }
 0x248   :  { %v1814_v15 = vpop.permute.xlu0 %1813  ;;  %v8135_v16 = vpop.permute.xlu1 %2468 }
 0x249   :  { %v1840_v23 = vsel %vm119_vm1, %v8043_v30, %v1814_v15 }
 0x24a   :  { %2280 = vrot.lane.b32.xlu0 %v8114_v56, %s7147_s14  ;;  %1831 = vrot.lane.b32.xlu1 %v8114_v56, %s7144_s6 }
 0x24c   :  { %v1918_v21 = vpop.permute.xlu0 %1917  ;;  %v8145_v6 = vpop.permute.xlu1 %2576 }
 0x24d   :  { %v1944_v25 = vsel %vm224_vm0, %v1916_v39, %v1918_v21  ;;  %v1580_v24 = vpop.f32.mrb[6].mxu0 }
 0x24e   :  { %2384 = vrot.lane.b32.xlu0 %v8114_v56, %s7148_s17  ;;  %1935 = vrot.lane.b32.xlu1 %v8114_v56, %s7143_s5  ;;  %v6558_v7 = vpack.c.bf16 %v1944_v25, %v1840_v23  ;;  %v1667_v34 = vmax.f32 %v1580_v24, 0.0  ;;  %v1582_v36 = vpop.f32.mrb[7].mxu0 }
 0x24f   :  { %v1668_v3 = vmax.f32 %v1582_v36, 0.0 }
 0x250   :  { %v2022_v30 = vpop.permute.xlu0 %2021  ;;  %v2263_v4 = vpop.permute.xlu1 %2262  ;;  %6559 = vmatprep.subr.bf16.mxu0 %v6558_v7  ;;  %v8165_v39 = vmul.f32 %v8150_v22, %v1667_v34 }
 0x251   :  { %6561 = vmatpush1.bf16.msra.mxu0 %v6560_v37  ;;  %v8174_v9 = vmul.f32 %v8162_v2, %v1668_v3  ;;  %v2048_v61 = vsel %vm329_vm2, %v8073_v41, %v2022_v30  ;;  %v2291_v19 = vsel %vm574_vm4, %v2263_v4, %v8085_v44  ;;  %v2290_v23 = vsel %vm574_vm4, %v8104_v52, %v2263_v4 }
 0x252   :  { %1829 = vrot.lane.b32.xlu0 %v8061_v38, %s7144_s6  ;;  %2278 = vrot.lane.b32.xlu1 %v8061_v38, %s7147_s14  ;;  %1774 = vst [vmem:[#allocation2 + $0x68] sm:$0xff] %v8165_v39  ;;  %2227 = vst [vmem:[#allocation4 + $0x240] sm:$0xff] %v8165_v39  ;;  %v6568_v24 = vpack.c.bf16 %v2290_v23, %v7891_v54  ;;  %v1945_v52 = vsel %vm224_vm0, %v1918_v21, %v8093_v48 }
 0x253   :  { %1775 = vst [vmem:[#allocation2 + $0x70] sm:$0xff] %v8174_v9  ;;  %v1841_v37 = vsel %vm119_vm1, %v1814_v15, %v8087_v45  ;;  %v2049_v26 = vsel %vm329_vm2, %v2022_v30, %v8091_v47 }
 0x254   :  { %v2128_v58 = vpop.permute.xlu0 %2127  ;;  %v8182_v60 = vpop.permute.xlu1 %2025  ;;  %v6580_v3 = vpack.c.bf16 %v1945_v52, %v1841_v37 }
 0x255   :  { %v2156_v17 = vsel %vm438_vm3, %v8081_v43, %v2128_v58  ;;  %v6566_v43 = vpack.c.bf16 %v2291_v19, %v7894_v55  ;;  %v2157_v4 = vsel %vm438_vm3, %v2128_v58, %v8102_v51 }
 0x256   :  { %1933 = vrot.lane.b32.xlu0 %v8061_v38, %s7143_s5  ;;  %2382 = vrot.lane.b32.xlu1 %v8061_v38, %s7148_s17  ;;  %v6562_v27 = vpack.c.bf16 %v2156_v17, %v2048_v61  ;;  %v8242_v17 = vrot.slane %v8037_v29, %v1698_v18 }
 0x258   :  { %v8197_v25 = vpop.permute.xlu0 %1817  ;;  %v8199_v41 = vpop.permute.xlu1 %2131  ;;  %6563 = vmatprep.subr.bf16.mxu0 %v6562_v27 }
 0x259   :  { %6565 = vmatpush1.bf16.msra.mxu0 %v6564_v42  ;;  %v1842_v55 = vsel %vm119_vm1, %v8087_v45, %v8197_v25  ;;  %v2158_v54 = vsel %vm438_vm3, %v8102_v51, %v8199_v41  ;;  %v6584_v51 = vpack.c.bf16 %v2157_v4, %v2049_v26 }
 0x25a   :  { %2037 = vrot.lane.b32.xlu0 %v8061_v38, %s7145_s10  ;;  %2486 = vrot.lane.b32.xlu1 %v8061_v38, %s7149_s18 }
 0x25b   :  { %6567 = vmatprep.subr.bf16.mxu0 %v6566_v43 }
 0x25c   :  { %v8209_v7 = vpop.permute.xlu0 %1921  ;;  %v8211_v34 = vpop.permute.xlu1 %2370 }
 0x25d   :  { %v1946_v36 = vsel %vm224_vm0, %v8093_v48, %v8209_v7  ;;  %6569 = vmatpush1.bf16.msra.mxu0 %v6568_v24  ;;  %v2050_v48 = vsel %vm329_vm2, %v8091_v47, %v8182_v60 }
 0x25e   :  { %2143 = vrot.lane.b32.xlu0 %v8061_v38, %s7146_s11  ;;  %2039 = vrot.lane.b32.xlu1 %v8114_v56, %s7145_s10  ;;  %v6578_v21 = vpack.c.bf16 %v1946_v36, %v1842_v55  ;;  %v6582_v40 = vpack.c.bf16 %v2158_v54, %v2050_v48 }
 0x260   :  { %v2367_v45 = vpop.permute.xlu0 %2366  ;;  %v2475_v15 = vpop.permute.xlu1 %2474  ;;  %6579 = vmatprep.subr.bf16.mxu1 %v6578_v21  ;;  %v8279_v21 = vld [vmem:[%s9337_s2 + $0x8] sm:$0xff] }
 0x261   :  { %6581 = vmatpush1.bf16.msra.mxu1 %v6580_v3  ;;  %v2394_v19 = vsel %vm679_vm5, %v8116_v62, %v2367_v45  ;;  %v2395_v47 = vsel %vm679_vm5, %v2367_v45, %v8118_v11 }
 0x262   :  { %1833 = vrot.lane.b32.xlu0 %v8121_v12, %s7144_s6  ;;  %2145 = vrot.lane.b32.xlu1 %v8114_v56, %s7146_s11 }
 0x263   :  { %6583 = vmatprep.subr.bf16.mxu1 %v6582_v40 }
 0x264   :  { %v2471_v58 = vpop.permute.xlu0 %2470  ;;  %v2579_v61 = vpop.permute.xlu1 %2578 }
 0x265   :  { %v2498_v30 = vsel %vm784_vm6, %v8135_v16, %v2471_v58  ;;  %v2499_v27 = vsel %vm784_vm6, %v2471_v58, %v8131_v14  ;;  %6585 = vmatpush1.bf16.msra.mxu1 %v6584_v51  ;;  %v1651_v42 = vpop.f32.mrb[6].mxu1  ;;  %v2396_v58 = vsel %vm679_vm5, %v8118_v11, %v8211_v34 }
 0x266   :  { %1937 = vrot.lane.b32.xlu0 %v8121_v12, %s7143_s5  ;;  %2590 = vrot.lane.b32.xlu1 %v8061_v38, %s7151_s19  ;;  %v6570_v46 = vpack.c.bf16 %v2499_v27, %v2395_v47  ;;  %v6572_v18 = vpack.c.bf16 %v2498_v30, %v2394_v19  ;;  %v1669_v29 = vmax.f32 %v1651_v42, 0.0  ;;  %v6336_v62 = vpop.f32.mrb[7].mxu1  ;;  %v2604_v47 = vsel %vm889_vm7, %v8145_v6, %v2579_v61 }
 0x267   :  { %v6596_v11 = vpack.c.bf16 %v7853_v28, %v2604_v47 }
 0x268   :  { %v2575_v23 = vpop.permute.xlu0 %2574  ;;  %v8256_v43 = vpop.permute.xlu1 %2268  ;;  %6571 = vmatprep.subr.bf16.mxu0 %v6570_v46  ;;  %v1761_v16 = vmul.f32 %v8242_v17, %v1669_v29 }
 0x269   :  { %v2602_v24 = vsel %vm889_vm7, %v8129_v33, %v2575_v23  ;;  %v2603_v52 = vsel %vm889_vm7, %v2575_v23, %v8145_v6  ;;  %6573 = vmatpush1.bf16.msra.mxu0 %v6572_v18 }
 0x26a   :  { %2488 = vrot.lane.b32.xlu0 %v8114_v56, %s7149_s18  ;;  %2282 = vrot.lane.b32.xlu1 %v8121_v12, %s7147_s14  ;;  %v6574_v38 = vpack.c.bf16 %v7853_v28, %v2603_v52  ;;  %v6576_v55 = vpack.c.bf16 %v7853_v28, %v2602_v24  ;;  %1776 = vst.msk [vmem:[#allocation2 + $0x78] sm:$0xff] %vm52_vm9, %v1761_v16 }
 0x26c   :  { %v2267_v36 = vpop.permute.xlu0 %2266  ;;  %v8270_v37 = vpop.permute.xlu1 %1819  ;;  %6575 = vmatprep.subr.bf16.mxu0 %v6574_v38 }
 0x26d   :  { %v2292_v33 = vsel %vm574_vm4, %v8085_v44, %v2267_v36  ;;  %v2293_v54 = vsel %vm574_vm4, %v2267_v36, %v8256_v43  ;;  %6577 = vmatpush1.bf16.msra.mxu0 %v6576_v55  ;;  %v1843_v55 = vsel %vm119_vm1, %v8197_v25, %v8270_v37 }
 0x26e   :  { %2041 = vrot.lane.b32.xlu0 %v8121_v12, %s7145_s10  ;;  %2386 = vrot.lane.b32.xlu1 %v8121_v12, %s7148_s17  ;;  %v6586_v3 = vpack.c.bf16 %v2293_v54, %v7922_v1  ;;  %v6588_v4 = vpack.c.bf16 %v2292_v33, %v7919_v0  ;;  %v2500_v0 = vsel %vm784_vm6, %v8131_v14, %v2475_v15 }
 0x26f   :  { %v6592_v19 = vpack.c.bf16 %v2500_v0, %v2396_v58  ;;  %v2711_v58 = vld [vmem:[#allocation4 + $0x208] sm:$0xff] }
 0x270   :  { %v8287_v44 = vpop.permute.xlu0 %2372  ;;  %v1924_v48 = vpop.permute.xlu1 %1923  ;;  %6134 = vmatmul.mubr.msk.f32.vlgmr.msra.gmra.mrb[8].mxu0 %vm1084_vm8, %v8279_v21  ;;  %6587 = vmatprep.subr.bf16.mxu1 %v6586_v3 }
 0x271   :  { %6589 = vmatpush1.bf16.msra.mxu1 %v6588_v4  ;;  %v8291_v45 = vld [vmem:[#allocation2 + $0x78] sm:$0xff]  ;;  %3005 = vmatprep.mubr.f32.mxu0 %v7862_v35  ;;  %v2397_v26 = vsel %vm679_vm5, %v8211_v34, %v8287_v44 }
 0x272   :  { %2147 = vrot.lane.b32.xlu0 %v8121_v12, %s7146_s11  ;;  %2490 = vrot.lane.b32.xlu1 %v8121_v12, %s7149_s18  ;;  %2229 = vst.msk [vmem:[#allocation4 + $0x250] sm:$0xff] %vm52_vm9, %v8291_v45 }
 0x274   :  { %v8302_v1 = vpop.permute.xlu0 %2476  ;;  %v8304_v40 = vpop.permute.xlu1 %2027 }
 0x275   :  { %v2501_v51 = vsel %vm784_vm6, %v2475_v15, %v8302_v1 }
 0x276   :  { %2592 = vrot.lane.b32.xlu0 %v8114_v56, %s7151_s19  ;;  %2594 = vrot.lane.b32.xlu1 %v8121_v12, %s7151_s19  ;;  %v6590_v14 = vpack.c.bf16 %v2501_v51, %v2397_v26  ;;  %v2051_v26 = vsel %vm329_vm2, %v8182_v60, %v8304_v40 }
 0x278   :  { %v8320_v30 = vpop.permute.xlu0 %2580  ;;  %v2134_v27 = vpop.permute.xlu1 %2133  ;;  %6591 = vmatprep.subr.bf16.mxu1 %v6590_v14 }
 0x279   :  { %v2605_v15 = vsel %vm889_vm7, %v2579_v61, %v8320_v30  ;;  %6593 = vmatpush1.bf16.msra.mxu1 %v6592_v19  ;;  %v2159_v25 = vsel %vm438_vm3, %v8199_v41, %v2134_v27 }
 0x27a   :  { %2284 = vrot.lane.b32.xlu0 %v8165_v39, %s7147_s14  ;;  %1835 = vrot.lane.b32.xlu1 %v8165_v39, %s7144_s6  ;;  %v6594_v56 = vpack.c.bf16 %v7853_v28, %v2605_v15  ;;  %v6604_v51 = vpack.c.bf16 %v2159_v25, %v2051_v26 }
 0x27c   :  { %v8330_v12 = vpop.permute.xlu0 %2272  ;;  %v8332_v6 = vpop.permute.xlu1 %1823  ;;  %6595 = vmatprep.subr.bf16.mxu1 %v6594_v56 }
 0x27d   :  { %6597 = vmatpush1.bf16.msra.mxu1 %v6596_v11 }
 0x27e   :  { %2388 = vrot.lane.b32.xlu0 %v8165_v39, %s7148_s17  ;;  %1939 = vrot.lane.b32.xlu1 %v8165_v39, %s7143_s5 }
 0x280   :  { %v8338_v34 = vpop.permute.xlu0 %2376  ;;  %v8340_v61 = vpop.permute.xlu1 %1927  ;;  %6135 = vmatmul.mubr.msk.f32.vlgmr.msra.gmra.mrb[8].mxu1 %vm1084_vm8, %v8279_v21 }
 0x281   :  { %3076 = vmatprep.mubr.f32.mxu1 %v7862_v35 }
 0x282   :  { %2492 = vrot.lane.b32.xlu0 %v8165_v39, %s7149_s18  ;;  %2043 = vrot.lane.b32.xlu1 %v8165_v39, %s7145_s10 }
 0x284   :  { %v8349_v42 = vpop.permute.xlu0 %2480  ;;  %v8351_v46 = vpop.permute.xlu1 %2031 }
 0x286   :  { %2596 = vrot.lane.b32.xlu0 %v8165_v39, %s7151_s19  ;;  %2149 = vrot.lane.b32.xlu1 %v8165_v39, %s7146_s11  ;;  %v1947_v39 = vsel %vm224_vm0, %v8209_v7, %v1924_v48 }
 0x287   :  { %v6600_v33 = vpack.c.bf16 %v1947_v39, %v1843_v55 }
 0x288   :  { %v8357_v18 = vpop.permute.xlu0 %2584  ;;  %v8359_v29 = vpop.permute.xlu1 %2137 }
 0x28a   :  { %1837 = vrot.lane.b32.xlu0 %v8174_v9, %s7144_s6  ;;  %2286 = vrot.lane.b32.xlu1 %v8174_v9, %s7147_s14 }
 0x28c   :  { %v1822_v62 = vpop.permute.xlu0 %1821  ;;  %v2271_v23 = vpop.permute.xlu1 %2270 }
 0x28d   :  { %v1844_v52 = vsel %vm119_vm1, %v8270_v37, %v1822_v62  ;;  %v2295_v4 = vsel %vm574_vm4, %v2271_v23, %v8330_v12  ;;  %v2294_v14 = vsel %vm574_vm4, %v8256_v43, %v2271_v23 }
 0x28e   :  { %1941 = vrot.lane.b32.xlu0 %v8174_v9, %s7143_s5  ;;  %2390 = vrot.lane.b32.xlu1 %v8174_v9, %s7148_s17 }
 0x290   :  { %v1926_v16 = vpop.permute.xlu0 %1925  ;;  %v2375_v24 = vpop.permute.xlu1 %2374 }
 0x291   :  { %v1948_v38 = vsel %vm224_vm0, %v1924_v48, %v1926_v16  ;;  %v2399_v15 = vsel %vm679_vm5, %v2375_v24, %v8338_v34  ;;  %v1949_v43 = vsel %vm224_vm0, %v1926_v16, %v8340_v61  ;;  %v1845_v16 = vsel %vm119_vm1, %v1822_v62, %v8332_v6 }
 0x292   :  { %2045 = vrot.lane.b32.xlu0 %v8174_v9, %s7145_s10  ;;  %2494 = vrot.lane.b32.xlu1 %v8174_v9, %s7149_s18  ;;  %v6598_v36 = vpack.c.bf16 %v1948_v38, %v1844_v52  ;;  %v6620_v25 = vpack.c.bf16 %v1949_v43, %v1845_v16 }
 0x294   :  { %v8381_v7 = vpop.permute.xlu0 %2029  ;;  %v2479_v54 = vpop.permute.xlu1 %2478  ;;  %6599 = vmatprep.subr.bf16.mxu0 %v6598_v36 }
 0x295   :  { %6601 = vmatpush1.bf16.msra.mxu0 %v6600_v33  ;;  %v2052_v48 = vsel %vm329_vm2, %v8304_v40, %v8381_v7  ;;  %v2503_v60 = vsel %vm784_vm6, %v2479_v54, %v8349_v42  ;;  %v2710_v40 = vld [vmem:[#allocation4 + $0x200] sm:$0xff]  ;;  %v2502_v11 = vsel %vm784_vm6, %v8302_v1, %v2479_v54  ;;  %v2398_v1 = vsel %vm679_vm5, %v8287_v44, %v2375_v24 }
 0x296   :  { %2151 = vrot.lane.b32.xlu0 %v8174_v9, %s7146_s11  ;;  %2598 = vrot.lane.b32.xlu1 %v8174_v9, %s7151_s19  ;;  %v6608_v56 = vpack.c.bf16 %v2294_v14, %v2710_v40  ;;  %v6610_v52 = vpack.c.bf16 %v2503_v60, %v2399_v15  ;;  %v6612_v54 = vpack.c.bf16 %v2502_v11, %v2398_v1  ;;  %v2712_v14 = vld [vmem:[#allocation4 + $0x210] sm:$0xff] }
 0x298   :  { %v2136_v37 = vpop.permute.xlu0 %2135  ;;  %v2583_v3 = vpop.permute.xlu1 %2582 }
 0x299   :  { %v2160_v0 = vsel %vm438_vm3, %v2134_v27, %v2136_v37  ;;  %v6606_v27 = vpack.c.bf16 %v2295_v4, %v2711_v58  ;;  %v2607_v38 = vsel %vm889_vm7, %v2583_v3, %v8357_v18  ;;  %v2161_v62 = vsel %vm438_vm3, %v2136_v37, %v8359_v29 }
 0x29a   :  { %2288 = vrot.lane.b32.xlu0 %v8291_v45, %s7147_s14  ;;  %2153 = vrot.lane.b32.xlu1 %v8291_v45, %s7146_s11  ;;  %v6602_v41 = vpack.c.bf16 %v2160_v0, %v2052_v48 }
 0x29c   :  { %v8404_v19 = vpop.permute.xlu0 %1825  ;;  %v2275_v47 = vpop.permute.xlu1 %2274  ;;  %6603 = vmatprep.subr.bf16.mxu0 %v6602_v41 }
 0x29d   :  { %6605 = vmatpush1.bf16.msra.mxu0 %v6604_v51  ;;  %v1846_v55 = vsel %vm119_vm1, %v8332_v6, %v8404_v19  ;;  %v6614_v6 = vpack.c.bf16 %v7853_v28, %v2607_v38  ;;  %v2296_v41 = vsel %vm574_vm4, %v8330_v12, %v2275_v47 }
 0x29e   :  { %2392 = vrot.lane.b32.xlu0 %v8291_v45, %s7148_s17  ;;  %6607 = vmatprep.subr.bf16.mxu0 %v6606_v27  ;;  %v6628_v12 = vpack.c.bf16 %v2296_v41, %v2712_v14  ;;  %v2715_v14 = vld [vmem:[#allocation4 + $0x228] sm:$0xff] }
 0x29f   :  { %3547 = vrot.lane.b32.xlu1 %v7862_v35, %s7143_s5 }
 0x2a0   :  { %v8418_v23 = vpop.permute.xlu0 %1929  ;;  %v2379_v39 = vpop.permute.xlu1 %2378 }
 0x2a1   :  { %v1950_v36 = vsel %vm224_vm0, %v8340_v61, %v8418_v23  ;;  %6609 = vmatpush1.bf16.msra.mxu0 %v6608_v56  ;;  %v2606_v61 = vsel %vm889_vm7, %v8320_v30, %v2583_v3  ;;  %v2400_v11 = vsel %vm679_vm5, %v8338_v34, %v2379_v39 }
 0x2a2   :  { %2496 = vrot.lane.b32.xlu0 %v8291_v45, %s7149_s18  ;;  %6611 = vmatprep.subr.bf16.mxu0 %v6610_v52  ;;  %v6618_v33 = vpack.c.bf16 %v1950_v36, %v1846_v55  ;;  %v6616_v44 = vpack.c.bf16 %v7853_v28, %v2606_v61 }
 0x2a3   :  { %3757 = vrot.lane.b32.xlu1 %v7862_v35, %s7146_s11 }
 0x2a4   :  { %v8438_v4 = vpop.permute.xlu0 %2033  ;;  %v2483_v48 = vpop.permute.xlu1 %2482  ;;  %6619 = vmatprep.subr.bf16.mxu1 %v6618_v33 }
 0x2a5   :  { %6613 = vmatpush1.bf16.msra.mxu0 %v6612_v54  ;;  %6621 = vmatpush1.bf16.msra.mxu1 %v6620_v25  ;;  %v2054_v3 = vsel %vm329_vm2, %v8351_v46, %v8438_v4  ;;  %v2504_v40 = vsel %vm784_vm6, %v8349_v42, %v2483_v48 }
 0x2a6   :  { %2600 = vrot.lane.b32.xlu0 %v8291_v45, %s7151_s19  ;;  %6615 = vmatprep.subr.bf16.mxu0 %v6614_v6  ;;  %v2053_v45 = vsel %vm329_vm2, %v8381_v7, %v8351_v46  ;;  %v2713_v46 = vld [vmem:[#allocation4 + $0x218] sm:$0xff]  ;;  %v6632_v38 = vpack.c.bf16 %v2504_v40, %v2400_v11 }
 0x2a7   :  { %v6624_v37 = vpack.c.bf16 %v2161_v62, %v2053_v45 }
 0x2a8   :  { %v8446_v24 = vpop.permute.xlu0 %2139  ;;  %v2587_v30 = vpop.permute.xlu1 %2586 }
 0x2a9   :  { %v2162_v0 = vsel %vm438_vm3, %v8359_v29, %v8446_v24  ;;  %6617 = vmatpush1.bf16.msra.mxu0 %v6616_v44  ;;  %v2608_v55 = vsel %vm889_vm7, %v8357_v18, %v2587_v30 }
 0x2aa   :  { %v6622_v26 = vpack.c.bf16 %v2162_v0, %v2054_v3  ;;  %3443 = vrot.lane.b32.xlu0 %v7862_v35, %s7144_s6  ;;  %v6636_v33 = vpack.c.bf16 %v7853_v28, %v2608_v55 }
 0x2ac   :  { %v8461_v51 = vpop.permute.xlu0 %2276  ;;  %v1828_v58 = vpop.permute.xlu1 %1827  ;;  %6136 = vmatmul.mubr.msk.f32.vlgmr.msra.gmra.mrb[10].mxu0 %vm1084_vm8, %v8279_v21  ;;  %6623 = vmatprep.subr.bf16.mxu1 %v6622_v26 }
 0x2ad   :  { %v2297_v29 = vsel %vm574_vm4, %v2275_v47, %v8461_v51  ;;  %6625 = vmatpush1.bf16.msra.mxu1 %v6624_v37  ;;  %3147 = vmatprep.mubr.f32.mxu0 %v7862_v35 }
 0x2ae   :  { %v6626_v7 = vpack.c.bf16 %v2297_v29, %v2713_v46  ;;  %3651 = vrot.lane.b32.xlu0 %v7862_v35, %s7145_s10 }
 0x2b0   :  { %v8470_v27 = vpop.permute.xlu0 %2380  ;;  %v1932_v60 = vpop.permute.xlu1 %1931  ;;  %6627 = vmatprep.subr.bf16.mxu1 %v6626_v7 }
 0x2b1   :  { %6629 = vmatpush1.bf16.msra.mxu1 %v6628_v12  ;;  %v2401_v56 = vsel %vm679_vm5, %v2379_v39, %v8470_v27 }
 0x2b4   :  { %v8474_v15 = vpop.permute.xlu0 %2484  ;;  %v2036_v47 = vpop.permute.xlu1 %2035 }
 0x2b5   :  { %v2505_v43 = vsel %vm784_vm6, %v2483_v48, %v8474_v15  ;;  %v1951_v48 = vsel %vm224_vm0, %v8418_v23, %v1932_v60 }
 0x2b6   :  { %v6630_v52 = vpack.c.bf16 %v2505_v43, %v2401_v56  ;;  %v2714_v56 = vld [vmem:[#allocation4 + $0x220] sm:$0xff] }
 0x2b8   :  { %v8484_v36 = vpop.permute.xlu0 %2588  ;;  %v2142_v42 = vpop.permute.xlu1 %2141  ;;  %6631 = vmatprep.subr.bf16.mxu1 %v6630_v52 }
 0x2b9   :  { %v2609_v16 = vsel %vm889_vm7, %v2587_v30, %v8484_v36  ;;  %6633 = vmatpush1.bf16.msra.mxu1 %v6632_v38  ;;  %v1847_v30 = vsel %vm119_vm1, %v8404_v19, %v1828_v58  ;;  %v2055_v19 = vsel %vm329_vm2, %v8438_v4, %v2036_v47 }
 0x2ba   :  { %v6634_v1 = vpack.c.bf16 %v7853_v28, %v2609_v16  ;;  %v6640_v0 = vpack.c.bf16 %v1951_v48, %v1847_v30 }
 0x2bc   :  { %v8490_v54 = vpop.permute.xlu0 %2280  ;;  %v1832_v34 = vpop.permute.xlu1 %1831  ;;  %6635 = vmatprep.subr.bf16.mxu1 %v6634_v1 }
 0x2bd   :  { %6637 = vmatpush1.bf16.msra.mxu1 %v6636_v33 }
 0x2c0   :  { %v8492_v39 = vpop.permute.xlu0 %2384  ;;  %v1936_v18 = vpop.permute.xlu1 %1935  ;;  %6137 = vmatmul.mubr.msk.f32.vlgmr.msra.gmra.mrb[10].mxu1 %vm1084_vm8, %v8279_v21 }
 0x2c1   :  { %3218 = vmatprep.mubr.f32.mxu1 %v7862_v35  ;;  %v2163_v35 = vsel %vm438_vm3, %v8446_v24, %v2142_v42 }
 0x2c2   :  { %v6644_v7 = vpack.c.bf16 %v2163_v35, %v2055_v19 }
 0x2c4   :  { %v1830_v25 = vpop.permute.xlu0 %1829  ;;  %v2279_v61 = vpop.permute.xlu1 %2278 }
 0x2c5   :  { %v1848_v44 = vsel %vm119_vm1, %v1828_v58, %v1830_v25  ;;  %v2299_v41 = vsel %vm574_vm4, %v2279_v61, %v8490_v54  ;;  %v2298_v12 = vsel %vm574_vm4, %v8461_v51, %v2279_v61  ;;  %v1849_v38 = vsel %vm119_vm1, %v1830_v25, %v1832_v34 }
 0x2c6   :  { %v6646_v40 = vpack.c.bf16 %v2299_v41, %v2715_v14  ;;  %v6648_v43 = vpack.c.bf16 %v2298_v12, %v2714_v56  ;;  %v2717_v14 = vld [vmem:[#allocation4 + $0x238] sm:$0xff] }
 0x2c8   :  { %v1934_v6 = vpop.permute.xlu0 %1933  ;;  %v2383_v28 = vpop.permute.xlu1 %2382 }
 0x2c9   :  { %v1952_v62 = vsel %vm224_vm0, %v1932_v60, %v1934_v6  ;;  %v1953_v11 = vsel %vm224_vm0, %v1934_v6, %v1936_v18  ;;  %v2403_v61 = vsel %vm679_vm5, %v2383_v28, %v8492_v39 }
 0x2ca   :  { %v6638_v3 = vpack.c.bf16 %v1952_v62, %v1848_v44 }
 0x2cc   :  { %v2038_v45 = vpop.permute.xlu0 %2037  ;;  %v2487_v26 = vpop.permute.xlu1 %2486  ;;  %6639 = vmatprep.subr.bf16.mxu0 %v6638_v3 }
 0x2cd   :  { %6641 = vmatpush1.bf16.msra.mxu0 %v6640_v0  ;;  %v2056_v29 = vsel %vm329_vm2, %v2036_v47, %v2038_v45  ;;  %v2506_v16 = vsel %vm784_vm6, %v8474_v15, %v2487_v26 }
 0x2d0   :  { %v2144_v37 = vpop.permute.xlu0 %2143  ;;  %v2040_v23 = vpop.permute.xlu1 %2039 }
 0x2d1   :  { %v2164_v46 = vsel %vm438_vm3, %v2142_v42, %v2144_v37  ;;  %v6660_v42 = vpack.c.bf16 %v1953_v11, %v1849_v38 }
 0x2d2   :  { %v6642_v58 = vpack.c.bf16 %v2164_v46, %v2056_v29  ;;  %v8543_v46 = vld [vmem:[#allocation4 + $0x440] sm:$0xff] }
 0x2d4   :  { %v8513_v60 = vpop.permute.xlu0 %1833  ;;  %v2146_v24 = vpop.permute.xlu1 %2145  ;;  %6643 = vmatprep.subr.bf16.mxu0 %v6642_v58 }
 0x2d5   :  { %6645 = vmatpush1.bf16.msra.mxu0 %v6644_v7  ;;  %v1850_v47 = vsel %vm119_vm1, %v1832_v34, %v8513_v60  ;;  %v2165_v15 = vsel %vm438_vm3, %v2144_v37, %v2146_v24 }
 0x2d6   :  { %6647 = vmatprep.subr.bf16.mxu0 %v6646_v40 }
 0x2d8   :  { %v8516_v52 = vpop.permute.xlu0 %1937  ;;  %v2591_v4 = vpop.permute.xlu1 %2590 }
 0x2d9   :  { %v1954_v51 = vsel %vm224_vm0, %v1936_v18, %v8516_v52  ;;  %6649 = vmatpush1.bf16.msra.mxu0 %v6648_v43  ;;  %v2402_v18 = vsel %vm679_vm5, %v8470_v27, %v2383_v28  ;;  %v2057_v27 = vsel %vm329_vm2, %v2038_v45, %v2040_v23  ;;  %v2610_v35 = vsel %vm889_vm7, %v8484_v36, %v2591_v4 }
 0x2da   :  { %v6658_v55 = vpack.c.bf16 %v1954_v51, %v1850_v47  ;;  %v6652_v44 = vpack.c.bf16 %v2506_v16, %v2402_v18  ;;  %v6656_v58 = vpack.c.bf16 %v8543_v46, %v2610_v35 }
 0x2dc   :  { %v2489_v1 = vpop.permute.xlu0 %2488  ;;  %v2283_v33 = vpop.permute.xlu1 %2282  ;;  %6659 = vmatprep.subr.bf16.mxu1 %v6658_v55 }
 0x2dd   :  { %v2507_v48 = vsel %vm784_vm6, %v2487_v26, %v2489_v1  ;;  %6661 = vmatpush1.bf16.msra.mxu1 %v6660_v42  ;;  %v6664_v26 = vpack.c.bf16 %v2165_v15, %v2057_v27  ;;  %v2300_v45 = vsel %vm574_vm4, %v8490_v54, %v2283_v33  ;;  %v8557_v54 = vld [vmem:[#allocation2] sm:$0xff] }
 0x2de   :  { %v6650_v6 = vpack.c.bf16 %v2507_v48, %v2403_v61 }
 0x2e0   :  { %v8530_v34 = vpop.permute.xlu0 %2041  ;;  %v2387_v25 = vpop.permute.xlu1 %2386  ;;  %6651 = vmatprep.subr.bf16.mxu0 %v6650_v6 }
 0x2e1   :  { %6653 = vmatpush1.bf16.msra.mxu0 %v6652_v44  ;;  %v2058_v3 = vsel %vm329_vm2, %v2040_v23, %v8530_v34  ;;  %v2404_v55 = vsel %vm679_vm5, %v8492_v39, %v2387_v25 }
 0x2e4   :  { %v8533_v62 = vpop.permute.xlu0 %2147  ;;  %v2491_v30 = vpop.permute.xlu1 %2490 }
 0x2e5   :  { %v2166_v0 = vsel %vm438_vm3, %v2146_v24, %v8533_v62  ;;  %v2716_v24 = vld [vmem:[#allocation4 + $0x230] sm:$0xff]  ;;  %v2508_v11 = vsel %vm784_vm6, %v2489_v1, %v2491_v30 }
 0x2e6   :  { %v6662_v28 = vpack.c.bf16 %v2166_v0, %v2058_v3  ;;  %v6668_v40 = vpack.c.bf16 %v2300_v45, %v2716_v24  ;;  %v6672_v16 = vpack.c.bf16 %v2508_v11, %v2404_v55 }
 0x2e8   :  { %v2593_v41 = vpop.permute.xlu0 %2592  ;;  %v2595_v29 = vpop.permute.xlu1 %2594  ;;  %6663 = vmatprep.subr.bf16.mxu1 %v6662_v28 }
 0x2e9   :  { %v2611_v37 = vsel %vm889_vm7, %v2591_v4, %v2593_v41  ;;  %6665 = vmatpush1.bf16.msra.mxu1 %v6664_v26 }
 0x2ea   :  { %v6654_v19 = vpack.c.bf16 %v8543_v46, %v2611_v37 }
 0x2ec   :  { %v8549_v23 = vpop.permute.xlu0 %2284  ;;  %v1836_v7 = vpop.permute.xlu1 %1835  ;;  %6655 = vmatprep.subr.bf16.mxu0 %v6654_v19 }
 0x2ed   :  { %v2301_v36 = vsel %vm574_vm4, %v2283_v33, %v8549_v23  ;;  %6657 = vmatpush1.bf16.msra.mxu0 %v6656_v58  ;;  %v2612_v33 = vsel %vm889_vm7, %v2593_v41, %v2595_v29  ;;  %v1851_v27 = vsel %vm119_vm1, %v8513_v60, %v1836_v7 }
 0x2ee   :  { %v6666_v12 = vpack.c.bf16 %v2301_v36, %v2717_v14  ;;  %v6676_v6 = vpack.c.bf16 %v8543_v46, %v2612_v33 }
 0x2f0   :  { %v8553_v56 = vpop.permute.xlu0 %2388  ;;  %v1940_v43 = vpop.permute.xlu1 %1939  ;;  %6138 = vmatmul.mubr.msk.f32.vlgmr.msra.gmra.mrb[12].mxu0 %vm1084_vm8, %v8279_v21  ;;  %6667 = vmatprep.subr.bf16.mxu1 %v6666_v12 }
 0x2f1   :  { %6669 = vmatpush1.bf16.msra.mxu1 %v6668_v40  ;;  %3289 = vmatprep.mubr.f32.mxu0 %v8557_v54  ;;  %v2405_v51 = vsel %vm679_vm5, %v2387_v25, %v8553_v56  ;;  %v1955_v39 = vsel %vm224_vm0, %v8516_v52, %v1940_v43 }
 0x2f2   :  { %v6680_v26 = vpack.c.bf16 %v1955_v39, %v1851_v27 }
 0x2f4   :  { %v8561_v4 = vpop.permute.xlu0 %2492  ;;  %v2044_v47 = vpop.permute.xlu1 %2043 }
 0x2f5   :  { %v2509_v38 = vsel %vm784_vm6, %v2491_v30, %v8561_v4 }
 0x2f6   :  { %v6670_v42 = vpack.c.bf16 %v2509_v38, %v2405_v51 }
 0x2f8   :  { %v8570_v61 = vpop.permute.xlu0 %2596  ;;  %v2150_v48 = vpop.permute.xlu1 %2149  ;;  %6671 = vmatprep.subr.bf16.mxu1 %v6670_v42 }
 0x2f9   :  { %v2613_v1 = vsel %vm889_vm7, %v2595_v29, %v8570_v61  ;;  %6673 = vmatpush1.bf16.msra.mxu1 %v6672_v16  ;;  %v2167_v41 = vsel %vm438_vm3, %v8533_v62, %v2150_v48 }
 0x2fa   :  { %v6674_v18 = vpack.c.bf16 %v8543_v46, %v2613_v1 }
 0x2fc   :  { %v1838_v44 = vpop.permute.xlu0 %1837  ;;  %v2287_v15 = vpop.permute.xlu1 %2286  ;;  %6675 = vmatprep.subr.bf16.mxu1 %v6674_v18 }
 0x2fd   :  { %1882 = vst.msk [vmem:[#allocation4 + $0x70] sm:$0xff] %vm52_vm9, %v1838_v44  ;;  %6677 = vmatpush1.bf16.msra.mxu1 %v6676_v6  ;;  %v1852_v3 = vsel %vm119_vm1, %v1836_v7, %v1838_v44  ;;  %v2059_v7 = vsel %vm329_vm2, %v8530_v34, %v2044_v47  ;;  %v2302_v24 = vsel %vm574_vm4, %v8549_v23, %v2287_v15 }
 0x2fe   :  { %6698 = vmatprep.subr.bf16.mxu1 %v7153_v13  ;;  %v6684_v12 = vpack.c.bf16 %v2167_v41, %v2059_v7 }
 0x300   :  { %v1942_v25 = vpop.permute.xlu0 %1941  ;;  %v2391_v30 = vpop.permute.xlu1 %2390  ;;  %6139 = vmatmul.mubr.msk.f32.vlgmr.msra.gmra.mrb[12].mxu1 %vm1084_vm8, %v8279_v21 }
 0x301   :  { %v1956_v0 = vsel %vm224_vm0, %v1940_v43, %v1942_v25  ;;  %1986 = vst.msk [vmem:[#allocation4 + $0xe8] sm:$0xff] %vm52_vm9, %v1942_v25  ;;  %6357 = vmatprep.mubr.msk.f32.mxu1 %vm7154_vm10, %v8557_v54  ;;  %v2720_v25 = vld [vmem:[#allocation4 + $0x250] sm:$0xff] }
 0x302   :  { %v6678_v28 = vpack.c.bf16 %v1956_v0, %v1852_v3 }
 0x304   :  { %v2046_v52 = vpop.permute.xlu0 %2045  ;;  %v2495_v35 = vpop.permute.xlu1 %2494  ;;  %6679 = vmatprep.subr.bf16.mxu0 %v6678_v28  ;;  %v2660_v19 = vld [vmem:[#allocation4 + $0x70] sm:$0xff]  ;;  %v2795_v28 = vld [vmem:[#allocation4 + $0x4a8] sm:$0xff] }
 0x305   :  { %2090 = vst.msk [vmem:[#allocation4 + $0x160] sm:$0xff] %vm52_vm9, %v2046_v52  ;;  %6681 = vmatpush1.bf16.msra.mxu0 %v6680_v26  ;;  %v2060_v45 = vsel %vm329_vm2, %v2044_v47, %v2046_v52  ;;  %v2718_v47 = vld [vmem:[#allocation4 + $0x240] sm:$0xff]  ;;  %v2510_v23 = vsel %vm784_vm6, %v8561_v4, %v2495_v35 }
 0x306   :  { %v6688_v51 = vpack.c.bf16 %v2302_v24, %v2718_v47 }
 0x308   :  { %v2152_v29 = vpop.permute.xlu0 %2151  ;;  %v2599_v37 = vpop.permute.xlu1 %2598  ;;  %v2675_v58 = vld [vmem:[#allocation4 + $0xe8] sm:$0xff] }
 0x309   :  { %v2168_v36 = vsel %vm438_vm3, %v2150_v48, %v2152_v29  ;;  %v6699_v60 = vpack.c.bf16 %v2675_v58, %v2660_v19 }
 0x30a   :  { %v6682_v14 = vpack.c.bf16 %v2168_v36, %v2060_v45 }
 0x30b   :  { %6700 = vmatpush3.bf16.msra.mxu1 %v6699_v60 }
 0x30c   :  { %v2289_v40 = vpop.permute.xlu0 %2288  ;;  %v2154_v62 = vpop.permute.xlu1 %2153  ;;  %6683 = vmatprep.subr.bf16.mxu0 %v6682_v14  ;;  %6701 = vmatprep.subr.bf16.mxu1 %v7153_v13  ;;  %v2690_v33 = vld [vmem:[#allocation4 + $0x160] sm:$0xff] }
 0x30d   :  { %v2303_v43 = vsel %vm574_vm4, %v2287_v15, %v2289_v40  ;;  %2333 = vst.msk [vmem:[#allocation4 + $0x2c8] sm:$0xff] %vm52_vm9, %v2289_v40  ;;  %v2169_v11 = vsel %vm438_vm3, %v2152_v29, %v2154_v62  ;;  %6685 = vmatpush1.bf16.msra.mxu0 %v6684_v12  ;;  %v2614_v15 = vsel %vm889_vm7, %v8570_v61, %v2599_v37 }
 0x30e   :  { %2199 = vst.msk [vmem:[#allocation4 + $0x1d8] sm:$0xff] %vm52_vm9, %v2169_v11  ;;  %v6686_v34 = vpack.c.bf16 %v2303_v43, %v8174_v9  ;;  %v2406_v9 = vsel %vm679_vm5, %v8553_v56, %v2391_v30  ;;  %v6696_v0 = vpack.c.bf16 %v8543_v46, %v2614_v15 }
 0x30f   :  { %v6692_v44 = vpack.c.bf16 %v2510_v23, %v2406_v9 }
 0x310   :  { %v2393_v38 = vpop.permute.xlu0 %2392  ;;  %6687 = vmatprep.subr.bf16.mxu0 %v6686_v34 }
 0x311   :  { %2437 = vst.msk [vmem:[#allocation4 + $0x340] sm:$0xff] %vm52_vm9, %v2393_v38  ;;  %6689 = vmatpush1.bf16.msra.mxu0 %v6688_v51  ;;  %v2407_v42 = vsel %vm679_vm5, %v2391_v30, %v2393_v38 }
 0x314   :  { %v2497_v55 = vpop.permute.xlu0 %2496  ;;  %v2735_v6 = vld [vmem:[#allocation4 + $0x2c8] sm:$0xff] }
 0x315   :  { %v2511_v16 = vsel %vm784_vm6, %v2495_v35, %v2497_v55  ;;  %2541 = vst.msk [vmem:[#allocation4 + $0x3b8] sm:$0xff] %vm52_vm9, %v2497_v55  ;;  %v2705_v48 = vld [vmem:[#allocation4 + $0x1d8] sm:$0xff]  ;;  %v6705_v3 = vpack.c.bf16 %v2735_v6, %v2720_v25 }
 0x316   :  { %v6702_v1 = vpack.c.bf16 %v2705_v48, %v2690_v33  ;;  %v6690_v18 = vpack.c.bf16 %v2511_v16, %v2407_v42 }
 0x318   :  { %v2601_v4 = vpop.permute.xlu0 %2600  ;;  %6703 = vmatpush3.bf16.msra.mxu1 %v6702_v1  ;;  %6691 = vmatprep.subr.bf16.mxu0 %v6690_v18  ;;  %v2750_v30 = vld [vmem:[#allocation4 + $0x340] sm:$0xff] }
 0x319   :  { %v2615_v39 = vsel %vm889_vm7, %v2599_v37, %v2601_v4  ;;  %2645 = vst.msk [vmem:[#allocation4 + $0x430] sm:$0xff] %vm52_vm9, %v2601_v4  ;;  %6704 = vmatprep.subr.bf16.mxu1 %v7153_v13  ;;  %6693 = vmatpush1.bf16.msra.mxu0 %v6692_v44 }
 0x31a   :  { %v6694_v56 = vpack.c.bf16 %v8543_v46, %v2615_v39 }
 0x31c   :  { %6706 = vmatpush3.bf16.msra.mxu1 %v6705_v3  ;;  %6695 = vmatprep.subr.bf16.mxu0 %v6694_v56  ;;  %v2765_v61 = vld [vmem:[#allocation4 + $0x3b8] sm:$0xff] }
 0x31d   :  { %6697 = vmatpush1.bf16.msra.mxu0 %v6696_v0  ;;  %6707 = vmatprep.subr.bf16.mxu1 %v7153_v13  ;;  %v6708_v27 = vpack.c.bf16 %v2765_v61, %v2750_v30 }
 0x320   :  { %6709 = vmatpush3.bf16.msra.mxu1 %v6708_v27  ;;  %v2780_v26 = vld [vmem:[#allocation4 + $0x430] sm:$0xff]  ;;  %6140 = vmatmul.mubr.msk.f32.vlgmr.msra.gmra.mrb[14].mxu0 %vm1084_vm8, %v8279_v21 }
 0x321   :  { %6710 = vmatprep.subr.bf16.mxu1 %v7153_v13  ;;  %v6711_v52 = vpack.c.bf16 %v2795_v28, %v2780_v26  ;;  %4512 = vmatprep.mubr.f32.mxu0 %v8557_v54 }
 0x324   :  { %6712 = vmatpush3.bf16.msra.mxu1 %v6711_v52 }
 0x327   :  { %6358 = vmatmul.mubr.msk.f32.vlgmr.msra.gmra.mrb[14].mxu1 %vm1084_vm8, %v8279_v21 }
 0x328   :  { %4583 = vmatprep.mubr.f32.mxu1 %v8557_v54 }
 0x343   :  { %v2865_v35 = vpop.f32.mrb[8].mxu0 }
 0x344   :  { %v3366_v41 = vmax.f32 %v2865_v35, 0.0  ;;  %v2867_v29 = vpop.f32.mrb[9].mxu0 }
 0x345   :  { %v3367_v37 = vmax.f32 %v2867_v29, 0.0 }
 0x346   :  { %v8628_v19 = vmul.f32 %v3366_v41, %v7883_v50 }
 0x347   :  { %v8631_v58 = vmul.f32 %v3367_v37, %v7888_v32 }
 0x348   :  { %3445 = vrot.lane.b32.xlu0 %v8628_v19, %s7144_s6  ;;  %3998 = vrot.lane.b32.xlu1 %v8628_v19, %s7148_s17 }
 0x34c   :  { %3549 = vrot.lane.b32.xlu0 %v8628_v19, %s7143_s5  ;;  %4206 = vrot.lane.b32.xlu1 %v8628_v19, %s7151_s19 }
 0x350   :  { %3653 = vrot.lane.b32.xlu0 %v8628_v19, %s7145_s10  ;;  %3447 = vrot.lane.b32.xlu1 %v8631_v58, %s7144_s6 }
 0x353   :  { %v2936_v50 = vpop.f32.mrb[8].mxu1 }
 0x354   :  { %3759 = vrot.lane.b32.xlu0 %v8628_v19, %s7146_s11  ;;  %3551 = vrot.lane.b32.xlu1 %v8631_v58, %s7143_s5  ;;  %v3368_v32 = vmax.f32 %v2936_v50, 0.0  ;;  %v2938_v21 = vpop.f32.mrb[9].mxu1 }
 0x355   :  { %v3369_v45 = vmax.f32 %v2938_v21, 0.0 }
 0x356   :  { %v8650_v36 = vmul.f32 %v3368_v32, %v7911_v57 }
 0x357   :  { %v8653_v60 = vmul.f32 %v3369_v45, %v7916_v59 }
 0x358   :  { %3851 = vst [vmem:[#allocation4 + $0x1f0] sm:$0xff] %v8650_v36  ;;  %3894 = vrot.lane.b32.xlu0 %v8628_v19, %s7147_s14  ;;  %3655 = vrot.lane.b32.xlu1 %v8631_v58, %s7145_s10 }
 0x359   :  { %3852 = vst [vmem:[#allocation4 + $0x1f8] sm:$0xff] %v8653_v60 }
 0x35c   :  { %4102 = vrot.lane.b32.xlu0 %v8628_v19, %s7149_s18  ;;  %3761 = vrot.lane.b32.xlu1 %v8631_v58, %s7146_s11 }
 0x360   :  { %3896 = vrot.lane.b32.xlu0 %v8631_v58, %s7147_s14  ;;  %4000 = vrot.lane.b32.xlu1 %v8631_v58, %s7148_s17 }
 0x364   :  { %4002 = vrot.lane.b32.xlu0 %v8650_v36, %s7148_s17  ;;  %4104 = vrot.lane.b32.xlu1 %v8631_v58, %s7149_s18 }
 0x368   :  { %4106 = vrot.lane.b32.xlu0 %v8650_v36, %s7149_s18  ;;  %4208 = vrot.lane.b32.xlu1 %v8631_v58, %s7151_s19 }
 0x36c   :  { %4210 = vrot.lane.b32.xlu0 %v8650_v36, %s7151_s19  ;;  %3898 = vrot.lane.b32.xlu1 %v8650_v36, %s7147_s14 }
 0x370   :  { %3451 = vrot.lane.b32.xlu0 %v8653_v60, %s7144_s6  ;;  %3555 = vrot.lane.b32.xlu1 %v8653_v60, %s7143_s5 }
 0x374   :  { %3659 = vrot.lane.b32.xlu0 %v8653_v60, %s7145_s10  ;;  %3765 = vrot.lane.b32.xlu1 %v8653_v60, %s7146_s11 }
 0x37f   :  { %v3007_v57 = vpop.f32.mrb[10].mxu0 }
 0x380   :  { %v3370_v59 = vmax.f32 %v3007_v57, 0.0  ;;  %v3009_v7 = vpop.f32.mrb[11].mxu0 }
 0x381   :  { %v3371_v14 = vmax.f32 %v3009_v7, 0.0 }
 0x382   :  { %v8690_v12 = vmul.f32 %v3370_v59, %v7959_v10 }
 0x383   :  { %v8693_v24 = vmul.f32 %v3371_v14, %v7964_v5 }
 0x384   :  { %3853 = vst [vmem:[#allocation4 + $0x200] sm:$0xff] %v8690_v12  ;;  %4006 = vrot.lane.b32.xlu1 %v8690_v12, %s7148_s17  ;;  %3453 = vrot.lane.b32.xlu0 %v8690_v12, %s7144_s6 }
 0x385   :  { %3854 = vst [vmem:[#allocation4 + $0x208] sm:$0xff] %v8693_v24 }
 0x388   :  { %4214 = vrot.lane.b32.xlu1 %v8690_v12, %s7151_s19  ;;  %3557 = vrot.lane.b32.xlu0 %v8690_v12, %s7143_s5 }
 0x38c   :  { %3661 = vrot.lane.b32.xlu0 %v8690_v12, %s7145_s10  ;;  %3455 = vrot.lane.b32.xlu1 %v8693_v24, %s7144_s6 }
 0x390   :  { %3767 = vrot.lane.b32.xlu0 %v8690_v12, %s7146_s11  ;;  %3559 = vrot.lane.b32.xlu1 %v8693_v24, %s7143_s5 }
 0x393   :  { %v3078_v10 = vpop.f32.mrb[10].mxu1 }
 0x394   :  { %v3372_v5 = vmax.f32 %v3078_v10, 0.0  ;;  %3902 = vrot.lane.b32.xlu0 %v8690_v12, %s7147_s14  ;;  %3663 = vrot.lane.b32.xlu1 %v8693_v24, %s7145_s10  ;;  %v3080_v40 = vpop.f32.mrb[11].mxu1 }
 0x395   :  { %v3373_v62 = vmax.f32 %v3080_v40, 0.0 }
 0x396   :  { %v8718_v43 = vmul.f32 %v3372_v5, %v8007_v20  ;;  %v3444_v20 = vpop.permute.xlu0 %3443 }
 0x397   :  { %v8721_v11 = vmul.f32 %v3373_v62, %v8010_v8  ;;  %v3548_v8 = vpop.permute.xlu1 %3547 }
 0x398   :  { %3855 = vst [vmem:[#allocation4 + $0x210] sm:$0xff] %v8718_v43  ;;  %4110 = vrot.lane.b32.xlu0 %v8690_v12, %s7149_s18  ;;  %3769 = vrot.lane.b32.xlu1 %v8693_v24, %s7146_s11 }
 0x399   :  { %3856 = vst [vmem:[#allocation4 + $0x218] sm:$0xff] %v8721_v11 }
 0x39a   :  { %v3652_v34 = vpop.permute.xlu0 %3651 }
 0x39b   :  { %v3758_v47 = vpop.permute.xlu1 %3757 }
 0x39c   :  { %3904 = vrot.lane.b32.xlu0 %v8693_v24, %s7147_s14  ;;  %4008 = vrot.lane.b32.xlu1 %v8693_v24, %s7148_s17 }
 0x3a0   :  { %4112 = vrot.lane.b32.xlu1 %v8693_v24, %s7149_s18  ;;  %4010 = vrot.lane.b32.xlu0 %v8718_v43, %s7148_s17 }
 0x3a4   :  { %4216 = vrot.lane.b32.xlu1 %v8693_v24, %s7151_s19  ;;  %4114 = vrot.lane.b32.xlu0 %v8718_v43, %s7149_s18 }
 0x3a8   :  { %4218 = vrot.lane.b32.xlu0 %v8718_v43, %s7151_s19  ;;  %3906 = vrot.lane.b32.xlu1 %v8718_v43, %s7147_s14 }
 0x3ac   :  { %3459 = vrot.lane.b32.xlu0 %v8721_v11, %s7144_s6  ;;  %3563 = vrot.lane.b32.xlu1 %v8721_v11, %s7143_s5 }
 0x3b0   :  { %3667 = vrot.lane.b32.xlu0 %v8721_v11, %s7145_s10  ;;  %3773 = vrot.lane.b32.xlu1 %v8721_v11, %s7146_s11 }
 0x3ba   :  { %v3446_v51 = vpop.permute.xlu0 %3445  ;;  %v3999_v38 = vpop.permute.xlu1 %3998 }
 0x3bb   :  { %v3473_v23 = vsel %vm119_vm1, %v3444_v20, %v3446_v51 }
 0x3be   :  { %v3550_v55 = vpop.permute.xlu0 %3549  ;;  %v4207_v42 = vpop.permute.xlu1 %4206 }
 0x3bf   :  { %v3577_v16 = vsel %vm224_vm0, %v3548_v8, %v3550_v55 }
 0x3c0   :  { %v6715_v0 = vpack.c.bf16 %v3577_v16, %v3473_v23 }
 0x3c2   :  { %v3654_v33 = vpop.permute.xlu0 %3653  ;;  %v8755_v48 = vpop.permute.xlu1 %3447 }
 0x3c3   :  { %v3149_v9 = vpop.f32.mrb[12].mxu0  ;;  %v3681_v1 = vsel %vm329_vm2, %v3652_v34, %v3654_v33  ;;  %v3474_v18 = vsel %vm119_vm1, %v3446_v51, %v8755_v48 }
 0x3c4   :  { %v3374_v6 = vmax.f32 %v3149_v9, 0.0  ;;  %v3151_v44 = vpop.f32.mrb[13].mxu0 }
 0x3c5   :  { %v3375_v15 = vmax.f32 %v3151_v44, 0.0 }
 0x3c6   :  { %v8761_v4 = vmul.f32 %v3374_v6, %v8048_v31  ;;  %v3760_v39 = vpop.permute.xlu0 %3759  ;;  %v8763_v25 = vpop.permute.xlu1 %3551 }
 0x3c7   :  { %v8766_v3 = vmul.f32 %v3375_v15, %v8053_v63  ;;  %v3789_v56 = vsel %vm438_vm3, %v3758_v47, %v3760_v39  ;;  %v3578_v30 = vsel %vm224_vm0, %v3550_v55, %v8763_v25 }
 0x3c8   :  { %3857 = vst [vmem:[#allocation4 + $0x220] sm:$0xff] %v8761_v4  ;;  %4014 = vrot.lane.b32.xlu1 %v8761_v4, %s7148_s17  ;;  %3461 = vrot.lane.b32.xlu0 %v8761_v4, %s7144_s6  ;;  %v6713_v31 = vpack.c.bf16 %v3578_v30, %v3474_v18  ;;  %v6719_v35 = vpack.c.bf16 %v3789_v56, %v3681_v1  ;;  %v8856_v1 = vld [vmem:[%s9337_s2 + $0x10] sm:$0xff] }
 0x3c9   :  { %3858 = vst [vmem:[#allocation4 + $0x228] sm:$0xff] %v8766_v3 }
 0x3ca   :  { %v3895_v61 = vpop.permute.xlu0 %3894  ;;  %v8777_v63 = vpop.permute.xlu1 %3655  ;;  %6714 = vmatprep.subr.bf16.mxu0 %v6713_v31 }
 0x3cb   :  { %v3682_v27 = vsel %vm329_vm2, %v3654_v33, %v8777_v63  ;;  %6716 = vmatpush1.bf16.msra.mxu0 %v6715_v0 }
 0x3cc   :  { %3565 = vrot.lane.b32.xlu0 %v8761_v4, %s7143_s5  ;;  %3463 = vrot.lane.b32.xlu1 %v8766_v3, %s7144_s6 }
 0x3ce   :  { %v4103_v28 = vpop.permute.xlu0 %4102  ;;  %v8785_v26 = vpop.permute.xlu1 %3761 }
 0x3cf   :  { %v3790_v52 = vsel %vm438_vm3, %v3760_v39, %v8785_v26 }
 0x3d0   :  { %3669 = vrot.lane.b32.xlu0 %v8761_v4, %s7145_s10  ;;  %3567 = vrot.lane.b32.xlu1 %v8766_v3, %s7143_s5  ;;  %v6717_v41 = vpack.c.bf16 %v3790_v52, %v3682_v27 }
 0x3d2   :  { %v3897_v29 = vpop.permute.xlu0 %3896  ;;  %v4001_v37 = vpop.permute.xlu1 %4000  ;;  %6718 = vmatprep.subr.bf16.mxu0 %v6717_v41 }
 0x3d3   :  { %v3924_v50 = vsel %vm574_vm4, %v3895_v61, %v3897_v29  ;;  %v4028_v32 = vsel %vm679_vm5, %v3999_v38, %v4001_v37  ;;  %v3220_v21 = vpop.f32.mrb[12].mxu1  ;;  %6720 = vmatpush1.bf16.msra.mxu0 %v6719_v35 }
 0x3d4   :  { %3775 = vrot.lane.b32.xlu0 %v8761_v4, %s7146_s11  ;;  %3671 = vrot.lane.b32.xlu1 %v8766_v3, %s7145_s10  ;;  %v3376_v45 = vmax.f32 %v3220_v21, 0.0  ;;  %v3222_v57 = vpop.f32.mrb[13].mxu1  ;;  %v6723_v55 = vpack.c.bf16 %v3924_v50, %v8628_v19 }
 0x3d5   :  { %v3377_v59 = vmax.f32 %v3222_v57, 0.0 }
 0x3d6   :  { %v8799_v7 = vpop.permute.xlu0 %4002  ;;  %v8802_v14 = vmul.f32 %v3376_v45, %v8100_v49  ;;  %v4105_v10 = vpop.permute.xlu1 %4104 }
 0x3d7   :  { %v4029_v5 = vsel %vm679_vm5, %v4001_v37, %v8799_v7  ;;  %v4132_v40 = vsel %vm784_vm6, %v4103_v28, %v4105_v10  ;;  %v8808_v62 = vmul.f32 %v3377_v59, %v8109_v53 }
 0x3d8   :  { %3859 = vst [vmem:[#allocation4 + $0x230] sm:$0xff] %v8802_v14  ;;  %3910 = vrot.lane.b32.xlu0 %v8761_v4, %s7147_s14  ;;  %3777 = vrot.lane.b32.xlu1 %v8766_v3, %s7146_s11  ;;  %v6727_v16 = vpack.c.bf16 %v4132_v40, %v4028_v32 }
 0x3d9   :  { %3860 = vst [vmem:[#allocation4 + $0x238] sm:$0xff] %v8808_v62 }
 0x3da   :  { %v8816_v49 = vpop.permute.xlu0 %4106  ;;  %v4209_v20 = vpop.permute.xlu1 %4208 }
 0x3db   :  { %v4133_v8 = vsel %vm784_vm6, %v4105_v10, %v8816_v49  ;;  %v4236_v34 = vsel %vm889_vm7, %v4207_v42, %v4209_v20 }
 0x3dc   :  { %4118 = vrot.lane.b32.xlu0 %v8761_v4, %s7149_s18  ;;  %4016 = vrot.lane.b32.xlu1 %v8766_v3, %s7148_s17  ;;  %v6725_v42 = vpack.c.bf16 %v4133_v8, %v4029_v5  ;;  %v6731_v19 = vpack.c.bf16 %v8543_v46, %v4236_v34 }
 0x3de   :  { %v8825_v53 = vpop.permute.xlu0 %4210  ;;  %v8827_v47 = vpop.permute.xlu1 %3898 }
 0x3df   :  { %v4237_v51 = vsel %vm889_vm7, %v4209_v20, %v8825_v53  ;;  %v3925_v38 = vsel %vm574_vm4, %v3897_v29, %v8827_v47 }
 0x3e0   :  { %3912 = vrot.lane.b32.xlu0 %v8766_v3, %s7147_s14  ;;  %4120 = vrot.lane.b32.xlu1 %v8766_v3, %s7149_s18  ;;  %v6721_v23 = vpack.c.bf16 %v3925_v38, %v8631_v58  ;;  %v6729_v33 = vpack.c.bf16 %v8543_v46, %v4237_v51 }
 0x3e2   :  { %6722 = vmatprep.subr.bf16.mxu0 %v6721_v23  ;;  %v8849_v58 = vpop.permute.xlu0 %3451  ;;  %v8851_v9 = vpop.permute.xlu1 %3555 }
 0x3e3   :  { %6724 = vmatpush1.bf16.msra.mxu0 %v6723_v55 }
 0x3e4   :  { %4018 = vrot.lane.b32.xlu0 %v8802_v14, %s7148_s17  ;;  %3914 = vrot.lane.b32.xlu1 %v8802_v14, %s7147_s14 }
 0x3e5   :  { %6726 = vmatprep.subr.bf16.mxu0 %v6725_v42 }
 0x3e6   :  { %v8869_v18 = vpop.permute.xlu0 %3659  ;;  %v8871_v6 = vpop.permute.xlu1 %3765 }
 0x3e7   :  { %6728 = vmatpush1.bf16.msra.mxu0 %v6727_v16 }
 0x3e8   :  { %4122 = vrot.lane.b32.xlu0 %v8802_v14, %s7149_s18  ;;  %4224 = vrot.lane.b32.xlu1 %v8766_v3, %s7151_s19 }
 0x3e9   :  { %6730 = vmatprep.subr.bf16.mxu0 %v6729_v33 }
 0x3eb   :  { %6732 = vmatpush1.bf16.msra.mxu0 %v6731_v19 }
 0x3ec   :  { %4226 = vrot.lane.b32.xlu0 %v8802_v14, %s7151_s19  ;;  %4222 = vrot.lane.b32.xlu1 %v8761_v4, %s7151_s19 }
 0x3ee   :  { %6143 = vmatmul.mubr.msk.f32.vlgmr.msra.gmra.mrb[16].mxu0 %vm1084_vm8, %v8856_v1 }
 0x3ef   :  { %4654 = vmatprep.mubr.f32.mxu0 %v8557_v54 }
 0x3f0   :  { %3449 = vrot.lane.b32.xlu0 %v8650_v36, %s7144_s6  ;;  %3553 = vrot.lane.b32.xlu1 %v8650_v36, %s7143_s5 }
 0x3f3   :  { %v3291_v44 = vpop.f32.mrb[14].mxu0 }
 0x3f4   :  { %3657 = vrot.lane.b32.xlu0 %v8650_v36, %s7145_s10  ;;  %3763 = vrot.lane.b32.xlu1 %v8650_v36, %s7146_s11  ;;  %v3378_v15 = vmax.f32 %v3291_v44, 0.0  ;;  %v3293_v39 = vpop.f32.mrb[15].mxu0 }
 0x3f5   :  { %v3379_v56 = vmax.f32 %v3293_v39, 0.0 }
 0x3f6   :  { %v3454_v30 = vpop.permute.xlu0 %3453  ;;  %v8877_v0 = vpop.permute.xlu1 %4006  ;;  %v8880_v31 = vmul.f32 %v3378_v15, %v8150_v22 }
 0x3f7   :  { %v3477_v61 = vsel %vm119_vm1, %v8849_v58, %v3454_v30  ;;  %v8885_v27 = vmul.f32 %v3379_v56, %v8162_v2 }
 0x3f8   :  { %3900 = vrot.lane.b32.xlu0 %v8653_v60, %s7147_s14  ;;  %4004 = vrot.lane.b32.xlu1 %v8653_v60, %s7148_s17  ;;  %3861 = vst [vmem:[#allocation4 + $0x240] sm:$0xff] %v8880_v31 }
 0x3f9   :  { %3862 = vst [vmem:[#allocation4 + $0x248] sm:$0xff] %v8885_v27 }
 0x3fa   :  { %v3558_v36 = vpop.permute.xlu0 %3557  ;;  %v8893_v28 = vpop.permute.xlu1 %4214 }
 0x3fb   :  { %v3581_v22 = vsel %vm224_vm0, %v8851_v9, %v3558_v36  ;;  %v3362_v52 = vpop.f32.mrb[14].mxu1 }
 0x3fc   :  { %4108 = vrot.lane.b32.xlu0 %v8653_v60, %s7149_s18  ;;  %4212 = vrot.lane.b32.xlu1 %v8653_v60, %s7151_s19  ;;  %v3380_v2 = vmax.f32 %v3362_v52, 0.0  ;;  %v6359_v35 = vpop.f32.mrb[15].mxu1  ;;  %v6755_v59 = vpack.c.bf16 %v3581_v22, %v3477_v61 }
 0x3fe   :  { %v3662_v41 = vpop.permute.xlu0 %3661  ;;  %v8901_v29 = vpop.permute.xlu1 %3455  ;;  %v3395_v37 = vmul.f32 %v3380_v2, %v8242_v17 }
 0x3ff   :  { %v3685_v50 = vsel %vm329_vm2, %v8869_v18, %v3662_v41  ;;  %v3478_v32 = vsel %vm119_vm1, %v3454_v30, %v8901_v29 }
 0x400   :  { %3457 = vrot.lane.b32.xlu0 %v8718_v43, %s7144_s6  ;;  %3561 = vrot.lane.b32.xlu1 %v8718_v43, %s7143_s5  ;;  %3410 = vst.msk [vmem:[#allocation3 + $0x78] sm:$0xff] %vm52_vm9, %v3395_v37 }
 0x402   :  { %v3768_v60 = vpop.permute.xlu0 %3767  ;;  %v8913_v21 = vpop.permute.xlu1 %3559 }
 0x403   :  { %v3793_v17 = vsel %vm438_vm3, %v8871_v6, %v3768_v60  ;;  %v3582_v45 = vsel %vm224_vm0, %v3558_v36, %v8913_v21 }
 0x404   :  { %3665 = vrot.lane.b32.xlu0 %v8718_v43, %s7145_s10  ;;  %3771 = vrot.lane.b32.xlu1 %v8718_v43, %s7146_s11  ;;  %v6753_v57 = vpack.c.bf16 %v3582_v45, %v3478_v32  ;;  %v6759_v38 = vpack.c.bf16 %v3793_v17, %v3685_v50 }
 0x406   :  { %v8923_v10 = vpop.permute.xlu0 %3902  ;;  %v8925_v5 = vpop.permute.xlu1 %3663  ;;  %6754 = vmatprep.subr.bf16.mxu0 %v6753_v57 }
 0x407   :  { %v3686_v40 = vsel %vm329_vm2, %v3662_v41, %v8925_v5  ;;  %6756 = vmatpush1.bf16.msra.mxu0 %v6755_v59  ;;  %v8929_v20 = vld [vmem:[#allocation3 + $0x78] sm:$0xff] }
 0x408   :  { %3908 = vrot.lane.b32.xlu0 %v8721_v11, %s7147_s14  ;;  %4012 = vrot.lane.b32.xlu1 %v8721_v11, %s7148_s17  ;;  %3863 = vst.msk [vmem:[#allocation4 + $0x250] sm:$0xff] %vm52_vm9, %v8929_v20 }
 0x40a   :  { %v8937_v43 = vpop.permute.xlu0 %4110  ;;  %v8939_v8 = vpop.permute.xlu1 %3769 }
 0x40b   :  { %v3794_v34 = vsel %vm438_vm3, %v3768_v60, %v8939_v8 }
 0x40c   :  { %4116 = vrot.lane.b32.xlu0 %v8721_v11, %s7149_s18  ;;  %4220 = vrot.lane.b32.xlu1 %v8721_v11, %s7151_s19  ;;  %v6757_v51 = vpack.c.bf16 %v3794_v34, %v3686_v40 }
 0x40e   :  { %v3905_v23 = vpop.permute.xlu0 %3904  ;;  %v4009_v55 = vpop.permute.xlu1 %4008  ;;  %6758 = vmatprep.subr.bf16.mxu0 %v6757_v51 }
 0x40f   :  { %v3928_v42 = vsel %vm574_vm4, %v8923_v10, %v3905_v23  ;;  %v4032_v16 = vsel %vm679_vm5, %v8877_v0, %v4009_v55  ;;  %6760 = vmatpush1.bf16.msra.mxu0 %v6759_v38 }
 0x410   :  { %3465 = vrot.lane.b32.xlu0 %v8802_v14, %s7144_s6  ;;  %3467 = vrot.lane.b32.xlu1 %v8808_v62, %s7144_s6  ;;  %v6763_v35 = vpack.c.bf16 %v3928_v42, %v8690_v12 }
 0x412   :  { %v8955_v33 = vpop.permute.xlu0 %4010  ;;  %v4113_v11 = vpop.permute.xlu1 %4112 }
 0x413   :  { %v4033_v19 = vsel %vm679_vm5, %v4009_v55, %v8955_v33  ;;  %v4136_v44 = vsel %vm784_vm6, %v8937_v43, %v4113_v11 }
 0x414   :  { %3569 = vrot.lane.b32.xlu0 %v8802_v14, %s7143_s5  ;;  %3571 = vrot.lane.b32.xlu1 %v8808_v62, %s7143_s5  ;;  %v6767_v37 = vpack.c.bf16 %v4136_v44, %v4032_v16 }
 0x416   :  { %v8965_v15 = vpop.permute.xlu0 %4114  ;;  %v4217_v39 = vpop.permute.xlu1 %4216 }
 0x417   :  { %v4137_v56 = vsel %vm784_vm6, %v4113_v11, %v8965_v15  ;;  %v4240_v30 = vsel %vm889_vm7, %v8893_v28, %v4217_v39 }
 0x418   :  { %3673 = vrot.lane.b32.xlu0 %v8802_v14, %s7145_s10  ;;  %3675 = vrot.lane.b32.xlu1 %v8808_v62, %s7145_s10  ;;  %v6765_v41 = vpack.c.bf16 %v4137_v56, %v4033_v19  ;;  %v6771_v12 = vpack.c.bf16 %v8543_v46, %v4240_v30 }
 0x41a   :  { %v8975_v61 = vpop.permute.xlu0 %4218  ;;  %v8977_v36 = vpop.permute.xlu1 %3906 }
 0x41b   :  { %v4241_v22 = vsel %vm889_vm7, %v4217_v39, %v8975_v61  ;;  %v3929_v52 = vsel %vm574_vm4, %v3905_v23, %v8977_v36 }
 0x41c   :  { %3779 = vrot.lane.b32.xlu0 %v8802_v14, %s7146_s11  ;;  %3781 = vrot.lane.b32.xlu1 %v8808_v62, %s7146_s11  ;;  %v6761_v2 = vpack.c.bf16 %v3929_v52, %v8693_v24  ;;  %v6769_v14 = vpack.c.bf16 %v8543_v46, %v4241_v22 }
 0x41e   :  { %6762 = vmatprep.subr.bf16.mxu0 %v6761_v2  ;;  %v9010_v24 = vpop.permute.xlu0 %3459  ;;  %v9012_v46 = vpop.permute.xlu1 %3563 }
 0x41f   :  { %6764 = vmatpush1.bf16.msra.mxu0 %v6763_v35 }
 0x420   :  { %3916 = vrot.lane.b32.xlu0 %v8808_v62, %s7147_s14  ;;  %3918 = vrot.lane.b32.xlu1 %v8880_v31, %s7147_s14 }
 0x421   :  { %6766 = vmatprep.subr.bf16.mxu0 %v6765_v41 }
 0x423   :  { %6768 = vmatpush1.bf16.msra.mxu0 %v6767_v37 }
 0x424   :  { %4020 = vrot.lane.b32.xlu0 %v8808_v62, %s7148_s17  ;;  %4022 = vrot.lane.b32.xlu1 %v8880_v31, %s7148_s17 }
 0x425   :  { %6770 = vmatprep.subr.bf16.mxu0 %v6769_v14 }
 0x427   :  { %6772 = vmatpush1.bf16.msra.mxu0 %v6771_v12 }
 0x428   :  { %4124 = vrot.lane.b32.xlu0 %v8808_v62, %s7149_s18  ;;  %4126 = vrot.lane.b32.xlu1 %v8880_v31, %s7149_s18 }
 0x42a   :  { %6145 = vmatmul.mubr.msk.f32.vlgmr.msra.gmra.mrb[18].mxu0 %vm1084_vm8, %v8856_v1 }
 0x42b   :  { %4796 = vmatprep.mubr.f32.mxu0 %v8557_v54  ;;  %v9022_v54 = vpop.permute.xlu0 %3667 }
 0x42c   :  { %4228 = vrot.lane.b32.xlu0 %v8808_v62, %s7151_s19  ;;  %4230 = vrot.lane.b32.xlu1 %v8880_v31, %s7151_s19  ;;  %v9024_v62 = vpop.permute.xlu1 %3773 }
 0x430   :  { %3469 = vrot.lane.b32.xlu0 %v8880_v31, %s7144_s6  ;;  %3471 = vrot.lane.b32.xlu1 %v8885_v27, %s7144_s6 }
 0x434   :  { %3573 = vrot.lane.b32.xlu0 %v8880_v31, %s7143_s5  ;;  %3575 = vrot.lane.b32.xlu1 %v8885_v27, %s7143_s5 }
 0x438   :  { %3677 = vrot.lane.b32.xlu0 %v8880_v31, %s7145_s10  ;;  %3679 = vrot.lane.b32.xlu1 %v8885_v27, %s7145_s10  ;;  %s7155_s10 = smov 88  }
 0x43a   :  { %v3462_v50 = vpop.permute.xlu0 %3461  ;;  %v9030_v32 = vpop.permute.xlu1 %4014 }
 0x43b   :  { %v3481_v60 = vsel %vm119_vm1, %v9010_v24, %v3462_v50 }
 0x43c   :  { %3783 = vrot.lane.b32.xlu0 %v8880_v31, %s7146_s11  ;;  %3785 = vrot.lane.b32.xlu1 %v8885_v27, %s7146_s11 }
 0x43e   :  { %v3566_v17 = vpop.permute.xlu0 %3565  ;;  %v9038_v45 = vpop.permute.xlu1 %3463 }
 0x43f   :  { %v3585_v57 = vsel %vm224_vm0, %v9012_v46, %v3566_v17  ;;  %v3482_v59 = vsel %vm119_vm1, %v3462_v50, %v9038_v45 }
 0x440   :  { %3920 = vrot.lane.b32.xlu0 %v8885_v27, %s7147_s14  ;;  %3922 = vrot.lane.b32.xlu1 %v8929_v20, %s7147_s14  ;;  %v6795_v23 = vpack.c.bf16 %v3585_v57, %v3481_v60  ;;  %s7157_s14 = smov 48  }
 0x442   :  { %v3670_v40 = vpop.permute.xlu0 %3669  ;;  %v9048_v31 = vpop.permute.xlu1 %3567 }
 0x443   :  { %v3689_v34 = vsel %vm329_vm2, %v9022_v54, %v3670_v40  ;;  %v3586_v51 = vsel %vm224_vm0, %v3566_v17, %v9048_v31 }
 0x444   :  { %4024 = vrot.lane.b32.xlu0 %v8885_v27, %s7148_s17  ;;  %4026 = vrot.lane.b32.xlu1 %v8929_v20, %s7148_s17  ;;  %v6793_v38 = vpack.c.bf16 %v3586_v51, %v3482_v59  ;;  %s7158_s17 = smov 68  }
 0x446   :  { %v3776_v55 = vpop.permute.xlu0 %3775  ;;  %v9058_v42 = vpop.permute.xlu1 %3671  ;;  %6794 = vmatprep.subr.bf16.mxu0 %v6793_v38 }
 0x447   :  { %v3797_v16 = vsel %vm438_vm3, %v9024_v62, %v3776_v55  ;;  %v3690_v11 = vsel %vm329_vm2, %v3670_v40, %v9058_v42  ;;  %6796 = vmatpush1.bf16.msra.mxu0 %v6795_v23 }
 0x448   :  { %4128 = vrot.lane.b32.xlu0 %v8885_v27, %s7149_s18  ;;  %4130 = vrot.lane.b32.xlu1 %v8929_v20, %s7149_s18  ;;  %v6799_v30 = vpack.c.bf16 %v3797_v16, %v3689_v34  ;;  %s7159_s18 = smov 28  }
 0x44a   :  { %v9068_v19 = vpop.permute.xlu0 %3910  ;;  %v9070_v44 = vpop.permute.xlu1 %3777 }
 0x44b   :  { %v3798_v39 = vsel %vm438_vm3, %v3776_v55, %v9070_v44  ;;  %v9110_v55 = vld [vmem:[#allocation4 + $0x440] sm:$0xff] }
 0x44c   :  { %4232 = vrot.lane.b32.xlu0 %v8885_v27, %s7151_s19  ;;  %4234 = vrot.lane.b32.xlu1 %v8929_v20, %s7151_s19  ;;  %v6797_v56 = vpack.c.bf16 %v3798_v39, %v3690_v11 }
 0x44e   :  { %v9078_v22 = vpop.permute.xlu0 %4118  ;;  %v4017_v52 = vpop.permute.xlu1 %4016  ;;  %6798 = vmatprep.subr.bf16.mxu0 %v6797_v56 }
 0x44f   :  { %v4036_v2 = vsel %vm679_vm5, %v9030_v32, %v4017_v52  ;;  %6800 = vmatpush1.bf16.msra.mxu0 %v6799_v30 }
 0x450   :  { %3787 = vrot.lane.b32.xlu0 %v8929_v20, %s7146_s11  ;;  %s7156_s11 = smov 108  }
 0x452   :  { %v3913_v35 = vpop.permute.xlu0 %3912  ;;  %v4121_v41 = vpop.permute.xlu1 %4120 }
 0x453   :  { %v3932_v27 = vsel %vm574_vm4, %v9068_v19, %v3913_v35  ;;  %v4140_v37 = vsel %vm784_vm6, %v9078_v22, %v4121_v41 }
 0x454   :  { %v6803_v17 = vpack.c.bf16 %v3932_v27, %v8761_v4  ;;  %v6807_v51 = vpack.c.bf16 %v4140_v37, %v4036_v2 }
 0x456   :  { %v9088_v14 = vpop.permute.xlu0 %4018  ;;  %v9090_v12 = vpop.permute.xlu1 %3914 }
 0x457   :  { %v4037_v50 = vsel %vm679_vm5, %v4017_v52, %v9088_v14  ;;  %v3933_v60 = vsel %vm574_vm4, %v3913_v35, %v9090_v12 }
 0x458   :  { %v6801_v20 = vpack.c.bf16 %v3933_v60, %v8766_v3 }
 0x45a   :  { %v9098_v57 = vpop.permute.xlu0 %4122  ;;  %v4225_v59 = vpop.permute.xlu1 %4224  ;;  %6802 = vmatprep.subr.bf16.mxu0 %v6801_v20 }
 0x45b   :  { %v4141_v40 = vsel %vm784_vm6, %v4121_v41, %v9098_v57  ;;  %6804 = vmatpush1.bf16.msra.mxu0 %v6803_v17  ;;  %v9132_v17 = vld [vmem:[#allocation2] sm:$0xff] }
 0x45c   :  { %v6805_v34 = vpack.c.bf16 %v4141_v40, %v4037_v50 }
 0x45e   :  { %v9102_v38 = vpop.permute.xlu0 %4226  ;;  %v9104_v23 = vpop.permute.xlu1 %4222  ;;  %6806 = vmatprep.subr.bf16.mxu0 %v6805_v34  ;;  %v4343_v34 = vld [vmem:[#allocation4 + $0x1f8] sm:$0xff] }
 0x45f   :  { %v4245_v3 = vsel %vm889_vm7, %v4225_v59, %v9102_v38  ;;  %v4244_v4 = vsel %vm889_vm7, %v9104_v23, %v4225_v59  ;;  %6808 = vmatpush1.bf16.msra.mxu0 %v6807_v51  ;;  %v4342_v51 = vld [vmem:[#allocation4 + $0x1f0] sm:$0xff] }
 0x460   :  { %v6809_v16 = vpack.c.bf16 %v9110_v55, %v4245_v3  ;;  %v6811_v11 = vpack.c.bf16 %v9110_v55, %v4244_v4 }
 0x462   :  { %v3450_v39 = vpop.permute.xlu0 %3449  ;;  %v3554_v56 = vpop.permute.xlu1 %3553  ;;  %6810 = vmatprep.subr.bf16.mxu0 %v6809_v16 }
 0x463   :  { %v3475_v30 = vsel %vm119_vm1, %v8755_v48, %v3450_v39  ;;  %v3476_v52 = vsel %vm119_vm1, %v3450_v39, %v8849_v58  ;;  %v3579_v2 = vsel %vm224_vm0, %v8763_v25, %v3554_v56  ;;  %v3580_v35 = vsel %vm224_vm0, %v3554_v56, %v8851_v9  ;;  %6812 = vmatpush1.bf16.msra.mxu0 %v6811_v11 }
 0x464   :  { %v6733_v41 = vpack.c.bf16 %v3580_v35, %v3476_v52  ;;  %v6735_v27 = vpack.c.bf16 %v3579_v2, %v3475_v30 }
 0x466   :  { %v3658_v37 = vpop.permute.xlu0 %3657  ;;  %v3764_v50 = vpop.permute.xlu1 %3763  ;;  %6734 = vmatprep.subr.bf16.mxu1 %v6733_v41  ;;  %6147 = vmatmul.mubr.msk.f32.vlgmr.msra.gmra.mrb[20].mxu0 %vm1084_vm8, %v8856_v1 }
 0x467   :  { %v3683_v48 = vsel %vm329_vm2, %v8777_v63, %v3658_v37  ;;  %v3684_v58 = vsel %vm329_vm2, %v3658_v37, %v8869_v18  ;;  %v3791_v25 = vsel %vm438_vm3, %v8785_v26, %v3764_v50  ;;  %v3792_v9 = vsel %vm438_vm3, %v3764_v50, %v8871_v6  ;;  %6736 = vmatpush1.bf16.msra.mxu1 %v6735_v27 }
 0x468   :  { %v6737_v60 = vpack.c.bf16 %v3792_v9, %v3684_v58  ;;  %v6739_v20 = vpack.c.bf16 %v3791_v25, %v3683_v48  ;;  %4938 = vmatprep.mubr.f32.mxu0 %v9132_v17 }
 0x46a   :  { %v3901_v59 = vpop.permute.xlu0 %3900  ;;  %v4005_v40 = vpop.permute.xlu1 %4004  ;;  %6738 = vmatprep.subr.bf16.mxu1 %v6737_v60  ;;  %v4347_v60 = vld [vmem:[#allocation4 + $0x218] sm:$0xff] }
 0x46b   :  { %v3926_v63 = vsel %vm574_vm4, %v8827_v47, %v3901_v59  ;;  %v3927_v18 = vsel %vm574_vm4, %v3901_v59, %v8923_v10  ;;  %v4030_v26 = vsel %vm679_vm5, %v8799_v7, %v4005_v40  ;;  %v4031_v6 = vsel %vm679_vm5, %v4005_v40, %v8877_v0  ;;  %6740 = vmatpush1.bf16.msra.mxu1 %v6739_v20 }
 0x46c   :  { %v6741_v3 = vpack.c.bf16 %v3927_v18, %v4343_v34  ;;  %v6743_v4 = vpack.c.bf16 %v3926_v63, %v4342_v51  ;;  %v4346_v63 = vld [vmem:[#allocation4 + $0x210] sm:$0xff] }
 0x46e   :  { %v4109_v16 = vpop.permute.xlu0 %4108  ;;  %v4213_v11 = vpop.permute.xlu1 %4212  ;;  %6742 = vmatprep.subr.bf16.mxu1 %v6741_v3 }
 0x46f   :  { %v4134_v47 = vsel %vm784_vm6, %v8816_v49, %v4109_v16  ;;  %v4135_v10 = vsel %vm784_vm6, %v4109_v16, %v8937_v43  ;;  %v4238_v7 = vsel %vm889_vm7, %v8825_v53, %v4213_v11  ;;  %v4239_v0 = vsel %vm889_vm7, %v4213_v11, %v8893_v28  ;;  %6744 = vmatpush1.bf16.msra.mxu1 %v6743_v4 }
 0x470   :  { %v6745_v39 = vpack.c.bf16 %v4135_v10, %v4031_v6  ;;  %v6747_v56 = vpack.c.bf16 %v4134_v47, %v4030_v26  ;;  %v6749_v2 = vpack.c.bf16 %v9110_v55, %v4239_v0  ;;  %v6751_v41 = vpack.c.bf16 %v9110_v55, %v4238_v7 }
 0x472   :  { %v3458_v30 = vpop.permute.xlu0 %3457  ;;  %v3562_v52 = vpop.permute.xlu1 %3561  ;;  %6746 = vmatprep.subr.bf16.mxu1 %v6745_v39 }
 0x473   :  { %v3479_v49 = vsel %vm119_vm1, %v8901_v29, %v3458_v30  ;;  %v3480_v43 = vsel %vm119_vm1, %v3458_v30, %v9010_v24  ;;  %v3583_v53 = vsel %vm224_vm0, %v8913_v21, %v3562_v52  ;;  %v3584_v28 = vsel %vm224_vm0, %v3562_v52, %v9012_v46  ;;  %6748 = vmatpush1.bf16.msra.mxu1 %v6747_v56 }
 0x474   :  { %6750 = vmatprep.subr.bf16.mxu1 %v6749_v2  ;;  %v6773_v35 = vpack.c.bf16 %v3584_v28, %v3480_v43  ;;  %v6775_v48 = vpack.c.bf16 %v3583_v53, %v3479_v49 }
 0x476   :  { %v3666_v27 = vpop.permute.xlu0 %3665  ;;  %v3772_v37 = vpop.permute.xlu1 %3771 }
 0x477   :  { %v3687_v50 = vsel %vm329_vm2, %v8925_v5, %v3666_v27  ;;  %v3688_v29 = vsel %vm329_vm2, %v3666_v27, %v9022_v54  ;;  %v3795_v24 = vsel %vm438_vm3, %v8939_v8, %v3772_v37  ;;  %v3796_v21 = vsel %vm438_vm3, %v3772_v37, %v9024_v62  ;;  %6752 = vmatpush1.bf16.msra.mxu1 %v6751_v41 }
 0x478   :  { %6774 = vmatprep.subr.bf16.mxu1 %v6773_v35  ;;  %v6777_v46 = vpack.c.bf16 %v3796_v21, %v3688_v29  ;;  %v6779_v9 = vpack.c.bf16 %v3795_v24, %v3687_v50  ;;  %v4350_v35 = vld [vmem:[#allocation4 + $0x230] sm:$0xff] }
 0x47a   :  { %v3909_v58 = vpop.permute.xlu0 %3908  ;;  %v4013_v25 = vpop.permute.xlu1 %4012  ;;  %6144 = vmatmul.mubr.msk.f32.vlgmr.msra.gmra.mrb[16].mxu1 %vm1084_vm8, %v8856_v1 }
 0x47b   :  { %v3930_v5 = vsel %vm574_vm4, %v8977_v36, %v3909_v58  ;;  %v3931_v54 = vsel %vm574_vm4, %v3909_v58, %v9068_v19  ;;  %v4034_v8 = vsel %vm679_vm5, %v8955_v33, %v4013_v25  ;;  %v4035_v62 = vsel %vm679_vm5, %v4013_v25, %v9030_v32  ;;  %6776 = vmatpush1.bf16.msra.mxu1 %v6775_v48 }
 0x47c   :  { %6778 = vmatprep.subr.bf16.mxu1 %v6777_v46  ;;  %4725 = vmatprep.mubr.f32.mxu1 %v9132_v17  ;;  %v6781_v40 = vpack.c.bf16 %v3931_v54, %v4347_v60  ;;  %v6783_v18 = vpack.c.bf16 %v3930_v5, %v4346_v63 }
 0x47e   :  { %v4117_v20 = vpop.permute.xlu0 %4116  ;;  %v4221_v59 = vpop.permute.xlu1 %4220 }
 0x47f   :  { %v4138_v36 = vsel %vm784_vm6, %v8965_v15, %v4117_v20  ;;  %v4139_v19 = vsel %vm784_vm6, %v4117_v20, %v9078_v22  ;;  %v4242_v33 = vsel %vm889_vm7, %v8975_v61, %v4221_v59  ;;  %v4243_v32 = vsel %vm889_vm7, %v4221_v59, %v9104_v23  ;;  %6780 = vmatpush1.bf16.msra.mxu1 %v6779_v9 }
 0x480   :  { %6782 = vmatprep.subr.bf16.mxu1 %v6781_v40  ;;  %v6785_v34 = vpack.c.bf16 %v4139_v19, %v4035_v62  ;;  %v6787_v61 = vpack.c.bf16 %v4138_v36, %v4034_v8  ;;  %v6789_v23 = vpack.c.bf16 %v9110_v55, %v4243_v32 }
 0x482   :  { %v3466_v26 = vpop.permute.xlu0 %3465  ;;  %v9188_v6 = vpop.permute.xlu1 %3467 }
 0x483   :  { %v3483_v15 = vsel %vm119_vm1, %v9038_v45, %v3466_v26  ;;  %v3484_v22 = vsel %vm119_vm1, %v3466_v26, %v9188_v6  ;;  %6784 = vmatpush1.bf16.msra.mxu1 %v6783_v18  ;;  %v6791_v45 = vpack.c.bf16 %v9110_v55, %v4242_v33 }
 0x484   :  { %6786 = vmatprep.subr.bf16.mxu1 %v6785_v34 }
 0x486   :  { %v3570_v51 = vpop.permute.xlu0 %3569  ;;  %v9194_v3 = vpop.permute.xlu1 %3571 }
 0x487   :  { %v3587_v4 = vsel %vm224_vm0, %v9048_v31, %v3570_v51  ;;  %v3588_v16 = vsel %vm224_vm0, %v3570_v51, %v9194_v3  ;;  %6788 = vmatpush1.bf16.msra.mxu1 %v6787_v61 }
 0x488   :  { %6790 = vmatprep.subr.bf16.mxu1 %v6789_v23  ;;  %v6813_v10 = vpack.c.bf16 %v3588_v16, %v3484_v22  ;;  %v6815_v31 = vpack.c.bf16 %v3587_v4, %v3483_v15 }
 0x48a   :  { %v3674_v11 = vpop.permute.xlu0 %3673  ;;  %v9202_v47 = vpop.permute.xlu1 %3675 }
 0x48b   :  { %v3691_v7 = vsel %vm329_vm2, %v9058_v42, %v3674_v11  ;;  %v3692_v0 = vsel %vm329_vm2, %v3674_v11, %v9202_v47  ;;  %6792 = vmatpush1.bf16.msra.mxu1 %v6791_v45 }
 0x48c   :  { %6814 = vmatprep.subr.bf16.mxu1 %v6813_v10  ;;  %v4352_v10 = vld [vmem:[#allocation4 + $0x240] sm:$0xff] }
 0x48e   :  { %v3780_v39 = vpop.permute.xlu0 %3779  ;;  %v9208_v56 = vpop.permute.xlu1 %3781  ;;  %6146 = vmatmul.mubr.msk.f32.vlgmr.msra.gmra.mrb[18].mxu1 %vm1084_vm8, %v8856_v1 }
 0x48f   :  { %v3799_v30 = vsel %vm438_vm3, %v9070_v44, %v3780_v39  ;;  %v3800_v52 = vsel %vm438_vm3, %v3780_v39, %v9208_v56  ;;  %6816 = vmatpush1.bf16.msra.mxu1 %v6815_v31  ;;  %4867 = vmatprep.mubr.f32.mxu1 %v9132_v17  ;;  %v4351_v44 = vld [vmem:[#allocation4 + $0x238] sm:$0xff] }
 0x490   :  { %v6817_v42 = vpack.c.bf16 %v3800_v52, %v3692_v0  ;;  %v6819_v2 = vpack.c.bf16 %v3799_v30, %v3691_v7 }
 0x492   :  { %v3917_v49 = vpop.permute.xlu0 %3916  ;;  %v9217_v43 = vpop.permute.xlu1 %3918  ;;  %6818 = vmatprep.subr.bf16.mxu1 %v6817_v42 }
 0x493   :  { %v3934_v53 = vsel %vm574_vm4, %v9090_v12, %v3917_v49  ;;  %v3935_v28 = vsel %vm574_vm4, %v3917_v49, %v9217_v43  ;;  %6820 = vmatpush1.bf16.msra.mxu1 %v6819_v2 }
 0x494   :  { %v6821_v41 = vpack.c.bf16 %v3935_v28, %v4351_v44  ;;  %v6823_v27 = vpack.c.bf16 %v3934_v53, %v4350_v35 }
 0x496   :  { %v4021_v37 = vpop.permute.xlu0 %4020  ;;  %v9223_v50 = vpop.permute.xlu1 %4022  ;;  %6822 = vmatprep.subr.bf16.mxu1 %v6821_v41 }
 0x497   :  { %v4038_v29 = vsel %vm679_vm5, %v9088_v14, %v4021_v37  ;;  %v4039_v24 = vsel %vm679_vm5, %v4021_v37, %v9223_v50  ;;  %6824 = vmatpush1.bf16.msra.mxu1 %v6823_v27 }
 0x49a   :  { %v4125_v12 = vpop.permute.xlu0 %4124  ;;  %v9229_v21 = vpop.permute.xlu1 %4126 }
 0x49b   :  { %v4142_v46 = vsel %vm784_vm6, %v9098_v57, %v4125_v12  ;;  %v4143_v48 = vsel %vm784_vm6, %v4125_v12, %v9229_v21 }
 0x49c   :  { %v6825_v58 = vpack.c.bf16 %v4143_v48, %v4039_v24  ;;  %v6827_v25 = vpack.c.bf16 %v4142_v46, %v4038_v29  ;;  %v7090_v46 = vld [vmem:[%s9337_s2 + $0x10] sm:$0xff] }
 0x49d   :  { %v6930_v48 = vld [vmem:[#allocation5 + $0x20] ss:$60 sps:$4 sm:$0xff]  }
 0x49e   :  { %v4229_v5 = vpop.permute.xlu0 %4228  ;;  %v9235_v54 = vpop.permute.xlu1 %4230  ;;  %6826 = vmatprep.subr.bf16.mxu1 %v6825_v58 }
 0x49f   :  { %v4246_v14 = vsel %vm889_vm7, %v9102_v38, %v4229_v5  ;;  %v4247_v8 = vsel %vm889_vm7, %v4229_v5, %v9235_v54  ;;  %6828 = vmatpush1.bf16.msra.mxu1 %v6827_v25 }
 0x4a0   :  { %v6829_v62 = vpack.c.bf16 %v9110_v55, %v4247_v8  ;;  %v6831_v57 = vpack.c.bf16 %v9110_v55, %v4246_v14  ;;  %v4354_v14 = vld [vmem:[#allocation4 + $0x250] sm:$0xff] }
 0x4a2   :  { %v3470_v9 = vpop.permute.xlu0 %3469  ;;  %v3472_v60 = vpop.permute.xlu1 %3471  ;;  %6830 = vmatprep.subr.bf16.mxu1 %v6829_v62 }
 0x4a3   :  { %v3485_v20 = vsel %vm119_vm1, %v9188_v6, %v3470_v9  ;;  %v3486_v59 = vsel %vm119_vm1, %v3470_v9, %v3472_v60  ;;  %3516 = vst.msk [vmem:[#allocation4 + $0x70] sm:$0xff] %vm52_vm9, %v3472_v60  ;;  %6832 = vmatpush1.bf16.msra.mxu1 %v6831_v57  ;;  %v6936_v9 = vld [vmem:[#allocation5 + $0x98] ss:$60 sps:$4 sm:$0xff]  }
 0x4a4   :  { %6853 = vmatprep.subr.bf16.mxu1 %v7153_v13  ;;  %v6944_v60 = vld [vmem:[#allocation5 + $0x114] ss:$60 sps:$4 sm:$0xff]  }
 0x4a6   :  { %v3574_v38 = vpop.permute.xlu0 %3573  ;;  %v3576_v40 = vpop.permute.xlu1 %3575  ;;  %6148 = vmatmul.mubr.msk.f32.vlgmr.msra.gmra.mrb[20].mxu1 %vm1084_vm8, %v8856_v1 }
 0x4a7   :  { %v3589_v36 = vsel %vm224_vm0, %v9194_v3, %v3574_v38  ;;  %v3590_v19 = vsel %vm224_vm0, %v3574_v38, %v3576_v40  ;;  %3620 = vst.msk [vmem:[#allocation4 + $0xe8] sm:$0xff] %vm52_vm9, %v3576_v40  ;;  %6380 = vmatprep.mubr.msk.f32.mxu1 %vm7154_vm10, %v9132_v17  ;;  %v4429_v38 = vld [vmem:[#allocation4 + $0x4a8] sm:$0xff] }
 0x4a8   :  { %v6833_v33 = vpack.c.bf16 %v3590_v19, %v3486_v59  ;;  %v6835_v32 = vpack.c.bf16 %v3589_v36, %v3485_v20  ;;  %v4431_v36 = vld [vmem:[#allocation2 + $0x10] sm:$0xff] }
 0x4a9   :  { %v6917_v19 = vld [vmem:[#allocation5 + $0x4] ss:$60 sps:$4 sm:$0xff]  }
 0x4aa   :  { %v3678_v63 = vpop.permute.xlu0 %3677  ;;  %v3680_v18 = vpop.permute.xlu1 %3679  ;;  %6834 = vmatprep.subr.bf16.mxu0 %v6833_v33  ;;  %v4294_v15 = vld [vmem:[#allocation4 + $0x70] sm:$0xff] }
 0x4ab   :  { %v3693_v26 = vsel %vm329_vm2, %v9202_v47, %v3678_v63  ;;  %v3694_v1 = vsel %vm329_vm2, %v3678_v63, %v3680_v18  ;;  %3724 = vst.msk [vmem:[#allocation4 + $0x160] sm:$0xff] %vm52_vm9, %v3680_v18  ;;  %6836 = vmatpush1.bf16.msra.mxu0 %v6835_v32  ;;  %v4353_v47 = vld [vmem:[#allocation4 + $0x248] sm:$0xff]  ;;  %v6942_v32 = vld [vmem:[#allocation5 + $0x110] ss:$60 sps:$4 sm:$0xff]  }
 0x4ac   :  { %v6949_v63 = vld [vmem:[#allocation5 + $0x18c] ss:$60 sps:$4 sm:$0xff]  }
 0x4ae   :  { %v3784_v6 = vpop.permute.xlu0 %3783  ;;  %v3786_v34 = vpop.permute.xlu1 %3785  ;;  %v4309_v22 = vld [vmem:[#allocation4 + $0xe8] sm:$0xff] }
 0x4af   :  { %v3801_v17 = vsel %vm438_vm3, %v9208_v56, %v3784_v6  ;;  %v3802_v61 = vsel %vm438_vm3, %v3784_v6, %v3786_v34  ;;  %v6854_v51 = vpack.c.bf16 %v4309_v22, %v4294_v15  ;;  %v6947_v6 = vld [vmem:[#allocation5 + $0x188] ss:$60 sps:$4 sm:$0xff]   ;;  %v6923_v15 = vld [vmem:[#allocation5 + $0xf4] ss:$60 sps:$4 sm:$0xff]   ;;  %v6953_v22 = vld [vmem:[#allocation5 + $0x200] ss:$60 sps:$4 sm:$0xff]  }
 0x4b0   :  { %v6837_v3 = vpack.c.bf16 %v3802_v61, %v3694_v1  ;;  %v6839_v23 = vpack.c.bf16 %v3801_v17, %v3693_v26  ;;  %v6915_v26 = vld [vmem:[#allocation5] ss:$60 sps:$4 sm:$0xff]   ;;  %v6921_v61 = vld [vmem:[#allocation5 + $0xf0] ss:$60 sps:$4 sm:$0xff]  }
 0x4b1   :  { %6855 = vmatpush3.bf16.msra.mxu1 %v6854_v51  ;;  %v6920_v1 = vld [vmem:[#allocation5 + $0x7c] ss:$60 sps:$4 sm:$0xff]   ;;  %v6926_v51 = vld [vmem:[#allocation5 + $0x16c] ss:$60 sps:$4 sm:$0xff]  }
 0x4b2   :  { %v3921_v4 = vpop.permute.xlu0 %3920  ;;  %v3923_v16 = vpop.permute.xlu1 %3922  ;;  %6838 = vmatprep.subr.bf16.mxu0 %v6837_v3  ;;  %6856 = vmatprep.subr.bf16.mxu1 %v7153_v13  ;;  %v4324_v58 = vld [vmem:[#allocation4 + $0x160] sm:$0xff]  ;;  %v6961_v17 = vld [vmem:[#allocation5 + $0x27c] ss:$60 sps:$4 sm:$0xff]  }
 0x4b3   :  { %v3936_v45 = vsel %vm574_vm4, %v9217_v43, %v3921_v4  ;;  %v3937_v11 = vsel %vm574_vm4, %v3921_v4, %v3923_v16  ;;  %3967 = vst.msk [vmem:[#allocation4 + $0x2c8] sm:$0xff] %vm52_vm9, %v3923_v16  ;;  %6840 = vmatpush1.bf16.msra.mxu0 %v6839_v23  ;;  %v6959_v3 = vld [vmem:[#allocation5 + $0x278] ss:$60 sps:$4 sm:$0xff]   ;;  %v5146_v4 = vld [vmem:[#allocation5 + $0x368] sm:$0xff] }
 0x4b4   :  { %v6841_v7 = vpack.c.bf16 %v3937_v11, %v4353_v47  ;;  %v6843_v0 = vpack.c.bf16 %v3936_v45, %v4352_v10  ;;  %v6967_v23 = vld [vmem:[#allocation5 + $0x2f4] ss:$60 sps:$4 sm:$0xff]   ;;  %v6924_v16 = vld [vmem:[#allocation5 + $0x168] ss:$60 sps:$4 sm:$0xff]   ;;  %v6265_v47 = vcombine.high %v5146_v4, %v5146_v4 }
 0x4b5   :  { %v6929_v45 = vld [vmem:[#allocation5 + $0x1e4] ss:$60 sps:$4 sm:$0xff]   ;;  %v6965_v11 = vld [vmem:[#allocation5 + $0x2f0] ss:$60 sps:$4 sm:$0xff]  }
 0x4b6   :  { %v4025_v31 = vpop.permute.xlu0 %4024  ;;  %v4027_v39 = vpop.permute.xlu1 %4026  ;;  %6842 = vmatprep.subr.bf16.mxu0 %v6841_v7 }
 0x4b7   :  { %v4040_v56 = vsel %vm679_vm5, %v9223_v50, %v4025_v31  ;;  %v4041_v30 = vsel %vm679_vm5, %v4025_v31, %v4027_v39  ;;  %4071 = vst.msk [vmem:[#allocation4 + $0x340] sm:$0xff] %vm52_vm9, %v4027_v39  ;;  %6844 = vmatpush1.bf16.msra.mxu0 %v6843_v0  ;;  %v6932_v50 = vld [vmem:[#allocation5 + $0x24] ss:$60 sps:$4 sm:$0xff]   ;;  %v6935_v31 = vld [vmem:[#allocation5 + $0x25c] ss:$60 sps:$4 sm:$0xff]   ;;  %v6264_v39 = vcombine.low %v5146_v4, %v5146_v4 }
 0x4b8   :  { %v6927_v0 = vld [vmem:[#allocation5 + $0x1e0] ss:$60 sps:$4 sm:$0xff]  }
 0x4b9   :  { %v7007_v4 = vld [vmem:[#allocation5 + $0x284] ss:$60 sps:$4 sm:$0xff]  }
 0x4ba   :  { %v4129_v52 = vpop.permute.xlu0 %4128  ;;  %v4131_v42 = vpop.permute.xlu1 %4130 }
 0x4bb   :  { %v4144_v2 = vsel %vm784_vm6, %v9229_v21, %v4129_v52  ;;  %v4145_v49 = vsel %vm784_vm6, %v4129_v52, %v4131_v42  ;;  %4175 = vst.msk [vmem:[#allocation4 + $0x3b8] sm:$0xff] %vm52_vm9, %v4131_v42  ;;  %v6941_v52 = vld [vmem:[#allocation5 + $0x2d4] ss:$60 sps:$4 sm:$0xff]   ;;  %v5142_v42 = vld [vmem:[#allocation5 + $0x348] sm:$0xff] }
 0x4bc   :  { %v6845_v43 = vpack.c.bf16 %v4145_v49, %v4041_v30  ;;  %v6847_v53 = vpack.c.bf16 %v4144_v2, %v4040_v56  ;;  %v6978_v56 = vld [vmem:[#allocation5 + $0x2c] ss:$60 sps:$4 sm:$0xff]   ;;  %v6933_v30 = vld [vmem:[#allocation5 + $0x258] ss:$60 sps:$4 sm:$0xff]   ;;  %v6257_v49 = vcombine.high %v5142_v42, %v5142_v42 }
 0x4bd   :  { %v6939_v2 = vld [vmem:[#allocation5 + $0x2d0] ss:$60 sps:$4 sm:$0xff]  }
 0x4be   :  { %v4233_v28 = vpop.permute.xlu0 %4232  ;;  %v4235_v44 = vpop.permute.xlu1 %4234  ;;  %6846 = vmatprep.subr.bf16.mxu0 %v6845_v43  ;;  %v4384_v8 = vld [vmem:[#allocation4 + $0x340] sm:$0xff]  ;;  %v6256_v43 = vcombine.low %v5142_v42, %v5142_v42 }
 0x4bf   :  { %v4248_v35 = vsel %vm889_vm7, %v9235_v54, %v4233_v28  ;;  %v4249_v41 = vsel %vm889_vm7, %v4233_v28, %v4235_v44  ;;  %4279 = vst.msk [vmem:[#allocation4 + $0x430] sm:$0xff] %vm52_vm9, %v4235_v44  ;;  %6848 = vmatpush1.bf16.msra.mxu0 %v6847_v53  ;;  %v4369_v54 = vld [vmem:[#allocation4 + $0x2c8] sm:$0xff]  ;;  %v6952_v53 = vld [vmem:[#allocation5 + $0xc] ss:$60 sps:$4 sm:$0xff]  }
 0x4c0   :  { %v6849_v27 = vpack.c.bf16 %v9110_v55, %v4249_v41  ;;  %v6851_v37 = vpack.c.bf16 %v9110_v55, %v4248_v35  ;;  %v6938_v55 = vld [vmem:[#allocation5 + $0x9c] ss:$60 sps:$4 sm:$0xff]   ;;  %v6860_v57 = vpack.c.bf16 %v4369_v54, %v4354_v14  ;;  %v6950_v35 = vld [vmem:[#allocation5 + $0x8] ss:$60 sps:$4 sm:$0xff]  }
 0x4c1   :  { %v9282_v29 = vpop.f32.mrb[16].mxu0  ;;  %v4430_v28 = vld [vmem:[#allocation2 + $0x8] sm:$0xff]  ;;  %v6976_v14 = vld [vmem:[#allocation5 + $0x28] ss:$60 sps:$4 sm:$0xff]  }
 0x4c2   :  { %v3788_v24 = vpop.permute.xlu0 %3787  ;;  %v4516_v12 = vpop.f32.mrb[17].mxu0  ;;  %6850 = vmatprep.subr.bf16.mxu0 %v6849_v27  ;;  %v4399_v62 = vld [vmem:[#allocation4 + $0x3b8] sm:$0xff]  ;;  %v4515_v44 = vadd.f32 %v9282_v29, %v4430_v28  ;;  %v6958_v27 = vld [vmem:[#allocation5 + $0x84] ss:$60 sps:$4 sm:$0xff]   ;;  %v7011_v42 = vld [vmem:[#allocation5 + $0x2f8] ss:$60 sps:$4 sm:$0xff]  }
 0x4c3   :  { %v3803_v21 = vsel %vm438_vm3, %v3786_v34, %v3788_v24  ;;  %6852 = vmatpush1.bf16.msra.mxu0 %v6851_v37  ;;  %v6863_v20 = vpack.c.bf16 %v4399_v62, %v4384_v8  ;;  %v4517_v33 = vadd.f32 %v4516_v12, %v4431_v36  ;;  %v6955_v34 = vld [vmem:[#allocation5 + $0x204] ss:$60 sps:$4 sm:$0xff]   ;;  %v6962_v24 = vld [vmem:[#allocation5 + $0xf8] ss:$60 sps:$4 sm:$0xff]  }
 0x4c4   :  { %3833 = vst.msk [vmem:[#allocation4 + $0x1d8] sm:$0xff] %vm52_vm9, %v3803_v21  ;;  %5914 = vmatprep.subr.bf16.mxu0 %v6932_v50  ;;  %v5015_v41 = vpack.c.bf16 %v4515_v44, %v4515_v44  ;;  %v6956_v37 = vld [vmem:[#allocation5 + $0x80] ss:$60 sps:$4 sm:$0xff]   ;;  %v6970_v12 = vld [vmem:[#allocation5 + $0x174] ss:$60 sps:$4 sm:$0xff]  }
 0x4c5   :  { %v5016_v18 = vpack.c.bf16 %v4517_v33, %v4517_v33  ;;  %v6964_v50 = vld [vmem:[#allocation5 + $0xfc] ss:$60 sps:$4 sm:$0xff]   ;;  %v6968_v21 = vld [vmem:[#allocation5 + $0x170] ss:$60 sps:$4 sm:$0xff]   ;;  %v6984_v62 = vld [vmem:[#allocation5 + $0xa4] ss:$60 sps:$4 sm:$0xff]  }
 0x4c6   :  { %6149 = vmatmul.mubr.msk.f32.vlgmr.msra.gmra.mrb[22].mxu0 %vm1084_vm8, %v7090_v46  ;;  %v4414_v59 = vld [vmem:[#allocation4 + $0x430] sm:$0xff]  ;;  %v6988_v36 = vld [vmem:[#allocation5 + $0x118] ss:$60 sps:$4 sm:$0xff]  }
 0x4c7   :  { %v6866_v40 = vpack.c.bf16 %v4429_v38, %v4414_v59  ;;  %v6979_v59 = vld [vmem:[#allocation5 + $0x260] ss:$60 sps:$4 sm:$0xff]   ;;  %v4433_v33 = vld [vmem:[#allocation2 + $0x20] sm:$0xff] }
 0x4c8   :  { %v6987_v38 = vld [vmem:[#allocation5 + $0x2dc] ss:$60 sps:$4 sm:$0xff]   ;;  %v7024_v28 = vld [vmem:[#allocation5 + $0x34] ss:$60 sps:$4 sm:$0xff]  }
 0x4c9   :  { %v7014_v44 = vld [vmem:[#allocation5 + $0x178] ss:$60 sps:$4 sm:$0xff]  }
 0x4cb   :  { %v4339_v25 = vld [vmem:[#allocation4 + $0x1d8] sm:$0xff] }
 0x4cc   :  { %v6857_v5 = vpack.c.bf16 %v4339_v25, %v4324_v58  ;;  %5915 = vmatpush1.bf16.xpose.msra.mxu0 %v6930_v48  ;;  %v4438_v48 = vld [vmem:[#allocation2 + $0x48] sm:$0xff]  ;;  %v4439_v58 = vld [vmem:[#allocation2 + $0x50] sm:$0xff] }
 0x4cd   :  { %5916 = vmatprep.subr.bf16.mxu0 %v6938_v55 }
 0x4ce   :  { %6858 = vmatpush3.bf16.msra.mxu1 %v6857_v5 }
 0x4cf   :  { %6859 = vmatprep.subr.bf16.mxu1 %v7153_v13 }
 0x4d2   :  { %6861 = vmatpush3.bf16.msra.mxu1 %v6860_v57  ;;  %v6973_v57 = vld [vmem:[#allocation5 + $0x1e8] ss:$60 sps:$4 sm:$0xff]  }
 0x4d3   :  { %6862 = vmatprep.subr.bf16.mxu1 %v7153_v13 }
 0x4d4   :  { %5917 = vmatpush1.bf16.xpose.msra.mxu0 %v6936_v9  ;;  %v6981_v9 = vld [vmem:[#allocation5 + $0x264] ss:$60 sps:$4 sm:$0xff]  }
 0x4d5   :  { %5918 = vmatprep.subr.bf16.mxu0 %v6944_v60  ;;  %v6982_v60 = vld [vmem:[#allocation5 + $0xa0] ss:$60 sps:$4 sm:$0xff]  }
 0x4d6   :  { %6864 = vmatpush3.bf16.msra.mxu1 %v6863_v20  ;;  %v6990_v20 = vld [vmem:[#allocation5 + $0x11c] ss:$60 sps:$4 sm:$0xff]  }
 0x4d7   :  { %6865 = vmatprep.subr.bf16.mxu1 %v7153_v13  ;;  %v6918_v13 = vld [vmem:[#allocation5 + $0x78] ss:$60 sps:$4 sm:$0xff]  }
 0x4da   :  { %6867 = vmatpush3.bf16.msra.mxu1 %v6866_v40 }
 0x4db   :  { %5754 = vmatprep.subr.bf16.mxu1 %v6917_v19  ;;  %v5143_v19 = vld [vmem:[#allocation5 + $0x350] sm:$0xff] }
 0x4dc   :  { %5919 = vmatpush1.bf16.xpose.msra.mxu0 %v6942_v32 }
 0x4dd   :  { %6381 = vmatmul.mubr.msk.f32.vlgmr.msra.gmra.mrb[22].mxu1 %vm1084_vm8, %v7090_v46  ;;  %5920 = vmatprep.subr.bf16.mxu0 %v6949_v63  ;;  %v6975_v46 = vld [vmem:[#allocation5 + $0x1ec] ss:$60 sps:$4 sm:$0xff]   ;;  %v6995_v63 = vld [vmem:[#allocation5 + $0x194] ss:$60 sps:$4 sm:$0xff]  }
 0x4de   :  { %5786 = vmatprep.mubr.bf16.mxu1 %v5016_v18  ;;  %v6985_v18 = vld [vmem:[#allocation5 + $0x2d8] ss:$60 sps:$4 sm:$0xff]  }
 0x4e3   :  { %5755 = vmatpush1.bf16.xpose.msra.mxu1 %v6915_v26 }
 0x4e4   :  { %5756 = vmatprep.subr.bf16.mxu1 %v6920_v1  ;;  %5921 = vmatpush1.bf16.xpose.msra.mxu0 %v6947_v6  ;;  %v6259_v1 = vcombine.high %v5143_v19, %v5143_v19 }
 0x4e5   :  { %5922 = vmatprep.subr.bf16.mxu0 %v6955_v34  ;;  %v6993_v34 = vld [vmem:[#allocation5 + $0x190] ss:$60 sps:$4 sm:$0xff]  }
 0x4eb   :  { %5757 = vmatpush1.bf16.xpose.msra.mxu1 %v6918_v13  ;;  %v7001_v13 = vld [vmem:[#allocation5 + $0x20c] ss:$60 sps:$4 sm:$0xff]  }
 0x4ec   :  { %5758 = vmatprep.subr.bf16.mxu1 %v6923_v15  ;;  %5923 = vmatpush1.bf16.xpose.msra.mxu0 %v6953_v22  ;;  %v6258_v15 = vcombine.low %v5143_v19, %v5143_v19  ;;  %v6998_v22 = vld [vmem:[#allocation5 + $0x14] ss:$60 sps:$4 sm:$0xff]   ;;  %v4443_v19 = vld [vmem:[#allocation2 + $0x70] sm:$0xff] }
 0x4ed   :  { %5924 = vmatprep.subr.bf16.mxu0 %v6961_v17  ;;  %v4432_v17 = vld [vmem:[#allocation2 + $0x18] sm:$0xff] }
 0x4f3   :  { %5759 = vmatpush1.bf16.xpose.msra.mxu1 %v6921_v61  ;;  %v4435_v61 = vld [vmem:[#allocation2 + $0x30] sm:$0xff] }
 0x4f4   :  { %5760 = vmatprep.subr.bf16.mxu1 %v6926_v51  ;;  %5925 = vmatpush1.bf16.xpose.msra.mxu0 %v6959_v3 }
 0x4f5   :  { %5926 = vmatprep.subr.bf16.mxu0 %v6967_v23  ;;  %v6999_v23 = vld [vmem:[#allocation5 + $0x208] ss:$60 sps:$4 sm:$0xff]  }
 0x4fb   :  { %5761 = vmatpush1.bf16.xpose.msra.mxu1 %v6924_v16  ;;  %v6996_v16 = vld [vmem:[#allocation5 + $0x10] ss:$60 sps:$4 sm:$0xff]  }
 0x4fc   :  { %5762 = vmatprep.subr.bf16.mxu1 %v6929_v45  ;;  %5927 = vmatpush1.bf16.xpose.msra.mxu0 %v6965_v11  ;;  %v7004_v11 = vld [vmem:[#allocation5 + $0x8c] ss:$60 sps:$4 sm:$0xff]  }
 0x4fd   :  { %v9294_v10 = vpop.f32.mrb[18].mxu0  ;;  %5928 = vmatprep.subr.bf16.mxu0 %v6265_v47 }
 0x4fe   :  { %v9296_v7 = vpop.f32.mrb[19].mxu0 }
 0x4ff   :  { %v4659_v3 = vadd.f32 %v9296_v7, %v4435_v61  ;;  %v7010_v7 = vld [vmem:[#allocation5 + $0x104] ss:$60 sps:$4 sm:$0xff]  }
 0x501   :  { %v5020_v47 = vpack.c.bf16 %v4659_v3, %v4659_v3  ;;  %v7048_v3 = vld [vmem:[#allocation5 + $0x90] ss:$60 sps:$4 sm:$0xff]  }
 0x503   :  { %5763 = vmatpush1.bf16.xpose.msra.mxu1 %v6927_v0 }
 0x504   :  { %5764 = vmatprep.subr.bf16.mxu1 %v6935_v31  ;;  %5929 = vmatpush1.bf16.xpose.msra.mxu0 %v6264_v39  ;;  %v7005_v39 = vld [vmem:[#allocation5 + $0x280] ss:$60 sps:$4 sm:$0xff]  }
 0x505   :  { %5954 = vmatprep.subr.bf16.mxu0 %v6978_v56  ;;  %v7013_v56 = vld [vmem:[#allocation5 + $0x2fc] ss:$60 sps:$4 sm:$0xff]  }
 0x50b   :  { %5765 = vmatpush1.bf16.xpose.msra.mxu1 %v6933_v30  ;;  %v7002_v30 = vld [vmem:[#allocation5 + $0x88] ss:$60 sps:$4 sm:$0xff]  }
 0x50c   :  { %5766 = vmatprep.subr.bf16.mxu1 %v6941_v52  ;;  %v5147_v52 = vld [vmem:[#allocation5 + $0x370] sm:$0xff] }
 0x513   :  { %5767 = vmatpush1.bf16.xpose.msra.mxu1 %v6939_v2  ;;  %v6267_v2 = vcombine.high %v5147_v52, %v5147_v52 }
 0x514   :  { %5768 = vmatprep.subr.bf16.mxu1 %v6257_v49  ;;  %v7008_v49 = vld [vmem:[#allocation5 + $0x100] ss:$60 sps:$4 sm:$0xff]  }
 0x51b   :  { %5769 = vmatpush1.bf16.xpose.msra.mxu1 %v6256_v43  ;;  %v7016_v43 = vld [vmem:[#allocation5 + $0x17c] ss:$60 sps:$4 sm:$0xff]  }
 0x51c   :  { %5794 = vmatprep.subr.bf16.mxu1 %v6952_v53  ;;  %v6266_v53 = vcombine.low %v5147_v52, %v5147_v52  ;;  %v4442_v52 = vld [vmem:[#allocation2 + $0x68] sm:$0xff] }
 0x522   :  { %5787 = vmatmul.mubr.bf16.vlgmr.msra.gmra.mrb[24].mxu1 %v5015_v41  ;;  %v4440_v41 = vld [vmem:[#allocation2 + $0x58] sm:$0xff] }
 0x523   :  { %5795 = vmatpush1.bf16.xpose.msra.mxu1 %v6950_v35  ;;  %v7021_v35 = vld [vmem:[#allocation5 + $0x1f4] ss:$60 sps:$4 sm:$0xff]  }
 0x524   :  { %5796 = vmatprep.subr.bf16.mxu1 %v6958_v27 }
 0x52b   :  { %5797 = vmatpush1.bf16.xpose.msra.mxu1 %v6956_v37 }
 0x52c   :  { %5798 = vmatprep.subr.bf16.mxu1 %v6964_v50  ;;  %v4441_v50 = vld [vmem:[#allocation2 + $0x60] sm:$0xff] }
 0x533   :  { %5799 = vmatpush1.bf16.xpose.msra.mxu1 %v6962_v24 }
 0x534   :  { %5800 = vmatprep.subr.bf16.mxu1 %v6970_v12 }
 0x539   :  { %v4798_v55 = vpop.f32.mrb[20].mxu0 }
 0x53a   :  { %v4799_v29 = vadd.f32 %v4798_v55, %v4438_v48  ;;  %v4800_v25 = vpop.f32.mrb[21].mxu0  ;;  %v7030_v55 = vld [vmem:[#allocation5 + $0xac] ss:$60 sps:$4 sm:$0xff]  }
 0x53b   :  { %5801 = vmatpush1.bf16.xpose.msra.mxu1 %v6968_v21  ;;  %v4801_v5 = vadd.f32 %v4800_v25, %v4439_v58  ;;  %v7027_v58 = vld [vmem:[#allocation5 + $0x26c] ss:$60 sps:$4 sm:$0xff]  }
 0x53c   :  { %5802 = vmatprep.subr.bf16.mxu1 %v6975_v46  ;;  %v5023_v8 = vpack.c.bf16 %v4799_v29, %v4799_v29  ;;  %v7022_v46 = vld [vmem:[#allocation5 + $0x30] ss:$60 sps:$4 sm:$0xff]   ;;  %v7028_v25 = vld [vmem:[#allocation5 + $0xa8] ss:$60 sps:$4 sm:$0xff]  }
 0x53d   :  { %v5024_v54 = vpack.c.bf16 %v4801_v5, %v4801_v5  ;;  %v7019_v29 = vld [vmem:[#allocation5 + $0x1f0] ss:$60 sps:$4 sm:$0xff]   ;;  %v7036_v5 = vld [vmem:[#allocation5 + $0x124] ss:$60 sps:$4 sm:$0xff]  }
 0x53f   :  { %5946 = vmatprep.mubr.bf16.mxu0 %v5024_v54  ;;  %v7025_v54 = vld [vmem:[#allocation5 + $0x268] ss:$60 sps:$4 sm:$0xff]  }
 0x540   :  { %5947 = vmatmul.mubr.bf16.vlgmr.msra.gmra.mrb[24].mxu0 %v5023_v8  ;;  %v7034_v8 = vld [vmem:[#allocation5 + $0x120] ss:$60 sps:$4 sm:$0xff]  }
 0x541   :  { %5955 = vmatpush1.bf16.xpose.msra.mxu0 %v6976_v14  ;;  %v7033_v14 = vld [vmem:[#allocation5 + $0x2e4] ss:$60 sps:$4 sm:$0xff]  }
 0x542   :  { %5956 = vmatprep.subr.bf16.mxu0 %v6984_v62  ;;  %v5144_v62 = vld [vmem:[#allocation5 + $0x358] sm:$0xff] }
 0x543   :  { %5803 = vmatpush1.bf16.xpose.msra.mxu1 %v6973_v57  ;;  %v7041_v57 = vld [vmem:[#allocation5 + $0x19c] ss:$60 sps:$4 sm:$0xff]  }
 0x544   :  { %5804 = vmatprep.subr.bf16.mxu1 %v6981_v9  ;;  %v7031_v9 = vld [vmem:[#allocation5 + $0x2e0] ss:$60 sps:$4 sm:$0xff]  }
 0x549   :  { %5957 = vmatpush1.bf16.xpose.msra.mxu0 %v6982_v60  ;;  %v6261_v60 = vcombine.high %v5144_v62, %v5144_v62 }
 0x54a   :  { %5958 = vmatprep.subr.bf16.mxu0 %v6990_v20  ;;  %v7039_v20 = vld [vmem:[#allocation5 + $0x198] ss:$60 sps:$4 sm:$0xff]  }
 0x54b   :  { %5805 = vmatpush1.bf16.xpose.msra.mxu1 %v6979_v59  ;;  %v7047_v59 = vld [vmem:[#allocation5 + $0x214] ss:$60 sps:$4 sm:$0xff]  }
 0x54c   :  { %5806 = vmatprep.subr.bf16.mxu1 %v6987_v38  ;;  %v6260_v38 = vcombine.low %v5144_v62, %v5144_v62 }
 0x54d   :  { %v4585_v40 = vpop.f32.mrb[16].mxu1 }
 0x54e   :  { %v4587_v32 = vpop.f32.mrb[17].mxu1  ;;  %v4586_v51 = vadd.f32 %v4585_v40, %v4432_v17  ;;  %v7044_v40 = vld [vmem:[#allocation5 + $0x1c] ss:$60 sps:$4 sm:$0xff]   ;;  %v7050_v17 = vld [vmem:[#allocation5 + $0x94] ss:$60 sps:$4 sm:$0xff]  }
 0x54f   :  { %v4588_v26 = vadd.f32 %v4587_v32, %v4433_v33  ;;  %v4434_v32 = vld [vmem:[#allocation2 + $0x28] sm:$0xff] }
 0x550   :  { %v5017_v45 = vpack.c.bf16 %v4586_v51, %v4586_v51  ;;  %v7051_v51 = vld [vmem:[#allocation5 + $0x288] ss:$60 sps:$4 sm:$0xff]  }
 0x551   :  { %v5018_v6 = vpack.c.bf16 %v4588_v26, %v4588_v26  ;;  %5959 = vmatpush1.bf16.xpose.msra.mxu0 %v6988_v36  ;;  %v4437_v26 = vld [vmem:[#allocation2 + $0x40] sm:$0xff] }
 0x552   :  { %5960 = vmatprep.subr.bf16.mxu0 %v6995_v63 }
 0x553   :  { %5807 = vmatpush1.bf16.xpose.msra.mxu1 %v6985_v18  ;;  %5826 = vmatprep.mubr.bf16.mxu1 %v5018_v6  ;;  %v4657_v18 = vadd.f32 %v9294_v10, %v4434_v32  ;;  %v7059_v10 = vld [vmem:[#allocation5 + $0x304] ss:$60 sps:$4 sm:$0xff]  }
 0x554   :  { %5808 = vmatprep.subr.bf16.mxu1 %v6259_v1 }
 0x559   :  { %5961 = vmatpush1.bf16.xpose.msra.mxu0 %v6993_v34  ;;  %v7045_v34 = vld [vmem:[#allocation5 + $0x210] ss:$60 sps:$4 sm:$0xff]  }
 0x55a   :  { %5962 = vmatprep.subr.bf16.mxu0 %v7001_v13  ;;  %v7053_v13 = vld [vmem:[#allocation5 + $0x28c] ss:$60 sps:$4 sm:$0xff]  }
 0x55b   :  { %5809 = vmatpush1.bf16.xpose.msra.mxu1 %v6258_v15  ;;  %v7042_v15 = vld [vmem:[#allocation5 + $0x18] ss:$60 sps:$4 sm:$0xff]  }
 0x55c   :  { %5834 = vmatprep.subr.bf16.mxu1 %v6998_v22  ;;  %v5019_v22 = vpack.c.bf16 %v4657_v18, %v4657_v18 }
 0x561   :  { %5963 = vmatpush1.bf16.xpose.msra.mxu0 %v6999_v23  ;;  %v9300_v0 = vpop.f32.mrb[18].mxu1  ;;  %v7056_v23 = vld [vmem:[#allocation5 + $0x10c] ss:$60 sps:$4 sm:$0xff]  }
 0x562   :  { %5827 = vmatmul.mubr.bf16.vlgmr.msra.gmra.mrb[24].mxu1 %v5017_v45  ;;  %v9302_v31 = vpop.f32.mrb[19].mxu1  ;;  %5964 = vmatprep.subr.bf16.mxu0 %v7007_v4  ;;  %v5148_v4 = vld [vmem:[#allocation5 + $0x378] sm:$0xff] }
 0x563   :  { %5835 = vmatpush1.bf16.xpose.msra.mxu1 %v6996_v16  ;;  %5866 = vmatprep.mubr.bf16.mxu1 %v5020_v47  ;;  %v4730_v1 = vadd.f32 %v9302_v31, %v4437_v26  ;;  %v7057_v16 = vld [vmem:[#allocation5 + $0x300] ss:$60 sps:$4 sm:$0xff]   ;;  %v6269_v45 = vcombine.high %v5148_v4, %v5148_v4 }
 0x564   :  { %5836 = vmatprep.subr.bf16.mxu1 %v7004_v11  ;;  %v7054_v11 = vld [vmem:[#allocation5 + $0x108] ss:$60 sps:$4 sm:$0xff]  }
 0x565   :  { %v5022_v61 = vpack.c.bf16 %v4730_v1, %v4730_v1  ;;  %v7062_v31 = vld [vmem:[#allocation5 + $0x184] ss:$60 sps:$4 sm:$0xff]  }
 0x569   :  { %5965 = vmatpush1.bf16.xpose.msra.mxu0 %v7005_v39 }
 0x56a   :  { %5966 = vmatprep.subr.bf16.mxu0 %v7013_v56  ;;  %v6268_v56 = vcombine.low %v5148_v4, %v5148_v4 }
 0x56b   :  { %5837 = vmatpush1.bf16.xpose.msra.mxu1 %v7002_v30  ;;  %v7060_v30 = vld [vmem:[#allocation5 + $0x180] ss:$60 sps:$4 sm:$0xff]  }
 0x56c   :  { %5838 = vmatprep.subr.bf16.mxu1 %v7010_v7  ;;  %v7067_v7 = vld [vmem:[#allocation5 + $0x1fc] ss:$60 sps:$4 sm:$0xff]  }
 0x571   :  { %5967 = vmatpush1.bf16.xpose.msra.mxu0 %v7011_v42 }
 0x572   :  { %5968 = vmatprep.subr.bf16.mxu0 %v6267_v2  ;;  %v7091_v2 = vld [vmem:[#allocation2] sm:$0xff] }
 0x573   :  { %5839 = vmatpush1.bf16.xpose.msra.mxu1 %v7008_v49  ;;  %v7068_v49 = vld [vmem:[#allocation5 + $0x38] ss:$60 sps:$4 sm:$0xff]  }
 0x574   :  { %5840 = vmatprep.subr.bf16.mxu1 %v7016_v43 }
 0x579   :  { %5969 = vmatpush1.bf16.xpose.msra.mxu0 %v6266_v53  ;;  %v4869_v27 = vpop.f32.mrb[20].mxu1  ;;  %v5731_v53 = vsel %vm52_vm9, %v7068_v49, 0 }
 0x57a   :  { %v4870_v37 = vadd.f32 %v4869_v27, %v4440_v41  ;;  %v4871_v24 = vpop.f32.mrb[21].mxu1  ;;  %5994 = vmatprep.subr.bf16.mxu0 %v7024_v28  ;;  %v7065_v28 = vld [vmem:[#allocation5 + $0x1f8] ss:$60 sps:$4 sm:$0xff]   ;;  %v7069_v27 = vld [vmem:[#allocation5 + $0x270] ss:$60 sps:$4 sm:$0xff]  }
 0x57b   :  { %5841 = vmatpush1.bf16.xpose.msra.mxu1 %v7014_v44  ;;  %v4872_v12 = vadd.f32 %v4871_v24, %v4441_v50  ;;  %v7071_v44 = vld [vmem:[#allocation5 + $0x274] ss:$60 sps:$4 sm:$0xff]   ;;  %v7076_v50 = vld [vmem:[#allocation5 + $0x128] ss:$60 sps:$4 sm:$0xff]  }
 0x57c   :  { %5842 = vmatprep.subr.bf16.mxu1 %v7021_v35  ;;  %v5025_v48 = vpack.c.bf16 %v4870_v37, %v4870_v37  ;;  %v7072_v35 = vld [vmem:[#allocation5 + $0xb0] ss:$60 sps:$4 sm:$0xff]   ;;  %v5145_v24 = vld [vmem:[#allocation5 + $0x360] sm:$0xff] }
 0x57d   :  { %v5026_v21 = vpack.c.bf16 %v4872_v12, %v4872_v12  ;;  %v5734_v41 = vsel %vm52_vm9, %v7072_v35, 0  ;;  %v7075_v37 = vld [vmem:[#allocation5 + $0x2ec] ss:$60 sps:$4 sm:$0xff]   ;;  %v5737_v12 = vsel %vm52_vm9, %v7076_v50, 0 }
 0x57f   :  { %5986 = vmatprep.mubr.bf16.mxu0 %v5026_v21  ;;  %v7073_v21 = vld [vmem:[#allocation5 + $0x2e8] ss:$60 sps:$4 sm:$0xff]  }
 0x580   :  { %5987 = vmatmul.mubr.bf16.vlgmr.msra.gmra.mrb[24].mxu0 %v5025_v48  ;;  %v7079_v48 = vld [vmem:[#allocation5 + $0x1a0] ss:$60 sps:$4 sm:$0xff]  }
 0x581   :  { %5995 = vmatpush1.bf16.xpose.msra.mxu0 %v7022_v46  ;;  %v6263_v46 = vcombine.high %v5145_v24, %v5145_v24 }
 0x582   :  { %5996 = vmatprep.subr.bf16.mxu0 %v7030_v55  ;;  %v5740_v55 = vsel %vm52_vm9, %v7079_v48, 0 }
 0x583   :  { %5843 = vmatpush1.bf16.xpose.msra.mxu1 %v7019_v29  ;;  %v6262_v29 = vcombine.low %v5145_v24, %v5145_v24 }
 0x584   :  { %5844 = vmatprep.subr.bf16.mxu1 %v7027_v58  ;;  %v7080_v58 = vld [vmem:[#allocation5 + $0x218] ss:$60 sps:$4 sm:$0xff]  }
 0x589   :  { %5997 = vmatpush1.bf16.xpose.msra.mxu0 %v7028_v25  ;;  %v4436_v25 = vld [vmem:[#allocation2 + $0x38] sm:$0xff] }
 0x58a   :  { %5998 = vmatprep.subr.bf16.mxu0 %v7036_v5  ;;  %v4728_v5 = vadd.f32 %v9300_v0, %v4436_v25  ;;  %v4444_v0 = vld [vmem:[#allocation2 + $0x78] sm:$0xff] }
 0x58b   :  { %5845 = vmatpush1.bf16.xpose.msra.mxu1 %v7025_v54  ;;  %v5743_v54 = vsel %vm52_vm9, %v7080_v58, 0 }
 0x58c   :  { %5846 = vmatprep.subr.bf16.mxu1 %v7033_v14  ;;  %v5021_v14 = vpack.c.bf16 %v4728_v5, %v4728_v5 }
 0x591   :  { %5999 = vmatpush1.bf16.xpose.msra.mxu0 %v7034_v8  ;;  %v7081_v8 = vld [vmem:[#allocation5 + $0x290] ss:$60 sps:$4 sm:$0xff]  }
 0x592   :  { %6000 = vmatprep.subr.bf16.mxu0 %v7041_v57  ;;  %v5746_v62 = vsel %vm52_vm9, %v7081_v8, 0  ;;  %v7082_v57 = vld [vmem:[#allocation5 + $0x308] ss:$60 sps:$4 sm:$0xff]  }
 0x593   :  { %5847 = vmatpush1.bf16.xpose.msra.mxu1 %v7031_v9  ;;  %v5749_v9 = vsel %vm52_vm9, %v7082_v57, 0 }
 0x594   :  { %5848 = vmatprep.subr.bf16.mxu1 %v6261_v60  ;;  %v7083_v60 = vld [vmem:[#allocation5 + $0x380] ss:$0 sps:$4 sm:$0xff]  }
 0x599   :  { %6001 = vmatpush1.bf16.xpose.msra.mxu0 %v7039_v20  ;;  %v4940_v36 = vpop.f32.mrb[22].mxu0  ;;  %v5752_v20 = vsel %vm52_vm9, %v7083_v60, 0 }
 0x59a   :  { %v4942_v33 = vpop.f32.mrb[23].mxu0  ;;  %6002 = vmatprep.subr.bf16.mxu0 %v7047_v59  ;;  %v4941_v42 = vadd.f32 %v4940_v36, %v4442_v52 }
 0x59b   :  { %5849 = vmatpush1.bf16.xpose.msra.mxu1 %v6260_v38  ;;  %v4943_v63 = vadd.f32 %v4942_v33, %v4443_v19 }
 0x59c   :  { %5874 = vmatprep.subr.bf16.mxu1 %v7044_v40  ;;  %v5027_v43 = vpack.c.bf16 %v4941_v42, %v4941_v42 }
 0x59d   :  { %v5028_v6 = vpack.c.bf16 %v4943_v63, %v4943_v63 }
 0x59f   :  { %6026 = vmatprep.mubr.bf16.mxu0 %v5028_v6 }
 0x5a1   :  { %6003 = vmatpush1.bf16.xpose.msra.mxu0 %v7045_v34 }
 0x5a2   :  { %5867 = vmatmul.mubr.bf16.vlgmr.msra.gmra.mrb[24].mxu1 %v5019_v22  ;;  %6004 = vmatprep.subr.bf16.mxu0 %v7053_v13 }
 0x5a3   :  { %5875 = vmatpush1.bf16.xpose.msra.mxu1 %v7042_v15  ;;  %5906 = vmatprep.mubr.bf16.mxu1 %v5022_v61 }
 0x5a4   :  { %5876 = vmatprep.subr.bf16.mxu1 %v7050_v17  ;;  %v6124_v17 = vld [vmem:[%s9337_s2 + $0x18] sm:$0xff]  ;;  %s7114_s2 = scalar_lea.vmem %s6116_s7, 32 }
 0x5a5   :  { %p7115_p8 = scmp.ne.s32.totalorder %s6116_s7, %s7114_s2  ;;  %p7120_p10 = scmp.lt.s32.totalorder %s7114_s2, %s7114_s2 }
 0x5a7   :  { %p7121_p11 = por %p7120_p10, %p7119_p9 }
 0x5a9   :  { %6005 = vmatpush1.bf16.xpose.msra.mxu0 %v7051_v51  ;;  %p7122_p12 = pnand %p7121_p11, %p7115_p8 }
 0x5aa   :  { %6006 = vmatprep.subr.bf16.mxu0 %v7059_v10 }
 0x5ab   :  { %5877 = vmatpush1.bf16.xpose.msra.mxu1 %v7048_v3 }
 0x5ac   :  { %5878 = vmatprep.subr.bf16.mxu1 %v7056_v23 }
 0x5b0   :  { %v9306_v47 = vpop.f32.mrb[22].mxu1 }
 0x5b1   :  { %6007 = vmatpush1.bf16.xpose.msra.mxu0 %v7057_v16  ;;  %v6382_v39 = vpop.f32.mrb[23].mxu1  ;;  %v5012_v59 = vadd.f32 %v9306_v47, %v4444_v0 }
 0x5b2   :  { %6008 = vmatprep.subr.bf16.mxu0 %v6269_v45 }
 0x5b3   :  { %5879 = vmatpush1.bf16.xpose.msra.mxu1 %v7054_v11  ;;  %v5029_v38 = vpack.c.bf16 %v5012_v59, %v5012_v59 }
 0x5b4   :  { %5880 = vmatprep.subr.bf16.mxu1 %v7062_v31 }
 0x5b9   :  { %6009 = vmatpush1.bf16.xpose.msra.mxu0 %v6268_v56 }
 0x5ba   :  { %6383 = vmatprep.subr.bf16.mxu0 %v7091_v2 }
 0x5bb   :  { %5881 = vmatpush1.bf16.xpose.msra.mxu1 %v7060_v30 }
 0x5bc   :  { %5882 = vmatprep.subr.bf16.mxu1 %v7067_v7 }
 0x5c0   :  { %6027 = vmatmul.mubr.bf16.vlgmr.msra.gmra.mrb[24].mxu0 %v5027_v43 }
 0x5c1   :  { %6384 = vmatpush3.bf16.xpose.msra.mxu0 %v5731_v53  ;;  %6399 = vmatprep.mubr.msk.bf16.mxu0 %vm7154_vm10, %v7091_v2 }
 0x5c2   :  { %6385 = vmatprep.subr.bf16.mxu0 %v7091_v2 }
 0x5c3   :  { %5883 = vmatpush1.bf16.xpose.msra.mxu1 %v7065_v28 }
 0x5c4   :  { %5884 = vmatprep.subr.bf16.mxu1 %v7071_v44 }
 0x5c9   :  { %6386 = vmatpush3.bf16.xpose.msra.mxu0 %v5734_v41 }
 0x5ca   :  { %6387 = vmatprep.subr.bf16.mxu0 %v7091_v2 }
 0x5cb   :  { %5885 = vmatpush1.bf16.xpose.msra.mxu1 %v7069_v27 }
 0x5cc   :  { %5886 = vmatprep.subr.bf16.mxu1 %v7075_v37 }
 0x5d1   :  { %6388 = vmatpush3.bf16.xpose.msra.mxu0 %v5737_v12 }
 0x5d2   :  { %6389 = vmatprep.subr.bf16.mxu0 %v7091_v2 }
 0x5d3   :  { %5887 = vmatpush1.bf16.xpose.msra.mxu1 %v7073_v21 }
 0x5d4   :  { %5888 = vmatprep.subr.bf16.mxu1 %v6263_v46 }
 0x5d9   :  { %6390 = vmatpush3.bf16.xpose.msra.mxu0 %v5740_v55 }
 0x5da   :  { %6391 = vmatprep.subr.bf16.mxu0 %v7091_v2 }
 0x5db   :  { %5889 = vmatpush1.bf16.xpose.msra.mxu1 %v6262_v29 }
 0x5e1   :  { %6392 = vmatpush3.bf16.xpose.msra.mxu0 %v5743_v54 }
 0x5e2   :  { %5907 = vmatmul.mubr.bf16.vlgmr.msra.gmra.mrb[24].mxu1 %v5021_v14  ;;  %6393 = vmatprep.subr.bf16.mxu0 %v7091_v2 }
 0x5e9   :  { %6394 = vmatpush3.bf16.xpose.msra.mxu0 %v5746_v62 }
 0x5ea   :  { %6395 = vmatprep.subr.bf16.mxu0 %v7091_v2 }
 0x5f1   :  { %6396 = vmatpush3.bf16.xpose.msra.mxu0 %v5749_v9 }
 0x5f2   :  { %6397 = vmatprep.subr.bf16.mxu0 %v7091_v2 }
 0x5f9   :  { %6398 = vmatpush3.bf16.xpose.msra.mxu0 %v5752_v20 }
 0x600   :  { %6400 = vmatmul.mubr.msk.bf16.vlgmr.msra.gmra.mrb[24].mxu0 %vm52_vm9, %v5029_v38 }
 0x6b5   :  { %v5908_v40 = vpop.f32.mrb[24].mxu1 }
 0x6b6   :  { %v5910_v36 = vpop.f32.mrb[25].mxu1 }
 0x6b7   :  { %v5911_v19 = vpop.f32.mrb[26].mxu1 }
 0x6b8   :  { %v5912_v33 = vpop.f32.mrb[27].mxu1 }
 0x6d3   :  { %v6068_v32 = vpop.f32.mrb[24].mxu0 }
 0x6d4   :  { %v6868_v63 = vadd.f32 %v6068_v32, %v5908_v40  ;;  %v6401_v18 = vpop.f32.mrb[25].mxu0 }
 0x6d5   :  { %v6071_v26 = vpop.f32.mrb[26].mxu0 }
 0x6d6   :  { %v6402_v1 = vpop.f32.mrb[27].mxu0  ;;  %v6081_v6 = vrot.slane %v6868_v63, 2  ;;  %v6076_v34 = vrot.slane %v6868_v63, 1  ;;  %v6091_v13 = vrot.slane %v6868_v63, 4  ;;  %v6086_v15 = vrot.slane %v6868_v63, 3 }
 0x6d7   :  { %v6096_v22 = vrot.slane %v6868_v63, 5  ;;  %v6074_v61 = vadd.f32 %v6868_v63, %v6124_v17 }
 0x6d8   :  { %6082 = vrot.lane.b32.xlu0 %v6081_v6, %s7155_s10  ;;  %6077 = vrot.lane.b32.xlu1 %v6076_v34, %s7156_s11 }
 0x6dc   :  { %6092 = vrot.lane.b32.xlu0 %v6091_v13, %s7157_s14  ;;  %6087 = vrot.lane.b32.xlu1 %v6086_v15, %s7158_s17 }
 0x6e0   :  { %6097 = vrot.lane.b32.xlu1 %v6096_v22, %s7159_s18 }
 0x74a   :  { %v6083_v51 = vpop.permute.xlu0 %6082  ;;  %v6078_v10 = vpop.permute.xlu1 %6077 }
 0x74b   :  { %v6080_v3 = vadd.f32 %v6078_v10, %v6074_v61 }
 0x74d   :  { %v6085_v23 = vadd.f32 %v6083_v51, %v6080_v3 }
 0x74e   :  { %v6088_v4 = vpop.permute.xlu1 %6087  ;;  %v6093_v45 = vpop.permute.xlu0 %6092 }
 0x74f   :  { %v6090_v16 = vadd.f32 %v6088_v4, %v6085_v23 }
 0x751   :  { %v6095_v11 = vadd.f32 %v6093_v45, %v6090_v16 }
 0x752   :  { %v6098_v47 = vpop.permute.xlu1 %6097 }
 0x753   :  { %v6100_v31 = vadd.f32 %v6098_v47, %v6095_v11 }
 0x755   :  { %v6101_v39 = vmax.f32 %v6100_v31, 0.0 }
 0x757   :  { %6105 = vrot.lane.b32.xlu0 %v6101_v39, %s7160_s29  ;;  %6103 = vst.msk [vmem:[#allocation8] sm:$0x1] %vm6102_vm12, %v6101_v39 }
 0x7c9   :  { %v6106_v56 = vpop.permute.xlu0 %6105 }
 0x7ca   :  { %6108 = vst.msk [vmem:[#allocation8 + $0x1] sm:$0x1] %vm6102_vm12, %v6106_v56 }
 0x7cb   :  { %7125 = shalt.err (!%p7122_p12)
}
 0x7cc   :  { %s7126_s9 = scalar_lea.hbm %s9339_s4, 32 }
 0x7cd   :  { %p7127_p13 = scmp.ne.s32.totalorder %s9339_s4, %s7126_s9  ;;  %p7130_p0 = scmp.lt.u32.totalorder %s7126_s9, %s9339_s4 }
 0x7cf   :  { %p7132_p1 = pnand %p7130_p0, %p7127_p13 }
 0x7d1   :  { %7135 = shalt.err (!%p7132_p1)
}
 0x7d2   :  { %6118 = dma.vmem_to_hbm [thread:$0]  %s6116_s7, 32, %s9339_s4, [#allocation7]  }
 0x7d3   :  { %7138 = dma.done.wait [#allocation7], 32  }
 0x7d4   :  { %7139 = vsyncadd [#allocation7], 4294967264 }
 0x7d5   :  { %6122 = vsyncpa [#allocation6], 1 }
 0x7d6   :  { %6123 = vsyncpa [#allocation7], 1 }

</bundles_post_ra>
